<compile_context>
chip_gen: v6e
topology: v6e:2x2x1
jax: 0.10.0
libtpu: 0.0.40
codegen_flags: <defaults>
</compile_context>

<pallas_src>
import functools
import math

import jax
import jax.numpy as jnp
from jax.experimental import pallas as pl
from jax.experimental.pallas import tpu as pltpu

BN_EPS = 1e-5
EXPANSION = 4

# 512x512 output tiles => arithmetic intensity ~256 flop/bf16-byte (above the
# v5e/v7x ridge); full-K weight panels (<= 4608) stay resident in VMEM.
TM_MAX, TN_MAX = 512, 512
K_FULL_MAX = 4608          # contract dim kept un-tiled up to here (all of ResNet-50)
TK_FALLBACK = 2048         # only used if K > K_FULL_MAX (never hit here)


def _vmem_limit_bytes():
    # v7x: 64 MiB physical VMEM per TensorCore; v5e/v6e: 128 MiB.
    try:
        cap = pltpu.get_tpu_info().vmem_capacity_bytes
    except Exception:
        cap = 64 * 1024 * 1024
    return max(32 * 1024 * 1024, min(96 * 1024 * 1024, int(cap * 0.7)))


VMEM_LIMIT = _vmem_limit_bytes()


# --------------------------------------------------------------------------
# helpers
# --------------------------------------------------------------------------
def _ru(x, m):
    return ((x + m - 1) // m) * m


def _fit2d(x, rows, cols):
    """Slice/zero-pad a 2-D array to exactly (rows, cols); no-op if it fits."""
    r, c = x.shape
    if r == rows and c == cols:
        return x
    x = x[:min(r, rows), :min(c, cols)]
    return jnp.pad(x, ((0, rows - x.shape[0]), (0, cols - x.shape[1])))


# --------------------------------------------------------------------------
# Pallas kernels
# --------------------------------------------------------------------------
def _make_mm_kernel(apply_relu, has_residual):
    """C = A @ B (f32 accumulate) + shift [+ residual] [ReLU].  The folded BN
    scale lives inside B, so the epilogue is add/select only."""
    def kernel(*refs):
        if has_residual:
            x_ref, w_ref, sh_ref, res_ref, o_ref, acc_ref = refs
        else:
            x_ref, w_ref, sh_ref, o_ref, acc_ref = refs
            res_ref = None
        k = pl.program_id(2)
        prod = jnp.dot(x_ref[...], w_ref[...],
                       preferred_element_type=jnp.float32)

        @pl.when(k == 0)
        def _():
            acc_ref[...] = prod            # write, no memset-then-add

        @pl.when(k != 0)
        def _():
            acc_ref[...] += prod

        @pl.when(k == pl.num_programs(2) - 1)
        def _():
            y = acc_ref[...] + sh_ref[...]
            if has_residual:
                y = y + res_ref[...].astype(jnp.float32)
            if apply_relu:
                y = jnp.maximum(y, 0.0)
            o_ref[...] = y.astype(o_ref.dtype)

    return kernel


def fused_matmul(x, w, shift, residual=None, relu=True, out_dtype=jnp.bfloat16):
    """act((x @ w) + shift [+ residual]) as one gridded Pallas matmul.

    Inputs may already be zero-padded beyond their logical extent (padded
    channels multiply zero-padded weight rows, so no stripping is required
    between consecutive 1x1 convolutions).  Returns the PADDED (Mp, Np)
    result; callers slice only where a spatial reshape is needed.
    """
    m_in, k_in = x.shape
    k_w, n = w.shape

    kp = _ru(max(k_in, k_w, 128), 128)
    if kp <= K_FULL_MAX:
        tk = kp                                 # weight panel resident, one k step
    else:
        tk = TK_FALLBACK
        kp = _ru(kp, tk)
    np_ = _ru(max(n, 128), 128)
    tn = min(TN_MAX, np_)
    np_ = _ru(np_, tn)
    mp = _ru(max(m_in, 8), 8)
    tm = min(TM_MAX, mp)
    mp = _ru(mp, tm)

    xp = _fit2d(x, mp, kp).astype(jnp.bfloat16)
    wp = _fit2d(w, kp, np_).astype(jnp.bfloat16)
    sh = _fit2d(shift.reshape(1, -1).astype(jnp.float32), 1, np_)

    args = [xp, wp, sh]
    in_specs = [
        pl.BlockSpec((tm, tk), lambda i, j, k: (i, k)),
        pl.BlockSpec((tk, tn), lambda i, j, k: (k, j)),
        pl.BlockSpec((1, tn), lambda i, j, k: (0, j)),
    ]
    has_res = residual is not None
    if has_res:
        args.append(_fit2d(residual, mp, np_).astype(jnp.bfloat16))
        in_specs.append(pl.BlockSpec((tm, tn), lambda i, j, k: (i, j)))

    gm, gn, gk = mp // tm, np_ // tn, kp // tk
    out_itemsize = 2 if out_dtype == jnp.bfloat16 else 4
    flops = 2 * mp * kp * np_
    bytes_accessed = (
        (mp * kp * 2) * (gn if gk > 1 else 1)      # A panels (resident across j if gk==1)
        + (kp * np_ * 2) * gm                      # B panels, re-fetched per i block
        + mp * np_ * out_itemsize                  # output
        + (mp * np_ * 2 if has_res else 0)         # residual stream
        + 4 * np_ * gm)                            # shift row

    out = pl.pallas_call(
        _make_mm_kernel(apply_relu=relu, has_residual=has_res),
        out_shape=jax.ShapeDtypeStruct((mp, np_), out_dtype),
        grid_spec=pltpu.PrefetchScalarGridSpec(
            num_scalar_prefetch=0,
            grid=(gm, gn, gk),
            in_specs=in_specs,
            out_specs=pl.BlockSpec((tm, tn), lambda i, j, k: (i, j)),
            scratch_shapes=[pltpu.VMEM((tm, tn), jnp.float32)],
        ),
        compiler_params=pltpu.CompilerParams(
            dimension_semantics=("parallel", "parallel", "arbitrary"),
            vmem_limit_bytes=VMEM_LIMIT,
        ),
        cost_estimate=pl.CostEstimate(flops=flops, transcendentals=0,
                                      bytes_accessed=int(bytes_accessed)),
    )(*args)
    return out


def _avgpool_kernel(x_ref, o_ref):
    o_ref[...] = jnp.mean(x_ref[...].astype(jnp.float32), axis=1)


def global_avg_pool(x):
    """AdaptiveAvgPool2d((1,1)) + flatten -> (N, C) float32 (tiny tensor;
    whole-array VMEM residency is fine here)."""
    n, h, w, c = x.shape
    return pl.pallas_call(
        _avgpool_kernel,
        out_shape=jax.ShapeDtypeStruct((n, c), jnp.float32),
        in_specs=[pl.BlockSpec(memory_space=pltpu.MemorySpace.VMEM)],
        out_specs=pl.BlockSpec(memory_space=pltpu.MemorySpace.VMEM),
        compiler_params=pltpu.CompilerParams(vmem_limit_bytes=VMEM_LIMIT),
    )(x.reshape(n, h * w, c))


# --------------------------------------------------------------------------
# glue: pooling, conv lowering, folded BN, activation bookkeeping
# --------------------------------------------------------------------------
def maxpool_3x3_s2(x):
    """nn.MaxPool2d(kernel_size=3, stride=2, padding=1) on NHWC.

    A tree of jnp.maximum over the 9 strided taps of the zero-padded input:
    XLA fuses this into a single pass, no (9, M, C) HBM intermediate.
    Zero padding is equivalent to -inf padding ONLY because the input is
    post-ReLU (non-negative) -- do not reorder this after a non-ReLU op."""
    n, h, w, c = x.shape
    ho = (h + 2 - 3) // 2 + 1
    wo = (w + 2 - 3) // 2 + 1
    xp = jnp.pad(x, ((0, 0), (1, 1), (1, 1), (0, 0)))
    out = None
    for kh in range(3):
        for kw in range(3):
            tap = xp[:, kh:kh + 2 * (ho - 1) + 1:2,
                     kw:kw + 2 * (wo - 1) + 1:2, :]
            out = tap if out is None else jnp.maximum(out, tap)
    return out


def _conv_patches(x, ksize, stride, padding):
    """im2col for a dense KxK conv on NHWC -> (N*Ho*Wo, K*K*C)."""
    n, h, w, c = x.shape
    ho = (h + 2 * padding - ksize) // stride + 1
    wo = (w + 2 * padding - ksize) // stride + 1
    xp = jnp.pad(x, ((0, 0), (padding, padding), (padding, padding), (0, 0)))
    cols = [xp[:, kh:kh + (ho - 1) * stride + 1:stride,
               kw:kw + (wo - 1) * stride + 1:stride, :]
            for kh in range(ksize) for kw in range(ksize)]
    patches = jnp.concatenate(cols, axis=-1)          # (N, Ho, Wo, K*K*C)
    return patches.reshape(n * ho * wo, ksize * ksize * c), (n, ho, wo)


def _fold_bn(bn):
    """Eval-mode BatchNorm2d folded into per-channel scale/shift."""
    inv = 1.0 / jnp.sqrt(bn["var"] + BN_EPS)
    scale = bn["gamma"] * inv
    shift = bn["beta"] - bn["mean"] * scale
    return scale, shift


def _conv_wmat_bn(w_oihw, bn):
    """PyTorch Conv2d weight (Cout,Cin,kh,kw) -> (kh*kw*Cin, Cout) matrix with
    the folded BN scale already multiplied in (host-side, static)."""
    scale, shift = _fold_bn(bn)
    cout, cin, kh, kw = w_oihw.shape
    wm = jnp.transpose(w_oihw, (2, 3, 1, 0)).reshape(kh * kw * cin, cout)
    return wm * scale[None, :], shift


# activations between layers are carried as padded (Mp, Cp) 2-D slabs plus
# their logical (n, h, w, c) dims; padded channels are zero, padded rows are
# don't-care (they never contaminate valid rows in a matmul).
def _act(data, n, h, w, c):
    return dict(data=data, n=n, h=h, w=w, c=c)


def _spatial(act):
    d = act["data"][:act["n"] * act["h"] * act["w"], :act["c"]]
    return d.reshape(act["n"], act["h"], act["w"], act["c"])


# --------------------------------------------------------------------------
# parameters
# --------------------------------------------------------------------------
def _init_conv(key, cout, cin, k):
    fan_in = cin * k * k
    bound = math.sqrt(1.0 / fan_in)
    return jax.random.uniform(key, (cout, cin, k, k), jnp.float32,
                              -bound, bound)


def _init_bn(c):
    return dict(gamma=jnp.ones((c,), jnp.float32),
                beta=jnp.zeros((c,), jnp.float32),
                mean=jnp.zeros((c,), jnp.float32),
                var=jnp.ones((c,), jnp.float32))


def _init_bottleneck(key, cin, width, stride):
    ks = jax.random.split(key, 4)
    p = dict(
        stride=stride,
        conv1=_init_conv(ks[0], width, cin, 1), bn1=_init_bn(width),
        conv2=_init_conv(ks[1], width, width, 3), bn2=_init_bn(width),
        conv3=_init_conv(ks[2], width * EXPANSION, width, 1),
        bn3=_init_bn(width * EXPANSION),
    )
    if stride != 1 or cin != width * EXPANSION:
        p["down_conv"] = _init_conv(ks[3], width * EXPANSION, cin, 1)
        p["down_bn"] = _init_bn(width * EXPANSION)
    return p


def init_encoder_params(key, in_ch=3, base_width=64, blocks=(3, 4, 6, 3),
                        use_bottleneck=False, bottleneck_dim=256):
    params = {}
    key, k = jax.random.split(key)
    params["conv1"] = _init_conv(k, base_width, in_ch, 7)
    params["bn1"] = _init_bn(base_width)

    cin = base_width
    stages = []
    for si, nblocks in enumerate(blocks):
        width = base_width * (2 ** si)
        stage = []
        for bi in range(nblocks):
            key, k = jax.random.split(key)
            stride = 2 if (si > 0 and bi == 0) else 1
            stage.append(_init_bottleneck(k, cin, width, stride))
            cin = width * EXPANSION
        stages.append(stage)
    params["stages"] = stages

    if use_bottleneck:
        key, k = jax.random.split(key)
        params["bottleneck_w"] = (math.sqrt(2.0 / (cin + bottleneck_dim)) *
                                  jax.random.normal(k, (cin, bottleneck_dim),
                                                    jnp.float32))
        params["bottleneck_b"] = jnp.zeros((bottleneck_dim,), jnp.float32)
        params["out_features"] = bottleneck_dim
    else:
        params["out_features"] = cin
    return params


# --------------------------------------------------------------------------
# forward
# --------------------------------------------------------------------------
def bottleneck_forward(act, p):
    stride = p["stride"]
    n, h, w, cin = act["n"], act["h"], act["w"], act["c"]
    width = p["conv1"].shape[0]

    # 1x1 reduce + BN + ReLU: consumes the padded (M, C) activation directly.
    wm, sh = _conv_wmat_bn(p["conv1"], p["bn1"])
    out = fused_matmul(act["data"], wm, sh, relu=True)

    # 3x3 conv (carries the stride, torchvision ResNet v1.5) + BN + ReLU.
    # TODO(synk): implicit in-kernel 9-tap GEMM instead of glue-side im2col.
    out_sp = _spatial(_act(out, n, h, w, width))
    patches, (n2, h2, w2) = _conv_patches(out_sp, 3, stride, 1)
    wm, sh = _conv_wmat_bn(p["conv2"], p["bn2"])
    out = fused_matmul(patches, wm, sh, relu=True)

    # shortcut: identity (already padded to the right (Mp, Cp)) or strided
    # 1x1 projection + BN (no ReLU).
    if "down_conv" in p:
        xs = _spatial(act)
        if stride != 1:
            xs = xs[:, ::stride, ::stride, :]
        wm, sh = _conv_wmat_bn(p["down_conv"], p["down_bn"])
        identity = fused_matmul(xs.reshape(n2 * h2 * w2, cin), wm, sh,
                                relu=False)
    else:
        identity = act["data"]

    # 1x1 expand + BN + residual add + ReLU, all fused in the matmul epilogue.
    wm, sh = _conv_wmat_bn(p["conv3"], p["bn3"])
    out = fused_matmul(out, wm, sh, residual=identity, relu=True)
    return _act(out, n2, h2, w2, width * EXPANSION)


def encoder_forward(x_nchw, params):
    """Encoder.forward: feature_layers(x) -> view(N, -1) [-> bottleneck]."""
    x = jnp.transpose(x_nchw, (0, 2, 3, 1)).astype(jnp.bfloat16)  # NCHW->NHWC

    # conv1 (7x7, s2, p3, bias=False) + BN + ReLU as one fused tiled matmul.
    patches, (n, h, w) = _conv_patches(x, 7, 2, 3)
    wm, sh = _conv_wmat_bn(params["conv1"], params["bn1"])
    out = fused_matmul(patches, wm, sh, relu=True)
    c1 = params["conv1"].shape[0]

    # maxpool 3x3, s2, p1 (single fused XLA pass; input is post-ReLU).
    xs = maxpool_3x3_s2(_spatial(_act(out, n, h, w, c1)))
    n, h, w, c = xs.shape
    act = _act(xs.reshape(n * h * w, c), n, h, w, c)

    # layer1 .. layer4
    for stage in params["stages"]:
        for block in stage:
            act = bottleneck_forward(act, block)

    # avgpool -> flatten
    feats = global_avg_pool(_spatial(act))                 # (N, C) float32

    # optional bottleneck Linear (use_bottleneck=False by default)
    if "bottleneck_w" in params:
        nfeat = params["bottleneck_w"].shape[1]
        feats = fused_matmul(feats, params["bottleneck_w"],
                             params["bottleneck_b"], relu=False,
                             out_dtype=jnp.float32)[:act["n"], :nfeat]
    return feats


# --------------------------------------------------------------------------
if __name__ == "__main__":
    key = jax.random.PRNGKey(0)
    kx, kp = jax.random.split(key)

    # SMALL ResNet-50-shaped config: the real [3,4,6,3] Bottleneck layout with
    # a reduced base width and 32x32 input so the test stays tiny & fast.
    batch, in_ch, image = 2, 3, 32
    base_width, blocks = 16, (3, 4, 6, 3)

    params = init_encoder_params(kp, in_ch=in_ch, base_width=base_width,
                                 blocks=blocks, use_bottleneck=False)
    x = jax.random.normal(kx, (batch, in_ch, image, image), jnp.float32)

    fwd = jax.jit(functools.partial(encoder_forward, params=params))
    feats = jax.block_until_ready(fwd(x))

    assert feats.shape == (batch, params["out_features"]), feats.shape
    assert bool(jnp.all(jnp.isfinite(feats)))
    print("KERNEL_OK")
</pallas_src>

<mosaic_0001>
module attributes {stable_mosaic.version = 11 : i64} {
  func.func @kernel(%arg0: i32, %arg1: i32, %arg2: i32, %arg3: memref<512x256xbf16, #tpu.memory_space<vmem>>, %arg4: memref<256x128xbf16, #tpu.memory_space<vmem>>, %arg5: memref<1x128xf32, #tpu.memory_space<vmem>>, %arg6: memref<512x128xbf16, #tpu.memory_space<vmem>>, %arg7: memref<512x128xf32, #tpu.memory_space<vmem>>) attributes {dimension_semantics = [#tpu.dimension_semantics<parallel>, #tpu.dimension_semantics<parallel>, #tpu.dimension_semantics<arbitrary>], iteration_bounds = array<i64: 1, 1, 1>, scalar_prefetch = 0 : i64, scratch_operands = 1 : i64, tpu.core_type = #tpu.core_type<tc>, window_params = [{transform_indices = @transform_0, window_bounds = array<i64: 512, 256>}, {transform_indices = @transform_1, window_bounds = array<i64: 256, 128>}, {transform_indices = @transform_2, window_bounds = array<i64: 1, 128>}, {transform_indices = @transform_3, window_bounds = array<i64: 512, 128>}]} {
    %c0 = arith.constant 0 : index
    %c0_0 = arith.constant 0 : index
    %0 = vector.load %arg3[%c0, %c0_0] : memref<512x256xbf16, #tpu.memory_space<vmem>>, vector<512x256xbf16>
    %c0_1 = arith.constant 0 : index
    %c0_2 = arith.constant 0 : index
    %1 = vector.load %arg4[%c0_1, %c0_2] : memref<256x128xbf16, #tpu.memory_space<vmem>>, vector<256x128xbf16>
    %cst = arith.constant dense<0.000000e+00> : vector<512x128xf32>
    %2 = tpu.matmul %0, %1, %cst {dimension_numbers = #tpu.dot_dimension_numbers<[1], [0], [0], [1], [0, 0, 1, 1], [], []>} : vector<512x256xbf16>, vector<256x128xbf16>, vector<512x128xf32> -> vector<512x128xf32>
    %c0_i32 = arith.constant 0 : i32
    %3 = arith.cmpi eq, %arg2, %c0_i32 : i32
    %4 = arith.extui %3 : i1 to i32
    %c0_i32_3 = arith.constant 0 : i32
    %5 = arith.cmpi ne, %4, %c0_i32_3 : i32
    scf.if %5 {
      %c0_8 = arith.constant 0 : index
      %c0_9 = arith.constant 0 : index
      %12 = vector.load %arg7[%c0_8, %c0_9] : memref<512x128xf32, #tpu.memory_space<vmem>>, vector<512x128xf32>
      tpu.vector_store %arg7[%c0_8, %c0_9], %2 {strides = array<i32>} : memref<512x128xf32, #tpu.memory_space<vmem>>, vector<512x128xf32>,
    } else {
    }
    %c0_i32_4 = arith.constant 0 : i32
    %6 = arith.cmpi ne, %arg2, %c0_i32_4 : i32
    %7 = arith.extui %6 : i1 to i32
    %c0_i32_5 = arith.constant 0 : i32
    %8 = arith.cmpi ne, %7, %c0_i32_5 : i32
    scf.if %8 {
      %c0_8 = arith.constant 0 : index
      %c0_9 = arith.constant 0 : index
      %12 = vector.load %arg7[%c0_8, %c0_9] : memref<512x128xf32, #tpu.memory_space<vmem>>, vector<512x128xf32>
      %13 = arith.addf %12, %2 : vector<512x128xf32>
      %c0_10 = arith.constant 0 : index
      %c0_11 = arith.constant 0 : index
      %14 = vector.load %arg7[%c0_10, %c0_11] : memref<512x128xf32, #tpu.memory_space<vmem>>, vector<512x128xf32>
      tpu.vector_store %arg7[%c0_10, %c0_11], %13 {strides = array<i32>} : memref<512x128xf32, #tpu.memory_space<vmem>>, vector<512x128xf32>,
    } else {
    }
    %c0_i32_6 = arith.constant 0 : i32
    %9 = arith.cmpi eq, %arg2, %c0_i32_6 : i32
    %10 = arith.extui %9 : i1 to i32
    %c0_i32_7 = arith.constant 0 : i32
    %11 = arith.cmpi ne, %10, %c0_i32_7 : i32
    scf.if %11 {
      %c0_8 = arith.constant 0 : index
      %c0_9 = arith.constant 0 : index
      %12 = vector.load %arg7[%c0_8, %c0_9] : memref<512x128xf32, #tpu.memory_space<vmem>>, vector<512x128xf32>
      %c0_10 = arith.constant 0 : index
      %c0_11 = arith.constant 0 : index
      %13 = vector.load %arg5[%c0_10, %c0_11] : memref<1x128xf32, #tpu.memory_space<vmem>>, vector<1x128xf32>
      %14 = vector.broadcast %13 : vector<1x128xf32> to vector<512x128xf32>
      %15 = arith.addf %12, %14 : vector<512x128xf32>
      %cst_12 = arith.constant 0.000000e+00 : f32
      %16 = vector.broadcast %cst_12 : f32 to vector<512x128xf32>
      %17 = arith.maximumf %15, %16 : vector<512x128xf32>
      %18 = arith.truncf %17 : vector<512x128xf32> to vector<512x128xbf16>
      %c0_13 = arith.constant 0 : index
      %c0_14 = arith.constant 0 : index
      %19 = vector.load %arg6[%c0_13, %c0_14] : memref<512x128xbf16, #tpu.memory_space<vmem>>, vector<512x128xbf16>
      tpu.vector_store %arg6[%c0_13, %c0_14], %18 {strides = array<i32>} : memref<512x128xbf16, #tpu.memory_space<vmem>>, vector<512x128xbf16>,
    } else {
    }
    return
  }
  func.func @transform_0(%arg0: i32, %arg1: i32, %arg2: i32) -> (i32, i32) {
    %c0_i32 = arith.constant 0 : i32
    return %arg0, %arg2 : i32, i32
  }
  func.func @transform_1(%arg0: i32, %arg1: i32, %arg2: i32) -> (i32, i32) {
    %c0_i32 = arith.constant 0 : i32
    return %arg2, %arg1 : i32, i32
  }
  func.func @transform_2(%arg0: i32, %arg1: i32, %arg2: i32) -> (i32, i32) {
    %c0_i32 = arith.constant 0 : i32
    %c0_i32_0 = arith.constant 0 : i32
    return %c0_i32, %arg1 : i32, i32
  }
  func.func @transform_3(%arg0: i32, %arg1: i32, %arg2: i32) -> (i32, i32) {
    %c0_i32 = arith.constant 0 : i32
    return %arg0, %arg1 : i32, i32
  }
}

module attributes {stable_mosaic.version = 11 : i64} {
  func.func @kernel(%arg0: i32, %arg1: i32, %arg2: i32, %arg3: memref<128x128xbf16, #tpu.memory_space<vmem>>, %arg4: memref<128x128xbf16, #tpu.memory_space<vmem>>, %arg5: memref<1x128xf32, #tpu.memory_space<vmem>>, %arg6: memref<128x128xbf16, #tpu.memory_space<vmem>>, %arg7: memref<128x128xf32, #tpu.memory_space<vmem>>) attributes {dimension_semantics = [#tpu.dimension_semantics<parallel>, #tpu.dimension_semantics<parallel>, #tpu.dimension_semantics<arbitrary>], iteration_bounds = array<i64: 1, 1, 1>, scalar_prefetch = 0 : i64, scratch_operands = 1 : i64, tpu.core_type = #tpu.core_type<tc>, window_params = [{transform_indices = @transform_0, window_bounds = array<i64: 128, 128>}, {transform_indices = @transform_1, window_bounds = array<i64: 128, 128>}, {transform_indices = @transform_2, window_bounds = array<i64: 1, 128>}, {transform_indices = @transform_3, window_bounds = array<i64: 128, 128>}]} {
    %c0 = arith.constant 0 : index
    %c0_0 = arith.constant 0 : index
    %0 = vector.load %arg3[%c0, %c0_0] : memref<128x128xbf16, #tpu.memory_space<vmem>>, vector<128x128xbf16>
    %c0_1 = arith.constant 0 : index
    %c0_2 = arith.constant 0 : index
    %1 = vector.load %arg4[%c0_1, %c0_2] : memref<128x128xbf16, #tpu.memory_space<vmem>>, vector<128x128xbf16>
    %cst = arith.constant dense<0.000000e+00> : vector<128x128xf32>
    %2 = tpu.matmul %0, %1, %cst {dimension_numbers = #tpu.dot_dimension_numbers<[1], [0], [0], [1], [0, 0, 1, 1], [], []>} : vector<128x128xbf16>, vector<128x128xbf16>, vector<128x128xf32> -> vector<128x128xf32>
    %c0_i32 = arith.constant 0 : i32
    %3 = arith.cmpi eq, %arg2, %c0_i32 : i32
    %4 = arith.extui %3 : i1 to i32
    %c0_i32_3 = arith.constant 0 : i32
    %5 = arith.cmpi ne, %4, %c0_i32_3 : i32
    scf.if %5 {
      %c0_8 = arith.constant 0 : index
      %c0_9 = arith.constant 0 : index
      %12 = vector.load %arg7[%c0_8, %c0_9] : memref<128x128xf32, #tpu.memory_space<vmem>>, vector<128x128xf32>
      tpu.vector_store %arg7[%c0_8, %c0_9], %2 {strides = array<i32>} : memref<128x128xf32, #tpu.memory_space<vmem>>, vector<128x128xf32>,
    } else {
    }
    %c0_i32_4 = arith.constant 0 : i32
    %6 = arith.cmpi ne, %arg2, %c0_i32_4 : i32
    %7 = arith.extui %6 : i1 to i32
    %c0_i32_5 = arith.constant 0 : i32
    %8 = arith.cmpi ne, %7, %c0_i32_5 : i32
    scf.if %8 {
      %c0_8 = arith.constant 0 : index
      %c0_9 = arith.constant 0 : index
      %12 = vector.load %arg7[%c0_8, %c0_9] : memref<128x128xf32, #tpu.memory_space<vmem>>, vector<128x128xf32>
      %13 = arith.addf %12, %2 : vector<128x128xf32>
      %c0_10 = arith.constant 0 : index
      %c0_11 = arith.constant 0 : index
      %14 = vector.load %arg7[%c0_10, %c0_11] : memref<128x128xf32, #tpu.memory_space<vmem>>, vector<128x128xf32>
      tpu.vector_store %arg7[%c0_10, %c0_11], %13 {strides = array<i32>} : memref<128x128xf32, #tpu.memory_space<vmem>>, vector<128x128xf32>,
    } else {
    }
    %c0_i32_6 = arith.constant 0 : i32
    %9 = arith.cmpi eq, %arg2, %c0_i32_6 : i32
    %10 = arith.extui %9 : i1 to i32
    %c0_i32_7 = arith.constant 0 : i32
    %11 = arith.cmpi ne, %10, %c0_i32_7 : i32
    scf.if %11 {
      %c0_8 = arith.constant 0 : index
      %c0_9 = arith.constant 0 : index
      %12 = vector.load %arg7[%c0_8, %c0_9] : memref<128x128xf32, #tpu.memory_space<vmem>>, vector<128x128xf32>
      %c0_10 = arith.constant 0 : index
      %c0_11 = arith.constant 0 : index
      %13 = vector.load %arg5[%c0_10, %c0_11] : memref<1x128xf32, #tpu.memory_space<vmem>>, vector<1x128xf32>
      %14 = vector.broadcast %13 : vector<1x128xf32> to vector<128x128xf32>
      %15 = arith.addf %12, %14 : vector<128x128xf32>
      %cst_12 = arith.constant 0.000000e+00 : f32
      %16 = vector.broadcast %cst_12 : f32 to vector<128x128xf32>
      %17 = arith.maximumf %15, %16 : vector<128x128xf32>
      %18 = arith.truncf %17 : vector<128x128xf32> to vector<128x128xbf16>
      %c0_13 = arith.constant 0 : index
      %c0_14 = arith.constant 0 : index
      %19 = vector.load %arg6[%c0_13, %c0_14] : memref<128x128xbf16, #tpu.memory_space<vmem>>, vector<128x128xbf16>
      tpu.vector_store %arg6[%c0_13, %c0_14], %18 {strides = array<i32>} : memref<128x128xbf16, #tpu.memory_space<vmem>>, vector<128x128xbf16>,
    } else {
    }
    return
  }
  func.func @transform_0(%arg0: i32, %arg1: i32, %arg2: i32) -> (i32, i32) {
    %c0_i32 = arith.constant 0 : i32
    return %arg0, %arg2 : i32, i32
  }
  func.func @transform_1(%arg0: i32, %arg1: i32, %arg2: i32) -> (i32, i32) {
    %c0_i32 = arith.constant 0 : i32
    return %arg2, %arg1 : i32, i32
  }
  func.func @transform_2(%arg0: i32, %arg1: i32, %arg2: i32) -> (i32, i32) {
    %c0_i32 = arith.constant 0 : i32
    %c0_i32_0 = arith.constant 0 : i32
    return %c0_i32, %arg1 : i32, i32
  }
  func.func @transform_3(%arg0: i32, %arg1: i32, %arg2: i32) -> (i32, i32) {
    %c0_i32 = arith.constant 0 : i32
    return %arg0, %arg1 : i32, i32
  }
}

module attributes {stable_mosaic.version = 11 : i64} {
  func.func @kernel(%arg0: i32, %arg1: i32, %arg2: i32, %arg3: memref<128x256xbf16, #tpu.memory_space<vmem>>, %arg4: memref<256x128xbf16, #tpu.memory_space<vmem>>, %arg5: memref<1x128xf32, #tpu.memory_space<vmem>>, %arg6: memref<128x128xbf16, #tpu.memory_space<vmem>>, %arg7: memref<128x128xf32, #tpu.memory_space<vmem>>) attributes {dimension_semantics = [#tpu.dimension_semantics<parallel>, #tpu.dimension_semantics<parallel>, #tpu.dimension_semantics<arbitrary>], iteration_bounds = array<i64: 1, 1, 1>, scalar_prefetch = 0 : i64, scratch_operands = 1 : i64, tpu.core_type = #tpu.core_type<tc>, window_params = [{transform_indices = @transform_0, window_bounds = array<i64: 128, 256>}, {transform_indices = @transform_1, window_bounds = array<i64: 256, 128>}, {transform_indices = @transform_2, window_bounds = array<i64: 1, 128>}, {transform_indices = @transform_3, window_bounds = array<i64: 128, 128>}]} {
    %c0 = arith.constant 0 : index
    %c0_0 = arith.constant 0 : index
    %0 = vector.load %arg3[%c0, %c0_0] : memref<128x256xbf16, #tpu.memory_space<vmem>>, vector<128x256xbf16>
    %c0_1 = arith.constant 0 : index
    %c0_2 = arith.constant 0 : index
    %1 = vector.load %arg4[%c0_1, %c0_2] : memref<256x128xbf16, #tpu.memory_space<vmem>>, vector<256x128xbf16>
    %cst = arith.constant dense<0.000000e+00> : vector<128x128xf32>
    %2 = tpu.matmul %0, %1, %cst {dimension_numbers = #tpu.dot_dimension_numbers<[1], [0], [0], [1], [0, 0, 1, 1], [], []>} : vector<128x256xbf16>, vector<256x128xbf16>, vector<128x128xf32> -> vector<128x128xf32>
    %c0_i32 = arith.constant 0 : i32
    %3 = arith.cmpi eq, %arg2, %c0_i32 : i32
    %4 = arith.extui %3 : i1 to i32
    %c0_i32_3 = arith.constant 0 : i32
    %5 = arith.cmpi ne, %4, %c0_i32_3 : i32
    scf.if %5 {
      %c0_8 = arith.constant 0 : index
      %c0_9 = arith.constant 0 : index
      %12 = vector.load %arg7[%c0_8, %c0_9] : memref<128x128xf32, #tpu.memory_space<vmem>>, vector<128x128xf32>
      tpu.vector_store %arg7[%c0_8, %c0_9], %2 {strides = array<i32>} : memref<128x128xf32, #tpu.memory_space<vmem>>, vector<128x128xf32>,
    } else {
    }
    %c0_i32_4 = arith.constant 0 : i32
    %6 = arith.cmpi ne, %arg2, %c0_i32_4 : i32
    %7 = arith.extui %6 : i1 to i32
    %c0_i32_5 = arith.constant 0 : i32
    %8 = arith.cmpi ne, %7, %c0_i32_5 : i32
    scf.if %8 {
      %c0_8 = arith.constant 0 : index
      %c0_9 = arith.constant 0 : index
      %12 = vector.load %arg7[%c0_8, %c0_9] : memref<128x128xf32, #tpu.memory_space<vmem>>, vector<128x128xf32>
      %13 = arith.addf %12, %2 : vector<128x128xf32>
      %c0_10 = arith.constant 0 : index
      %c0_11 = arith.constant 0 : index
      %14 = vector.load %arg7[%c0_10, %c0_11] : memref<128x128xf32, #tpu.memory_space<vmem>>, vector<128x128xf32>
      tpu.vector_store %arg7[%c0_10, %c0_11], %13 {strides = array<i32>} : memref<128x128xf32, #tpu.memory_space<vmem>>, vector<128x128xf32>,
    } else {
    }
    %c0_i32_6 = arith.constant 0 : i32
    %9 = arith.cmpi eq, %arg2, %c0_i32_6 : i32
    %10 = arith.extui %9 : i1 to i32
    %c0_i32_7 = arith.constant 0 : i32
    %11 = arith.cmpi ne, %10, %c0_i32_7 : i32
    scf.if %11 {
      %c0_8 = arith.constant 0 : index
      %c0_9 = arith.constant 0 : index
      %12 = vector.load %arg7[%c0_8, %c0_9] : memref<128x128xf32, #tpu.memory_space<vmem>>, vector<128x128xf32>
      %c0_10 = arith.constant 0 : index
      %c0_11 = arith.constant 0 : index
      %13 = vector.load %arg5[%c0_10, %c0_11] : memref<1x128xf32, #tpu.memory_space<vmem>>, vector<1x128xf32>
      %14 = vector.broadcast %13 : vector<1x128xf32> to vector<128x128xf32>
      %15 = arith.addf %12, %14 : vector<128x128xf32>
      %cst_12 = arith.constant 0.000000e+00 : f32
      %16 = vector.broadcast %cst_12 : f32 to vector<128x128xf32>
      %17 = arith.maximumf %15, %16 : vector<128x128xf32>
      %18 = arith.truncf %17 : vector<128x128xf32> to vector<128x128xbf16>
      %c0_13 = arith.constant 0 : index
      %c0_14 = arith.constant 0 : index
      %19 = vector.load %arg6[%c0_13, %c0_14] : memref<128x128xbf16, #tpu.memory_space<vmem>>, vector<128x128xbf16>
      tpu.vector_store %arg6[%c0_13, %c0_14], %18 {strides = array<i32>} : memref<128x128xbf16, #tpu.memory_space<vmem>>, vector<128x128xbf16>,
    } else {
    }
    return
  }
  func.func @transform_0(%arg0: i32, %arg1: i32, %arg2: i32) -> (i32, i32) {
    %c0_i32 = arith.constant 0 : i32
    return %arg0, %arg2 : i32, i32
  }
  func.func @transform_1(%arg0: i32, %arg1: i32, %arg2: i32) -> (i32, i32) {
    %c0_i32 = arith.constant 0 : i32
    return %arg2, %arg1 : i32, i32
  }
  func.func @transform_2(%arg0: i32, %arg1: i32, %arg2: i32) -> (i32, i32) {
    %c0_i32 = arith.constant 0 : i32
    %c0_i32_0 = arith.constant 0 : i32
    return %c0_i32, %arg1 : i32, i32
  }
  func.func @transform_3(%arg0: i32, %arg1: i32, %arg2: i32) -> (i32, i32) {
    %c0_i32 = arith.constant 0 : i32
    return %arg0, %arg1 : i32, i32
  }
}

module attributes {stable_mosaic.version = 11 : i64} {
  func.func @kernel(%arg0: i32, %arg1: i32, %arg2: i32, %arg3: memref<128x128xbf16, #tpu.memory_space<vmem>>, %arg4: memref<128x128xbf16, #tpu.memory_space<vmem>>, %arg5: memref<1x128xf32, #tpu.memory_space<vmem>>, %arg6: memref<128x128xbf16, #tpu.memory_space<vmem>>, %arg7: memref<128x128xbf16, #tpu.memory_space<vmem>>, %arg8: memref<128x128xf32, #tpu.memory_space<vmem>>) attributes {dimension_semantics = [#tpu.dimension_semantics<parallel>, #tpu.dimension_semantics<parallel>, #tpu.dimension_semantics<arbitrary>], iteration_bounds = array<i64: 1, 1, 1>, scalar_prefetch = 0 : i64, scratch_operands = 1 : i64, tpu.core_type = #tpu.core_type<tc>, window_params = [{transform_indices = @transform_0, window_bounds = array<i64: 128, 128>}, {transform_indices = @transform_1, window_bounds = array<i64: 128, 128>}, {transform_indices = @transform_2, window_bounds = array<i64: 1, 128>}, {transform_indices = @transform_3, window_bounds = array<i64: 128, 128>}, {transform_indices = @transform_4, window_bounds = array<i64: 128, 128>}]} {
    %c0 = arith.constant 0 : index
    %c0_0 = arith.constant 0 : index
    %0 = vector.load %arg3[%c0, %c0_0] : memref<128x128xbf16, #tpu.memory_space<vmem>>, vector<128x128xbf16>
    %c0_1 = arith.constant 0 : index
    %c0_2 = arith.constant 0 : index
    %1 = vector.load %arg4[%c0_1, %c0_2] : memref<128x128xbf16, #tpu.memory_space<vmem>>, vector<128x128xbf16>
    %cst = arith.constant dense<0.000000e+00> : vector<128x128xf32>
    %2 = tpu.matmul %0, %1, %cst {dimension_numbers = #tpu.dot_dimension_numbers<[1], [0], [0], [1], [0, 0, 1, 1], [], []>} : vector<128x128xbf16>, vector<128x128xbf16>, vector<128x128xf32> -> vector<128x128xf32>
    %c0_i32 = arith.constant 0 : i32
    %3 = arith.cmpi eq, %arg2, %c0_i32 : i32
    %4 = arith.extui %3 : i1 to i32
    %c0_i32_3 = arith.constant 0 : i32
    %5 = arith.cmpi ne, %4, %c0_i32_3 : i32
    scf.if %5 {
      %c0_8 = arith.constant 0 : index
      %c0_9 = arith.constant 0 : index
      %12 = vector.load %arg8[%c0_8, %c0_9] : memref<128x128xf32, #tpu.memory_space<vmem>>, vector<128x128xf32>
      tpu.vector_store %arg8[%c0_8, %c0_9], %2 {strides = array<i32>} : memref<128x128xf32, #tpu.memory_space<vmem>>, vector<128x128xf32>,
    } else {
    }
    %c0_i32_4 = arith.constant 0 : i32
    %6 = arith.cmpi ne, %arg2, %c0_i32_4 : i32
    %7 = arith.extui %6 : i1 to i32
    %c0_i32_5 = arith.constant 0 : i32
    %8 = arith.cmpi ne, %7, %c0_i32_5 : i32
    scf.if %8 {
      %c0_8 = arith.constant 0 : index
      %c0_9 = arith.constant 0 : index
      %12 = vector.load %arg8[%c0_8, %c0_9] : memref<128x128xf32, #tpu.memory_space<vmem>>, vector<128x128xf32>
      %13 = arith.addf %12, %2 : vector<128x128xf32>
      %c0_10 = arith.constant 0 : index
      %c0_11 = arith.constant 0 : index
      %14 = vector.load %arg8[%c0_10, %c0_11] : memref<128x128xf32, #tpu.memory_space<vmem>>, vector<128x128xf32>
      tpu.vector_store %arg8[%c0_10, %c0_11], %13 {strides = array<i32>} : memref<128x128xf32, #tpu.memory_space<vmem>>, vector<128x128xf32>,
    } else {
    }
    %c0_i32_6 = arith.constant 0 : i32
    %9 = arith.cmpi eq, %arg2, %c0_i32_6 : i32
    %10 = arith.extui %9 : i1 to i32
    %c0_i32_7 = arith.constant 0 : i32
    %11 = arith.cmpi ne, %10, %c0_i32_7 : i32
    scf.if %11 {
      %c0_8 = arith.constant 0 : index
      %c0_9 = arith.constant 0 : index
      %12 = vector.load %arg8[%c0_8, %c0_9] : memref<128x128xf32, #tpu.memory_space<vmem>>, vector<128x128xf32>
      %c0_10 = arith.constant 0 : index
      %c0_11 = arith.constant 0 : index
      %13 = vector.load %arg5[%c0_10, %c0_11] : memref<1x128xf32, #tpu.memory_space<vmem>>, vector<1x128xf32>
      %14 = vector.broadcast %13 : vector<1x128xf32> to vector<128x128xf32>
      %15 = arith.addf %12, %14 : vector<128x128xf32>
      %c0_12 = arith.constant 0 : index
      %c0_13 = arith.constant 0 : index
      %16 = vector.load %arg6[%c0_12, %c0_13] : memref<128x128xbf16, #tpu.memory_space<vmem>>, vector<128x128xbf16>
      %17 = arith.extf %16 : vector<128x128xbf16> to vector<128x128xf32>
      %18 = arith.addf %15, %17 : vector<128x128xf32>
      %cst_14 = arith.constant 0.000000e+00 : f32
      %19 = vector.broadcast %cst_14 : f32 to vector<128x128xf32>
      %20 = arith.maximumf %18, %19 : vector<128x128xf32>
      %21 = arith.truncf %20 : vector<128x128xf32> to vector<128x128xbf16>
      %c0_15 = arith.constant 0 : index
      %c0_16 = arith.constant 0 : index
      %22 = vector.load %arg7[%c0_15, %c0_16] : memref<128x128xbf16, #tpu.memory_space<vmem>>, vector<128x128xbf16>
      tpu.vector_store %arg7[%c0_15, %c0_16], %21 {strides = array<i32>} : memref<128x128xbf16, #tpu.memory_space<vmem>>, vector<128x128xbf16>,
    } else {
    }
    return
  }
  func.func @transform_0(%arg0: i32, %arg1: i32, %arg2: i32) -> (i32, i32) {
    %c0_i32 = arith.constant 0 : i32
    return %arg0, %arg2 : i32, i32
  }
  func.func @transform_1(%arg0: i32, %arg1: i32, %arg2: i32) -> (i32, i32) {
    %c0_i32 = arith.constant 0 : i32
    return %arg2, %arg1 : i32, i32
  }
  func.func @transform_2(%arg0: i32, %arg1: i32, %arg2: i32) -> (i32, i32) {
    %c0_i32 = arith.constant 0 : i32
    %c0_i32_0 = arith.constant 0 : i32
    return %c0_i32, %arg1 : i32, i32
  }
  func.func @transform_3(%arg0: i32, %arg1: i32, %arg2: i32) -> (i32, i32) {
    %c0_i32 = arith.constant 0 : i32
    return %arg0, %arg1 : i32, i32
  }
  func.func @transform_4(%arg0: i32, %arg1: i32, %arg2: i32) -> (i32, i32) {
    %c0_i32 = arith.constant 0 : i32
    return %arg0, %arg1 : i32, i32
  }
}

module attributes {stable_mosaic.version = 11 : i64} {
  func.func @kernel(%arg0: i32, %arg1: i32, %arg2: i32, %arg3: memref<128x128xbf16, #tpu.memory_space<vmem>>, %arg4: memref<128x128xbf16, #tpu.memory_space<vmem>>, %arg5: memref<1x128xf32, #tpu.memory_space<vmem>>, %arg6: memref<128x128xbf16, #tpu.memory_space<vmem>>, %arg7: memref<128x128xf32, #tpu.memory_space<vmem>>) attributes {dimension_semantics = [#tpu.dimension_semantics<parallel>, #tpu.dimension_semantics<parallel>, #tpu.dimension_semantics<arbitrary>], iteration_bounds = array<i64: 1, 1, 1>, scalar_prefetch = 0 : i64, scratch_operands = 1 : i64, tpu.core_type = #tpu.core_type<tc>, window_params = [{transform_indices = @transform_0, window_bounds = array<i64: 128, 128>}, {transform_indices = @transform_1, window_bounds = array<i64: 128, 128>}, {transform_indices = @transform_2, window_bounds = array<i64: 1, 128>}, {transform_indices = @transform_3, window_bounds = array<i64: 128, 128>}]} {
    %c0 = arith.constant 0 : index
    %c0_0 = arith.constant 0 : index
    %0 = vector.load %arg3[%c0, %c0_0] : memref<128x128xbf16, #tpu.memory_space<vmem>>, vector<128x128xbf16>
    %c0_1 = arith.constant 0 : index
    %c0_2 = arith.constant 0 : index
    %1 = vector.load %arg4[%c0_1, %c0_2] : memref<128x128xbf16, #tpu.memory_space<vmem>>, vector<128x128xbf16>
    %cst = arith.constant dense<0.000000e+00> : vector<128x128xf32>
    %2 = tpu.matmul %0, %1, %cst {dimension_numbers = #tpu.dot_dimension_numbers<[1], [0], [0], [1], [0, 0, 1, 1], [], []>} : vector<128x128xbf16>, vector<128x128xbf16>, vector<128x128xf32> -> vector<128x128xf32>
    %c0_i32 = arith.constant 0 : i32
    %3 = arith.cmpi eq, %arg2, %c0_i32 : i32
    %4 = arith.extui %3 : i1 to i32
    %c0_i32_3 = arith.constant 0 : i32
    %5 = arith.cmpi ne, %4, %c0_i32_3 : i32
    scf.if %5 {
      %c0_8 = arith.constant 0 : index
      %c0_9 = arith.constant 0 : index
      %12 = vector.load %arg7[%c0_8, %c0_9] : memref<128x128xf32, #tpu.memory_space<vmem>>, vector<128x128xf32>
      tpu.vector_store %arg7[%c0_8, %c0_9], %2 {strides = array<i32>} : memref<128x128xf32, #tpu.memory_space<vmem>>, vector<128x128xf32>,
    } else {
    }
    %c0_i32_4 = arith.constant 0 : i32
    %6 = arith.cmpi ne, %arg2, %c0_i32_4 : i32
    %7 = arith.extui %6 : i1 to i32
    %c0_i32_5 = arith.constant 0 : i32
    %8 = arith.cmpi ne, %7, %c0_i32_5 : i32
    scf.if %8 {
      %c0_8 = arith.constant 0 : index
      %c0_9 = arith.constant 0 : index
      %12 = vector.load %arg7[%c0_8, %c0_9] : memref<128x128xf32, #tpu.memory_space<vmem>>, vector<128x128xf32>
      %13 = arith.addf %12, %2 : vector<128x128xf32>
      %c0_10 = arith.constant 0 : index
      %c0_11 = arith.constant 0 : index
      %14 = vector.load %arg7[%c0_10, %c0_11] : memref<128x128xf32, #tpu.memory_space<vmem>>, vector<128x128xf32>
      tpu.vector_store %arg7[%c0_10, %c0_11], %13 {strides = array<i32>} : memref<128x128xf32, #tpu.memory_space<vmem>>, vector<128x128xf32>,
    } else {
    }
    %c0_i32_6 = arith.constant 0 : i32
    %9 = arith.cmpi eq, %arg2, %c0_i32_6 : i32
    %10 = arith.extui %9 : i1 to i32
    %c0_i32_7 = arith.constant 0 : i32
    %11 = arith.cmpi ne, %10, %c0_i32_7 : i32
    scf.if %11 {
      %c0_8 = arith.constant 0 : index
      %c0_9 = arith.constant 0 : index
      %12 = vector.load %arg7[%c0_8, %c0_9] : memref<128x128xf32, #tpu.memory_space<vmem>>, vector<128x128xf32>
      %c0_10 = arith.constant 0 : index
      %c0_11 = arith.constant 0 : index
      %13 = vector.load %arg5[%c0_10, %c0_11] : memref<1x128xf32, #tpu.memory_space<vmem>>, vector<1x128xf32>
      %14 = vector.broadcast %13 : vector<1x128xf32> to vector<128x128xf32>
      %15 = arith.addf %12, %14 : vector<128x128xf32>
      %16 = arith.truncf %15 : vector<128x128xf32> to vector<128x128xbf16>
      %c0_12 = arith.constant 0 : index
      %c0_13 = arith.constant 0 : index
      %17 = vector.load %arg6[%c0_12, %c0_13] : memref<128x128xbf16, #tpu.memory_space<vmem>>, vector<128x128xbf16>
      tpu.vector_store %arg6[%c0_12, %c0_13], %16 {strides = array<i32>} : memref<128x128xbf16, #tpu.memory_space<vmem>>, vector<128x128xbf16>,
    } else {
    }
    return
  }
  func.func @transform_0(%arg0: i32, %arg1: i32, %arg2: i32) -> (i32, i32) {
    %c0_i32 = arith.constant 0 : i32
    return %arg0, %arg2 : i32, i32
  }
  func.func @transform_1(%arg0: i32, %arg1: i32, %arg2: i32) -> (i32, i32) {
    %c0_i32 = arith.constant 0 : i32
    return %arg2, %arg1 : i32, i32
  }
  func.func @transform_2(%arg0: i32, %arg1: i32, %arg2: i32) -> (i32, i32) {
    %c0_i32 = arith.constant 0 : i32
    %c0_i32_0 = arith.constant 0 : i32
    return %c0_i32, %arg1 : i32, i32
  }
  func.func @transform_3(%arg0: i32, %arg1: i32, %arg2: i32) -> (i32, i32) {
    %c0_i32 = arith.constant 0 : i32
    return %arg0, %arg1 : i32, i32
  }
}

module attributes {stable_mosaic.version = 11 : i64} {
  func.func @kernel(%arg0: i32, %arg1: i32, %arg2: i32, %arg3: memref<32x384xbf16, #tpu.memory_space<vmem>>, %arg4: memref<384x128xbf16, #tpu.memory_space<vmem>>, %arg5: memref<1x128xf32, #tpu.memory_space<vmem>>, %arg6: memref<32x128xbf16, #tpu.memory_space<vmem>>, %arg7: memref<32x128xf32, #tpu.memory_space<vmem>>) attributes {dimension_semantics = [#tpu.dimension_semantics<parallel>, #tpu.dimension_semantics<parallel>, #tpu.dimension_semantics<arbitrary>], iteration_bounds = array<i64: 1, 1, 1>, scalar_prefetch = 0 : i64, scratch_operands = 1 : i64, tpu.core_type = #tpu.core_type<tc>, window_params = [{transform_indices = @transform_0, window_bounds = array<i64: 32, 384>}, {transform_indices = @transform_1, window_bounds = array<i64: 384, 128>}, {transform_indices = @transform_2, window_bounds = array<i64: 1, 128>}, {transform_indices = @transform_3, window_bounds = array<i64: 32, 128>}]} {
    %c0 = arith.constant 0 : index
    %c0_0 = arith.constant 0 : index
    %0 = vector.load %arg3[%c0, %c0_0] : memref<32x384xbf16, #tpu.memory_space<vmem>>, vector<32x384xbf16>
    %c0_1 = arith.constant 0 : index
    %c0_2 = arith.constant 0 : index
    %1 = vector.load %arg4[%c0_1, %c0_2] : memref<384x128xbf16, #tpu.memory_space<vmem>>, vector<384x128xbf16>
    %cst = arith.constant dense<0.000000e+00> : vector<32x128xf32>
    %2 = tpu.matmul %0, %1, %cst {dimension_numbers = #tpu.dot_dimension_numbers<[1], [0], [0], [1], [0, 0, 1, 1], [], []>} : vector<32x384xbf16>, vector<384x128xbf16>, vector<32x128xf32> -> vector<32x128xf32>
    %c0_i32 = arith.constant 0 : i32
    %3 = arith.cmpi eq, %arg2, %c0_i32 : i32
    %4 = arith.extui %3 : i1 to i32
    %c0_i32_3 = arith.constant 0 : i32
    %5 = arith.cmpi ne, %4, %c0_i32_3 : i32
    scf.if %5 {
      %c0_8 = arith.constant 0 : index
      %c0_9 = arith.constant 0 : index
      %12 = vector.load %arg7[%c0_8, %c0_9] : memref<32x128xf32, #tpu.memory_space<vmem>>, vector<32x128xf32>
      tpu.vector_store %arg7[%c0_8, %c0_9], %2 {strides = array<i32>} : memref<32x128xf32, #tpu.memory_space<vmem>>, vector<32x128xf32>,
    } else {
    }
    %c0_i32_4 = arith.constant 0 : i32
    %6 = arith.cmpi ne, %arg2, %c0_i32_4 : i32
    %7 = arith.extui %6 : i1 to i32
    %c0_i32_5 = arith.constant 0 : i32
    %8 = arith.cmpi ne, %7, %c0_i32_5 : i32
    scf.if %8 {
      %c0_8 = arith.constant 0 : index
      %c0_9 = arith.constant 0 : index
      %12 = vector.load %arg7[%c0_8, %c0_9] : memref<32x128xf32, #tpu.memory_space<vmem>>, vector<32x128xf32>
      %13 = arith.addf %12, %2 : vector<32x128xf32>
      %c0_10 = arith.constant 0 : index
      %c0_11 = arith.constant 0 : index
      %14 = vector.load %arg7[%c0_10, %c0_11] : memref<32x128xf32, #tpu.memory_space<vmem>>, vector<32x128xf32>
      tpu.vector_store %arg7[%c0_10, %c0_11], %13 {strides = array<i32>} : memref<32x128xf32, #tpu.memory_space<vmem>>, vector<32x128xf32>,
    } else {
    }
    %c0_i32_6 = arith.constant 0 : i32
    %9 = arith.cmpi eq, %arg2, %c0_i32_6 : i32
    %10 = arith.extui %9 : i1 to i32
    %c0_i32_7 = arith.constant 0 : i32
    %11 = arith.cmpi ne, %10, %c0_i32_7 : i32
    scf.if %11 {
      %c0_8 = arith.constant 0 : index
      %c0_9 = arith.constant 0 : index
      %12 = vector.load %arg7[%c0_8, %c0_9] : memref<32x128xf32, #tpu.memory_space<vmem>>, vector<32x128xf32>
      %c0_10 = arith.constant 0 : index
      %c0_11 = arith.constant 0 : index
      %13 = vector.load %arg5[%c0_10, %c0_11] : memref<1x128xf32, #tpu.memory_space<vmem>>, vector<1x128xf32>
      %14 = vector.broadcast %13 : vector<1x128xf32> to vector<32x128xf32>
      %15 = arith.addf %12, %14 : vector<32x128xf32>
      %cst_12 = arith.constant 0.000000e+00 : f32
      %16 = vector.broadcast %cst_12 : f32 to vector<32x128xf32>
      %17 = arith.maximumf %15, %16 : vector<32x128xf32>
      %18 = arith.truncf %17 : vector<32x128xf32> to vector<32x128xbf16>
      %c0_13 = arith.constant 0 : index
      %c0_14 = arith.constant 0 : index
      %19 = vector.load %arg6[%c0_13, %c0_14] : memref<32x128xbf16, #tpu.memory_space<vmem>>, vector<32x128xbf16>
      tpu.vector_store %arg6[%c0_13, %c0_14], %18 {strides = array<i32>} : memref<32x128xbf16, #tpu.memory_space<vmem>>, vector<32x128xbf16>,
    } else {
    }
    return
  }
  func.func @transform_0(%arg0: i32, %arg1: i32, %arg2: i32) -> (i32, i32) {
    %c0_i32 = arith.constant 0 : i32
    return %arg0, %arg2 : i32, i32
  }
  func.func @transform_1(%arg0: i32, %arg1: i32, %arg2: i32) -> (i32, i32) {
    %c0_i32 = arith.constant 0 : i32
    return %arg2, %arg1 : i32, i32
  }
  func.func @transform_2(%arg0: i32, %arg1: i32, %arg2: i32) -> (i32, i32) {
    %c0_i32 = arith.constant 0 : i32
    %c0_i32_0 = arith.constant 0 : i32
    return %c0_i32, %arg1 : i32, i32
  }
  func.func @transform_3(%arg0: i32, %arg1: i32, %arg2: i32) -> (i32, i32) {
    %c0_i32 = arith.constant 0 : i32
    return %arg0, %arg1 : i32, i32
  }
}

module attributes {stable_mosaic.version = 11 : i64} {
  func.func @kernel(%arg0: i32, %arg1: i32, %arg2: i32, %arg3: memref<32x128xbf16, #tpu.memory_space<vmem>>, %arg4: memref<128x128xbf16, #tpu.memory_space<vmem>>, %arg5: memref<1x128xf32, #tpu.memory_space<vmem>>, %arg6: memref<32x128xbf16, #tpu.memory_space<vmem>>, %arg7: memref<32x128xf32, #tpu.memory_space<vmem>>) attributes {dimension_semantics = [#tpu.dimension_semantics<parallel>, #tpu.dimension_semantics<parallel>, #tpu.dimension_semantics<arbitrary>], iteration_bounds = array<i64: 1, 1, 1>, scalar_prefetch = 0 : i64, scratch_operands = 1 : i64, tpu.core_type = #tpu.core_type<tc>, window_params = [{transform_indices = @transform_0, window_bounds = array<i64: 32, 128>}, {transform_indices = @transform_1, window_bounds = array<i64: 128, 128>}, {transform_indices = @transform_2, window_bounds = array<i64: 1, 128>}, {transform_indices = @transform_3, window_bounds = array<i64: 32, 128>}]} {
    %c0 = arith.constant 0 : index
    %c0_0 = arith.constant 0 : index
    %0 = vector.load %arg3[%c0, %c0_0] : memref<32x128xbf16, #tpu.memory_space<vmem>>, vector<32x128xbf16>
    %c0_1 = arith.constant 0 : index
    %c0_2 = arith.constant 0 : index
    %1 = vector.load %arg4[%c0_1, %c0_2] : memref<128x128xbf16, #tpu.memory_space<vmem>>, vector<128x128xbf16>
    %cst = arith.constant dense<0.000000e+00> : vector<32x128xf32>
    %2 = tpu.matmul %0, %1, %cst {dimension_numbers = #tpu.dot_dimension_numbers<[1], [0], [0], [1], [0, 0, 1, 1], [], []>} : vector<32x128xbf16>, vector<128x128xbf16>, vector<32x128xf32> -> vector<32x128xf32>
    %c0_i32 = arith.constant 0 : i32
    %3 = arith.cmpi eq, %arg2, %c0_i32 : i32
    %4 = arith.extui %3 : i1 to i32
    %c0_i32_3 = arith.constant 0 : i32
    %5 = arith.cmpi ne, %4, %c0_i32_3 : i32
    scf.if %5 {
      %c0_8 = arith.constant 0 : index
      %c0_9 = arith.constant 0 : index
      %12 = vector.load %arg7[%c0_8, %c0_9] : memref<32x128xf32, #tpu.memory_space<vmem>>, vector<32x128xf32>
      tpu.vector_store %arg7[%c0_8, %c0_9], %2 {strides = array<i32>} : memref<32x128xf32, #tpu.memory_space<vmem>>, vector<32x128xf32>,
    } else {
    }
    %c0_i32_4 = arith.constant 0 : i32
    %6 = arith.cmpi ne, %arg2, %c0_i32_4 : i32
    %7 = arith.extui %6 : i1 to i32
    %c0_i32_5 = arith.constant 0 : i32
    %8 = arith.cmpi ne, %7, %c0_i32_5 : i32
    scf.if %8 {
      %c0_8 = arith.constant 0 : index
      %c0_9 = arith.constant 0 : index
      %12 = vector.load %arg7[%c0_8, %c0_9] : memref<32x128xf32, #tpu.memory_space<vmem>>, vector<32x128xf32>
      %13 = arith.addf %12, %2 : vector<32x128xf32>
      %c0_10 = arith.constant 0 : index
      %c0_11 = arith.constant 0 : index
      %14 = vector.load %arg7[%c0_10, %c0_11] : memref<32x128xf32, #tpu.memory_space<vmem>>, vector<32x128xf32>
      tpu.vector_store %arg7[%c0_10, %c0_11], %13 {strides = array<i32>} : memref<32x128xf32, #tpu.memory_space<vmem>>, vector<32x128xf32>,
    } else {
    }
    %c0_i32_6 = arith.constant 0 : i32
    %9 = arith.cmpi eq, %arg2, %c0_i32_6 : i32
    %10 = arith.extui %9 : i1 to i32
    %c0_i32_7 = arith.constant 0 : i32
    %11 = arith.cmpi ne, %10, %c0_i32_7 : i32
    scf.if %11 {
      %c0_8 = arith.constant 0 : index
      %c0_9 = arith.constant 0 : index
      %12 = vector.load %arg7[%c0_8, %c0_9] : memref<32x128xf32, #tpu.memory_space<vmem>>, vector<32x128xf32>
      %c0_10 = arith.constant 0 : index
      %c0_11 = arith.constant 0 : index
      %13 = vector.load %arg5[%c0_10, %c0_11] : memref<1x128xf32, #tpu.memory_space<vmem>>, vector<1x128xf32>
      %14 = vector.broadcast %13 : vector<1x128xf32> to vector<32x128xf32>
      %15 = arith.addf %12, %14 : vector<32x128xf32>
      %16 = arith.truncf %15 : vector<32x128xf32> to vector<32x128xbf16>
      %c0_12 = arith.constant 0 : index
      %c0_13 = arith.constant 0 : index
      %17 = vector.load %arg6[%c0_12, %c0_13] : memref<32x128xbf16, #tpu.memory_space<vmem>>, vector<32x128xbf16>
      tpu.vector_store %arg6[%c0_12, %c0_13], %16 {strides = array<i32>} : memref<32x128xbf16, #tpu.memory_space<vmem>>, vector<32x128xbf16>,
    } else {
    }
    return
  }
  func.func @transform_0(%arg0: i32, %arg1: i32, %arg2: i32) -> (i32, i32) {
    %c0_i32 = arith.constant 0 : i32
    return %arg0, %arg2 : i32, i32
  }
  func.func @transform_1(%arg0: i32, %arg1: i32, %arg2: i32) -> (i32, i32) {
    %c0_i32 = arith.constant 0 : i32
    return %arg2, %arg1 : i32, i32
  }
  func.func @transform_2(%arg0: i32, %arg1: i32, %arg2: i32) -> (i32, i32) {
    %c0_i32 = arith.constant 0 : i32
    %c0_i32_0 = arith.constant 0 : i32
    return %c0_i32, %arg1 : i32, i32
  }
  func.func @transform_3(%arg0: i32, %arg1: i32, %arg2: i32) -> (i32, i32) {
    %c0_i32 = arith.constant 0 : i32
    return %arg0, %arg1 : i32, i32
  }
}

module attributes {stable_mosaic.version = 11 : i64} {
  func.func @kernel(%arg0: i32, %arg1: i32, %arg2: i32, %arg3: memref<32x128xbf16, #tpu.memory_space<vmem>>, %arg4: memref<128x128xbf16, #tpu.memory_space<vmem>>, %arg5: memref<1x128xf32, #tpu.memory_space<vmem>>, %arg6: memref<32x128xbf16, #tpu.memory_space<vmem>>, %arg7: memref<32x128xbf16, #tpu.memory_space<vmem>>, %arg8: memref<32x128xf32, #tpu.memory_space<vmem>>) attributes {dimension_semantics = [#tpu.dimension_semantics<parallel>, #tpu.dimension_semantics<parallel>, #tpu.dimension_semantics<arbitrary>], iteration_bounds = array<i64: 1, 1, 1>, scalar_prefetch = 0 : i64, scratch_operands = 1 : i64, tpu.core_type = #tpu.core_type<tc>, window_params = [{transform_indices = @transform_0, window_bounds = array<i64: 32, 128>}, {transform_indices = @transform_1, window_bounds = array<i64: 128, 128>}, {transform_indices = @transform_2, window_bounds = array<i64: 1, 128>}, {transform_indices = @transform_3, window_bounds = array<i64: 32, 128>}, {transform_indices = @transform_4, window_bounds = array<i64: 32, 128>}]} {
    %c0 = arith.constant 0 : index
    %c0_0 = arith.constant 0 : index
    %0 = vector.load %arg3[%c0, %c0_0] : memref<32x128xbf16, #tpu.memory_space<vmem>>, vector<32x128xbf16>
    %c0_1 = arith.constant 0 : index
    %c0_2 = arith.constant 0 : index
    %1 = vector.load %arg4[%c0_1, %c0_2] : memref<128x128xbf16, #tpu.memory_space<vmem>>, vector<128x128xbf16>
    %cst = arith.constant dense<0.000000e+00> : vector<32x128xf32>
    %2 = tpu.matmul %0, %1, %cst {dimension_numbers = #tpu.dot_dimension_numbers<[1], [0], [0], [1], [0, 0, 1, 1], [], []>} : vector<32x128xbf16>, vector<128x128xbf16>, vector<32x128xf32> -> vector<32x128xf32>
    %c0_i32 = arith.constant 0 : i32
    %3 = arith.cmpi eq, %arg2, %c0_i32 : i32
    %4 = arith.extui %3 : i1 to i32
    %c0_i32_3 = arith.constant 0 : i32
    %5 = arith.cmpi ne, %4, %c0_i32_3 : i32
    scf.if %5 {
      %c0_8 = arith.constant 0 : index
      %c0_9 = arith.constant 0 : index
      %12 = vector.load %arg8[%c0_8, %c0_9] : memref<32x128xf32, #tpu.memory_space<vmem>>, vector<32x128xf32>
      tpu.vector_store %arg8[%c0_8, %c0_9], %2 {strides = array<i32>} : memref<32x128xf32, #tpu.memory_space<vmem>>, vector<32x128xf32>,
    } else {
    }
    %c0_i32_4 = arith.constant 0 : i32
    %6 = arith.cmpi ne, %arg2, %c0_i32_4 : i32
    %7 = arith.extui %6 : i1 to i32
    %c0_i32_5 = arith.constant 0 : i32
    %8 = arith.cmpi ne, %7, %c0_i32_5 : i32
    scf.if %8 {
      %c0_8 = arith.constant 0 : index
      %c0_9 = arith.constant 0 : index
      %12 = vector.load %arg8[%c0_8, %c0_9] : memref<32x128xf32, #tpu.memory_space<vmem>>, vector<32x128xf32>
      %13 = arith.addf %12, %2 : vector<32x128xf32>
      %c0_10 = arith.constant 0 : index
      %c0_11 = arith.constant 0 : index
      %14 = vector.load %arg8[%c0_10, %c0_11] : memref<32x128xf32, #tpu.memory_space<vmem>>, vector<32x128xf32>
      tpu.vector_store %arg8[%c0_10, %c0_11], %13 {strides = array<i32>} : memref<32x128xf32, #tpu.memory_space<vmem>>, vector<32x128xf32>,
    } else {
    }
    %c0_i32_6 = arith.constant 0 : i32
    %9 = arith.cmpi eq, %arg2, %c0_i32_6 : i32
    %10 = arith.extui %9 : i1 to i32
    %c0_i32_7 = arith.constant 0 : i32
    %11 = arith.cmpi ne, %10, %c0_i32_7 : i32
    scf.if %11 {
      %c0_8 = arith.constant 0 : index
      %c0_9 = arith.constant 0 : index
      %12 = vector.load %arg8[%c0_8, %c0_9] : memref<32x128xf32, #tpu.memory_space<vmem>>, vector<32x128xf32>
      %c0_10 = arith.constant 0 : index
      %c0_11 = arith.constant 0 : index
      %13 = vector.load %arg5[%c0_10, %c0_11] : memref<1x128xf32, #tpu.memory_space<vmem>>, vector<1x128xf32>
      %14 = vector.broadcast %13 : vector<1x128xf32> to vector<32x128xf32>
      %15 = arith.addf %12, %14 : vector<32x128xf32>
      %c0_12 = arith.constant 0 : index
      %c0_13 = arith.constant 0 : index
      %16 = vector.load %arg6[%c0_12, %c0_13] : memref<32x128xbf16, #tpu.memory_space<vmem>>, vector<32x128xbf16>
      %17 = arith.extf %16 : vector<32x128xbf16> to vector<32x128xf32>
      %18 = arith.addf %15, %17 : vector<32x128xf32>
      %cst_14 = arith.constant 0.000000e+00 : f32
      %19 = vector.broadcast %cst_14 : f32 to vector<32x128xf32>
      %20 = arith.maximumf %18, %19 : vector<32x128xf32>
      %21 = arith.truncf %20 : vector<32x128xf32> to vector<32x128xbf16>
      %c0_15 = arith.constant 0 : index
      %c0_16 = arith.constant 0 : index
      %22 = vector.load %arg7[%c0_15, %c0_16] : memref<32x128xbf16, #tpu.memory_space<vmem>>, vector<32x128xbf16>
      tpu.vector_store %arg7[%c0_15, %c0_16], %21 {strides = array<i32>} : memref<32x128xbf16, #tpu.memory_space<vmem>>, vector<32x128xbf16>,
    } else {
    }
    return
  }
  func.func @transform_0(%arg0: i32, %arg1: i32, %arg2: i32) -> (i32, i32) {
    %c0_i32 = arith.constant 0 : i32
    return %arg0, %arg2 : i32, i32
  }
  func.func @transform_1(%arg0: i32, %arg1: i32, %arg2: i32) -> (i32, i32) {
    %c0_i32 = arith.constant 0 : i32
    return %arg2, %arg1 : i32, i32
  }
  func.func @transform_2(%arg0: i32, %arg1: i32, %arg2: i32) -> (i32, i32) {
    %c0_i32 = arith.constant 0 : i32
    %c0_i32_0 = arith.constant 0 : i32
    return %c0_i32, %arg1 : i32, i32
  }
  func.func @transform_3(%arg0: i32, %arg1: i32, %arg2: i32) -> (i32, i32) {
    %c0_i32 = arith.constant 0 : i32
    return %arg0, %arg1 : i32, i32
  }
  func.func @transform_4(%arg0: i32, %arg1: i32, %arg2: i32) -> (i32, i32) {
    %c0_i32 = arith.constant 0 : i32
    return %arg0, %arg1 : i32, i32
  }
}

module attributes {stable_mosaic.version = 11 : i64} {
  func.func @kernel(%arg0: i32, %arg1: i32, %arg2: i32, %arg3: memref<32x128xbf16, #tpu.memory_space<vmem>>, %arg4: memref<128x128xbf16, #tpu.memory_space<vmem>>, %arg5: memref<1x128xf32, #tpu.memory_space<vmem>>, %arg6: memref<32x128xbf16, #tpu.memory_space<vmem>>, %arg7: memref<32x128xf32, #tpu.memory_space<vmem>>) attributes {dimension_semantics = [#tpu.dimension_semantics<parallel>, #tpu.dimension_semantics<parallel>, #tpu.dimension_semantics<arbitrary>], iteration_bounds = array<i64: 1, 1, 1>, scalar_prefetch = 0 : i64, scratch_operands = 1 : i64, tpu.core_type = #tpu.core_type<tc>, window_params = [{transform_indices = @transform_0, window_bounds = array<i64: 32, 128>}, {transform_indices = @transform_1, window_bounds = array<i64: 128, 128>}, {transform_indices = @transform_2, window_bounds = array<i64: 1, 128>}, {transform_indices = @transform_3, window_bounds = array<i64: 32, 128>}]} {
    %c0 = arith.constant 0 : index
    %c0_0 = arith.constant 0 : index
    %0 = vector.load %arg3[%c0, %c0_0] : memref<32x128xbf16, #tpu.memory_space<vmem>>, vector<32x128xbf16>
    %c0_1 = arith.constant 0 : index
    %c0_2 = arith.constant 0 : index
    %1 = vector.load %arg4[%c0_1, %c0_2] : memref<128x128xbf16, #tpu.memory_space<vmem>>, vector<128x128xbf16>
    %cst = arith.constant dense<0.000000e+00> : vector<32x128xf32>
    %2 = tpu.matmul %0, %1, %cst {dimension_numbers = #tpu.dot_dimension_numbers<[1], [0], [0], [1], [0, 0, 1, 1], [], []>} : vector<32x128xbf16>, vector<128x128xbf16>, vector<32x128xf32> -> vector<32x128xf32>
    %c0_i32 = arith.constant 0 : i32
    %3 = arith.cmpi eq, %arg2, %c0_i32 : i32
    %4 = arith.extui %3 : i1 to i32
    %c0_i32_3 = arith.constant 0 : i32
    %5 = arith.cmpi ne, %4, %c0_i32_3 : i32
    scf.if %5 {
      %c0_8 = arith.constant 0 : index
      %c0_9 = arith.constant 0 : index
      %12 = vector.load %arg7[%c0_8, %c0_9] : memref<32x128xf32, #tpu.memory_space<vmem>>, vector<32x128xf32>
      tpu.vector_store %arg7[%c0_8, %c0_9], %2 {strides = array<i32>} : memref<32x128xf32, #tpu.memory_space<vmem>>, vector<32x128xf32>,
    } else {
    }
    %c0_i32_4 = arith.constant 0 : i32
    %6 = arith.cmpi ne, %arg2, %c0_i32_4 : i32
    %7 = arith.extui %6 : i1 to i32
    %c0_i32_5 = arith.constant 0 : i32
    %8 = arith.cmpi ne, %7, %c0_i32_5 : i32
    scf.if %8 {
      %c0_8 = arith.constant 0 : index
      %c0_9 = arith.constant 0 : index
      %12 = vector.load %arg7[%c0_8, %c0_9] : memref<32x128xf32, #tpu.memory_space<vmem>>, vector<32x128xf32>
      %13 = arith.addf %12, %2 : vector<32x128xf32>
      %c0_10 = arith.constant 0 : index
      %c0_11 = arith.constant 0 : index
      %14 = vector.load %arg7[%c0_10, %c0_11] : memref<32x128xf32, #tpu.memory_space<vmem>>, vector<32x128xf32>
      tpu.vector_store %arg7[%c0_10, %c0_11], %13 {strides = array<i32>} : memref<32x128xf32, #tpu.memory_space<vmem>>, vector<32x128xf32>,
    } else {
    }
    %c0_i32_6 = arith.constant 0 : i32
    %9 = arith.cmpi eq, %arg2, %c0_i32_6 : i32
    %10 = arith.extui %9 : i1 to i32
    %c0_i32_7 = arith.constant 0 : i32
    %11 = arith.cmpi ne, %10, %c0_i32_7 : i32
    scf.if %11 {
      %c0_8 = arith.constant 0 : index
      %c0_9 = arith.constant 0 : index
      %12 = vector.load %arg7[%c0_8, %c0_9] : memref<32x128xf32, #tpu.memory_space<vmem>>, vector<32x128xf32>
      %c0_10 = arith.constant 0 : index
      %c0_11 = arith.constant 0 : index
      %13 = vector.load %arg5[%c0_10, %c0_11] : memref<1x128xf32, #tpu.memory_space<vmem>>, vector<1x128xf32>
      %14 = vector.broadcast %13 : vector<1x128xf32> to vector<32x128xf32>
      %15 = arith.addf %12, %14 : vector<32x128xf32>
      %cst_12 = arith.constant 0.000000e+00 : f32
      %16 = vector.broadcast %cst_12 : f32 to vector<32x128xf32>
      %17 = arith.maximumf %15, %16 : vector<32x128xf32>
      %18 = arith.truncf %17 : vector<32x128xf32> to vector<32x128xbf16>
      %c0_13 = arith.constant 0 : index
      %c0_14 = arith.constant 0 : index
      %19 = vector.load %arg6[%c0_13, %c0_14] : memref<32x128xbf16, #tpu.memory_space<vmem>>, vector<32x128xbf16>
      tpu.vector_store %arg6[%c0_13, %c0_14], %18 {strides = array<i32>} : memref<32x128xbf16, #tpu.memory_space<vmem>>, vector<32x128xbf16>,
    } else {
    }
    return
  }
  func.func @transform_0(%arg0: i32, %arg1: i32, %arg2: i32) -> (i32, i32) {
    %c0_i32 = arith.constant 0 : i32
    return %arg0, %arg2 : i32, i32
  }
  func.func @transform_1(%arg0: i32, %arg1: i32, %arg2: i32) -> (i32, i32) {
    %c0_i32 = arith.constant 0 : i32
    return %arg2, %arg1 : i32, i32
  }
  func.func @transform_2(%arg0: i32, %arg1: i32, %arg2: i32) -> (i32, i32) {
    %c0_i32 = arith.constant 0 : i32
    %c0_i32_0 = arith.constant 0 : i32
    return %c0_i32, %arg1 : i32, i32
  }
  func.func @transform_3(%arg0: i32, %arg1: i32, %arg2: i32) -> (i32, i32) {
    %c0_i32 = arith.constant 0 : i32
    return %arg0, %arg1 : i32, i32
  }
}

module attributes {stable_mosaic.version = 11 : i64} {
  func.func @kernel(%arg0: i32, %arg1: i32, %arg2: i32, %arg3: memref<8x640xbf16, #tpu.memory_space<vmem>>, %arg4: memref<640x128xbf16, #tpu.memory_space<vmem>>, %arg5: memref<1x128xf32, #tpu.memory_space<vmem>>, %arg6: memref<8x128xbf16, #tpu.memory_space<vmem>>, %arg7: memref<8x128xf32, #tpu.memory_space<vmem>>) attributes {dimension_semantics = [#tpu.dimension_semantics<parallel>, #tpu.dimension_semantics<parallel>, #tpu.dimension_semantics<arbitrary>], iteration_bounds = array<i64: 1, 1, 1>, scalar_prefetch = 0 : i64, scratch_operands = 1 : i64, tpu.core_type = #tpu.core_type<tc>, window_params = [{transform_indices = @transform_0, window_bounds = array<i64: 8, 640>}, {transform_indices = @transform_1, window_bounds = array<i64: 640, 128>}, {transform_indices = @transform_2, window_bounds = array<i64: 1, 128>}, {transform_indices = @transform_3, window_bounds = array<i64: 8, 128>}]} {
    %c0 = arith.constant 0 : index
    %c0_0 = arith.constant 0 : index
    %0 = vector.load %arg3[%c0, %c0_0] : memref<8x640xbf16, #tpu.memory_space<vmem>>, vector<8x640xbf16>
    %c0_1 = arith.constant 0 : index
    %c0_2 = arith.constant 0 : index
    %1 = vector.load %arg4[%c0_1, %c0_2] : memref<640x128xbf16, #tpu.memory_space<vmem>>, vector<640x128xbf16>
    %cst = arith.constant dense<0.000000e+00> : vector<8x128xf32>
    %2 = tpu.matmul %0, %1, %cst {dimension_numbers = #tpu.dot_dimension_numbers<[1], [0], [0], [1], [0, 0, 1, 1], [], []>} : vector<8x640xbf16>, vector<640x128xbf16>, vector<8x128xf32> -> vector<8x128xf32>
    %c0_i32 = arith.constant 0 : i32
    %3 = arith.cmpi eq, %arg2, %c0_i32 : i32
    %4 = arith.extui %3 : i1 to i32
    %c0_i32_3 = arith.constant 0 : i32
    %5 = arith.cmpi ne, %4, %c0_i32_3 : i32
    scf.if %5 {
      %c0_8 = arith.constant 0 : index
      %c0_9 = arith.constant 0 : index
      %12 = vector.load %arg7[%c0_8, %c0_9] : memref<8x128xf32, #tpu.memory_space<vmem>>, vector<8x128xf32>
      tpu.vector_store %arg7[%c0_8, %c0_9], %2 {strides = array<i32>} : memref<8x128xf32, #tpu.memory_space<vmem>>, vector<8x128xf32>,
    } else {
    }
    %c0_i32_4 = arith.constant 0 : i32
    %6 = arith.cmpi ne, %arg2, %c0_i32_4 : i32
    %7 = arith.extui %6 : i1 to i32
    %c0_i32_5 = arith.constant 0 : i32
    %8 = arith.cmpi ne, %7, %c0_i32_5 : i32
    scf.if %8 {
      %c0_8 = arith.constant 0 : index
      %c0_9 = arith.constant 0 : index
      %12 = vector.load %arg7[%c0_8, %c0_9] : memref<8x128xf32, #tpu.memory_space<vmem>>, vector<8x128xf32>
      %13 = arith.addf %12, %2 : vector<8x128xf32>
      %c0_10 = arith.constant 0 : index
      %c0_11 = arith.constant 0 : index
      %14 = vector.load %arg7[%c0_10, %c0_11] : memref<8x128xf32, #tpu.memory_space<vmem>>, vector<8x128xf32>
      tpu.vector_store %arg7[%c0_10, %c0_11], %13 {strides = array<i32>} : memref<8x128xf32, #tpu.memory_space<vmem>>, vector<8x128xf32>,
    } else {
    }
    %c0_i32_6 = arith.constant 0 : i32
    %9 = arith.cmpi eq, %arg2, %c0_i32_6 : i32
    %10 = arith.extui %9 : i1 to i32
    %c0_i32_7 = arith.constant 0 : i32
    %11 = arith.cmpi ne, %10, %c0_i32_7 : i32
    scf.if %11 {
      %c0_8 = arith.constant 0 : index
      %c0_9 = arith.constant 0 : index
      %12 = vector.load %arg7[%c0_8, %c0_9] : memref<8x128xf32, #tpu.memory_space<vmem>>, vector<8x128xf32>
      %c0_10 = arith.constant 0 : index
      %c0_11 = arith.constant 0 : index
      %13 = vector.load %arg5[%c0_10, %c0_11] : memref<1x128xf32, #tpu.memory_space<vmem>>, vector<1x128xf32>
      %14 = vector.broadcast %13 : vector<1x128xf32> to vector<8x128xf32>
      %15 = arith.addf %12, %14 : vector<8x128xf32>
      %cst_12 = arith.constant 0.000000e+00 : f32
      %16 = vector.broadcast %cst_12 : f32 to vector<8x128xf32>
      %17 = arith.maximumf %15, %16 : vector<8x128xf32>
      %18 = arith.truncf %17 : vector<8x128xf32> to vector<8x128xbf16>
      %c0_13 = arith.constant 0 : index
      %c0_14 = arith.constant 0 : index
      %19 = vector.load %arg6[%c0_13, %c0_14] : memref<8x128xbf16, #tpu.memory_space<vmem>>, vector<8x128xbf16>
      tpu.vector_store %arg6[%c0_13, %c0_14], %18 {strides = array<i32>} : memref<8x128xbf16, #tpu.memory_space<vmem>>, vector<8x128xbf16>,
    } else {
    }
    return
  }
  func.func @transform_0(%arg0: i32, %arg1: i32, %arg2: i32) -> (i32, i32) {
    %c0_i32 = arith.constant 0 : i32
    return %arg0, %arg2 : i32, i32
  }
  func.func @transform_1(%arg0: i32, %arg1: i32, %arg2: i32) -> (i32, i32) {
    %c0_i32 = arith.constant 0 : i32
    return %arg2, %arg1 : i32, i32
  }
  func.func @transform_2(%arg0: i32, %arg1: i32, %arg2: i32) -> (i32, i32) {
    %c0_i32 = arith.constant 0 : i32
    %c0_i32_0 = arith.constant 0 : i32
    return %c0_i32, %arg1 : i32, i32
  }
  func.func @transform_3(%arg0: i32, %arg1: i32, %arg2: i32) -> (i32, i32) {
    %c0_i32 = arith.constant 0 : i32
    return %arg0, %arg1 : i32, i32
  }
}

module attributes {stable_mosaic.version = 11 : i64} {
  func.func @kernel(%arg0: i32, %arg1: i32, %arg2: i32, %arg3: memref<8x128xbf16, #tpu.memory_space<vmem>>, %arg4: memref<128x256xbf16, #tpu.memory_space<vmem>>, %arg5: memref<1x256xf32, #tpu.memory_space<vmem>>, %arg6: memref<8x256xbf16, #tpu.memory_space<vmem>>, %arg7: memref<8x256xbf16, #tpu.memory_space<vmem>>, %arg8: memref<8x256xf32, #tpu.memory_space<vmem>>) attributes {dimension_semantics = [#tpu.dimension_semantics<parallel>, #tpu.dimension_semantics<parallel>, #tpu.dimension_semantics<arbitrary>], iteration_bounds = array<i64: 1, 1, 1>, scalar_prefetch = 0 : i64, scratch_operands = 1 : i64, tpu.core_type = #tpu.core_type<tc>, window_params = [{transform_indices = @transform_0, window_bounds = array<i64: 8, 128>}, {transform_indices = @transform_1, window_bounds = array<i64: 128, 256>}, {transform_indices = @transform_2, window_bounds = array<i64: 1, 256>}, {transform_indices = @transform_3, window_bounds = array<i64: 8, 256>}, {transform_indices = @transform_4, window_bounds = array<i64: 8, 256>}]} {
    %c0 = arith.constant 0 : index
    %c0_0 = arith.constant 0 : index
    %0 = vector.load %arg3[%c0, %c0_0] : memref<8x128xbf16, #tpu.memory_space<vmem>>, vector<8x128xbf16>
    %c0_1 = arith.constant 0 : index
    %c0_2 = arith.constant 0 : index
    %1 = vector.load %arg4[%c0_1, %c0_2] : memref<128x256xbf16, #tpu.memory_space<vmem>>, vector<128x256xbf16>
    %cst = arith.constant dense<0.000000e+00> : vector<8x256xf32>
    %2 = tpu.matmul %0, %1, %cst {dimension_numbers = #tpu.dot_dimension_numbers<[1], [0], [0], [1], [0, 0, 1, 1], [], []>} : vector<8x128xbf16>, vector<128x256xbf16>, vector<8x256xf32> -> vector<8x256xf32>
    %c0_i32 = arith.constant 0 : i32
    %3 = arith.cmpi eq, %arg2, %c0_i32 : i32
    %4 = arith.extui %3 : i1 to i32
    %c0_i32_3 = arith.constant 0 : i32
    %5 = arith.cmpi ne, %4, %c0_i32_3 : i32
    scf.if %5 {
      %c0_8 = arith.constant 0 : index
      %c0_9 = arith.constant 0 : index
      %12 = vector.load %arg8[%c0_8, %c0_9] : memref<8x256xf32, #tpu.memory_space<vmem>>, vector<8x256xf32>
      tpu.vector_store %arg8[%c0_8, %c0_9], %2 {strides = array<i32>} : memref<8x256xf32, #tpu.memory_space<vmem>>, vector<8x256xf32>,
    } else {
    }
    %c0_i32_4 = arith.constant 0 : i32
    %6 = arith.cmpi ne, %arg2, %c0_i32_4 : i32
    %7 = arith.extui %6 : i1 to i32
    %c0_i32_5 = arith.constant 0 : i32
    %8 = arith.cmpi ne, %7, %c0_i32_5 : i32
    scf.if %8 {
      %c0_8 = arith.constant 0 : index
      %c0_9 = arith.constant 0 : index
      %12 = vector.load %arg8[%c0_8, %c0_9] : memref<8x256xf32, #tpu.memory_space<vmem>>, vector<8x256xf32>
      %13 = arith.addf %12, %2 : vector<8x256xf32>
      %c0_10 = arith.constant 0 : index
      %c0_11 = arith.constant 0 : index
      %14 = vector.load %arg8[%c0_10, %c0_11] : memref<8x256xf32, #tpu.memory_space<vmem>>, vector<8x256xf32>
      tpu.vector_store %arg8[%c0_10, %c0_11], %13 {strides = array<i32>} : memref<8x256xf32, #tpu.memory_space<vmem>>, vector<8x256xf32>,
    } else {
    }
    %c0_i32_6 = arith.constant 0 : i32
    %9 = arith.cmpi eq, %arg2, %c0_i32_6 : i32
    %10 = arith.extui %9 : i1 to i32
    %c0_i32_7 = arith.constant 0 : i32
    %11 = arith.cmpi ne, %10, %c0_i32_7 : i32
    scf.if %11 {
      %c0_8 = arith.constant 0 : index
      %c0_9 = arith.constant 0 : index
      %12 = vector.load %arg8[%c0_8, %c0_9] : memref<8x256xf32, #tpu.memory_space<vmem>>, vector<8x256xf32>
      %c0_10 = arith.constant 0 : index
      %c0_11 = arith.constant 0 : index
      %13 = vector.load %arg5[%c0_10, %c0_11] : memref<1x256xf32, #tpu.memory_space<vmem>>, vector<1x256xf32>
      %14 = vector.broadcast %13 : vector<1x256xf32> to vector<8x256xf32>
      %15 = arith.addf %12, %14 : vector<8x256xf32>
      %c0_12 = arith.constant 0 : index
      %c0_13 = arith.constant 0 : index
      %16 = vector.load %arg6[%c0_12, %c0_13] : memref<8x256xbf16, #tpu.memory_space<vmem>>, vector<8x256xbf16>
      %17 = arith.extf %16 : vector<8x256xbf16> to vector<8x256xf32>
      %18 = arith.addf %15, %17 : vector<8x256xf32>
      %cst_14 = arith.constant 0.000000e+00 : f32
      %19 = vector.broadcast %cst_14 : f32 to vector<8x256xf32>
      %20 = arith.maximumf %18, %19 : vector<8x256xf32>
      %21 = arith.truncf %20 : vector<8x256xf32> to vector<8x256xbf16>
      %c0_15 = arith.constant 0 : index
      %c0_16 = arith.constant 0 : index
      %22 = vector.load %arg7[%c0_15, %c0_16] : memref<8x256xbf16, #tpu.memory_space<vmem>>, vector<8x256xbf16>
      tpu.vector_store %arg7[%c0_15, %c0_16], %21 {strides = array<i32>} : memref<8x256xbf16, #tpu.memory_space<vmem>>, vector<8x256xbf16>,
    } else {
    }
    return
  }
  func.func @transform_0(%arg0: i32, %arg1: i32, %arg2: i32) -> (i32, i32) {
    %c0_i32 = arith.constant 0 : i32
    return %arg0, %arg2 : i32, i32
  }
  func.func @transform_1(%arg0: i32, %arg1: i32, %arg2: i32) -> (i32, i32) {
    %c0_i32 = arith.constant 0 : i32
    return %arg2, %arg1 : i32, i32
  }
  func.func @transform_2(%arg0: i32, %arg1: i32, %arg2: i32) -> (i32, i32) {
    %c0_i32 = arith.constant 0 : i32
    %c0_i32_0 = arith.constant 0 : i32
    return %c0_i32, %arg1 : i32, i32
  }
  func.func @transform_3(%arg0: i32, %arg1: i32, %arg2: i32) -> (i32, i32) {
    %c0_i32 = arith.constant 0 : i32
    return %arg0, %arg1 : i32, i32
  }
  func.func @transform_4(%arg0: i32, %arg1: i32, %arg2: i32) -> (i32, i32) {
    %c0_i32 = arith.constant 0 : i32
    return %arg0, %arg1 : i32, i32
  }
}

module attributes {stable_mosaic.version = 11 : i64} {
  func.func @kernel(%arg0: i32, %arg1: i32, %arg2: i32, %arg3: memref<8x128xbf16, #tpu.memory_space<vmem>>, %arg4: memref<128x256xbf16, #tpu.memory_space<vmem>>, %arg5: memref<1x256xf32, #tpu.memory_space<vmem>>, %arg6: memref<8x256xbf16, #tpu.memory_space<vmem>>, %arg7: memref<8x256xf32, #tpu.memory_space<vmem>>) attributes {dimension_semantics = [#tpu.dimension_semantics<parallel>, #tpu.dimension_semantics<parallel>, #tpu.dimension_semantics<arbitrary>], iteration_bounds = array<i64: 1, 1, 1>, scalar_prefetch = 0 : i64, scratch_operands = 1 : i64, tpu.core_type = #tpu.core_type<tc>, window_params = [{transform_indices = @transform_0, window_bounds = array<i64: 8, 128>}, {transform_indices = @transform_1, window_bounds = array<i64: 128, 256>}, {transform_indices = @transform_2, window_bounds = array<i64: 1, 256>}, {transform_indices = @transform_3, window_bounds = array<i64: 8, 256>}]} {
    %c0 = arith.constant 0 : index
    %c0_0 = arith.constant 0 : index
    %0 = vector.load %arg3[%c0, %c0_0] : memref<8x128xbf16, #tpu.memory_space<vmem>>, vector<8x128xbf16>
    %c0_1 = arith.constant 0 : index
    %c0_2 = arith.constant 0 : index
    %1 = vector.load %arg4[%c0_1, %c0_2] : memref<128x256xbf16, #tpu.memory_space<vmem>>, vector<128x256xbf16>
    %cst = arith.constant dense<0.000000e+00> : vector<8x256xf32>
    %2 = tpu.matmul %0, %1, %cst {dimension_numbers = #tpu.dot_dimension_numbers<[1], [0], [0], [1], [0, 0, 1, 1], [], []>} : vector<8x128xbf16>, vector<128x256xbf16>, vector<8x256xf32> -> vector<8x256xf32>
    %c0_i32 = arith.constant 0 : i32
    %3 = arith.cmpi eq, %arg2, %c0_i32 : i32
    %4 = arith.extui %3 : i1 to i32
    %c0_i32_3 = arith.constant 0 : i32
    %5 = arith.cmpi ne, %4, %c0_i32_3 : i32
    scf.if %5 {
      %c0_8 = arith.constant 0 : index
      %c0_9 = arith.constant 0 : index
      %12 = vector.load %arg7[%c0_8, %c0_9] : memref<8x256xf32, #tpu.memory_space<vmem>>, vector<8x256xf32>
      tpu.vector_store %arg7[%c0_8, %c0_9], %2 {strides = array<i32>} : memref<8x256xf32, #tpu.memory_space<vmem>>, vector<8x256xf32>,
    } else {
    }
    %c0_i32_4 = arith.constant 0 : i32
    %6 = arith.cmpi ne, %arg2, %c0_i32_4 : i32
    %7 = arith.extui %6 : i1 to i32
    %c0_i32_5 = arith.constant 0 : i32
    %8 = arith.cmpi ne, %7, %c0_i32_5 : i32
    scf.if %8 {
      %c0_8 = arith.constant 0 : index
      %c0_9 = arith.constant 0 : index
      %12 = vector.load %arg7[%c0_8, %c0_9] : memref<8x256xf32, #tpu.memory_space<vmem>>, vector<8x256xf32>
      %13 = arith.addf %12, %2 : vector<8x256xf32>
      %c0_10 = arith.constant 0 : index
      %c0_11 = arith.constant 0 : index
      %14 = vector.load %arg7[%c0_10, %c0_11] : memref<8x256xf32, #tpu.memory_space<vmem>>, vector<8x256xf32>
      tpu.vector_store %arg7[%c0_10, %c0_11], %13 {strides = array<i32>} : memref<8x256xf32, #tpu.memory_space<vmem>>, vector<8x256xf32>,
    } else {
    }
    %c0_i32_6 = arith.constant 0 : i32
    %9 = arith.cmpi eq, %arg2, %c0_i32_6 : i32
    %10 = arith.extui %9 : i1 to i32
    %c0_i32_7 = arith.constant 0 : i32
    %11 = arith.cmpi ne, %10, %c0_i32_7 : i32
    scf.if %11 {
      %c0_8 = arith.constant 0 : index
      %c0_9 = arith.constant 0 : index
      %12 = vector.load %arg7[%c0_8, %c0_9] : memref<8x256xf32, #tpu.memory_space<vmem>>, vector<8x256xf32>
      %c0_10 = arith.constant 0 : index
      %c0_11 = arith.constant 0 : index
      %13 = vector.load %arg5[%c0_10, %c0_11] : memref<1x256xf32, #tpu.memory_space<vmem>>, vector<1x256xf32>
      %14 = vector.broadcast %13 : vector<1x256xf32> to vector<8x256xf32>
      %15 = arith.addf %12, %14 : vector<8x256xf32>
      %16 = arith.truncf %15 : vector<8x256xf32> to vector<8x256xbf16>
      %c0_12 = arith.constant 0 : index
      %c0_13 = arith.constant 0 : index
      %17 = vector.load %arg6[%c0_12, %c0_13] : memref<8x256xbf16, #tpu.memory_space<vmem>>, vector<8x256xbf16>
      tpu.vector_store %arg6[%c0_12, %c0_13], %16 {strides = array<i32>} : memref<8x256xbf16, #tpu.memory_space<vmem>>, vector<8x256xbf16>,
    } else {
    }
    return
  }
  func.func @transform_0(%arg0: i32, %arg1: i32, %arg2: i32) -> (i32, i32) {
    %c0_i32 = arith.constant 0 : i32
    return %arg0, %arg2 : i32, i32
  }
  func.func @transform_1(%arg0: i32, %arg1: i32, %arg2: i32) -> (i32, i32) {
    %c0_i32 = arith.constant 0 : i32
    return %arg2, %arg1 : i32, i32
  }
  func.func @transform_2(%arg0: i32, %arg1: i32, %arg2: i32) -> (i32, i32) {
    %c0_i32 = arith.constant 0 : i32
    %c0_i32_0 = arith.constant 0 : i32
    return %c0_i32, %arg1 : i32, i32
  }
  func.func @transform_3(%arg0: i32, %arg1: i32, %arg2: i32) -> (i32, i32) {
    %c0_i32 = arith.constant 0 : i32
    return %arg0, %arg1 : i32, i32
  }
}

module attributes {stable_mosaic.version = 11 : i64} {
  func.func @kernel(%arg0: i32, %arg1: i32, %arg2: i32, %arg3: memref<8x256xbf16, #tpu.memory_space<vmem>>, %arg4: memref<256x128xbf16, #tpu.memory_space<vmem>>, %arg5: memref<1x128xf32, #tpu.memory_space<vmem>>, %arg6: memref<8x128xbf16, #tpu.memory_space<vmem>>, %arg7: memref<8x128xf32, #tpu.memory_space<vmem>>) attributes {dimension_semantics = [#tpu.dimension_semantics<parallel>, #tpu.dimension_semantics<parallel>, #tpu.dimension_semantics<arbitrary>], iteration_bounds = array<i64: 1, 1, 1>, scalar_prefetch = 0 : i64, scratch_operands = 1 : i64, tpu.core_type = #tpu.core_type<tc>, window_params = [{transform_indices = @transform_0, window_bounds = array<i64: 8, 256>}, {transform_indices = @transform_1, window_bounds = array<i64: 256, 128>}, {transform_indices = @transform_2, window_bounds = array<i64: 1, 128>}, {transform_indices = @transform_3, window_bounds = array<i64: 8, 128>}]} {
    %c0 = arith.constant 0 : index
    %c0_0 = arith.constant 0 : index
    %0 = vector.load %arg3[%c0, %c0_0] : memref<8x256xbf16, #tpu.memory_space<vmem>>, vector<8x256xbf16>
    %c0_1 = arith.constant 0 : index
    %c0_2 = arith.constant 0 : index
    %1 = vector.load %arg4[%c0_1, %c0_2] : memref<256x128xbf16, #tpu.memory_space<vmem>>, vector<256x128xbf16>
    %cst = arith.constant dense<0.000000e+00> : vector<8x128xf32>
    %2 = tpu.matmul %0, %1, %cst {dimension_numbers = #tpu.dot_dimension_numbers<[1], [0], [0], [1], [0, 0, 1, 1], [], []>} : vector<8x256xbf16>, vector<256x128xbf16>, vector<8x128xf32> -> vector<8x128xf32>
    %c0_i32 = arith.constant 0 : i32
    %3 = arith.cmpi eq, %arg2, %c0_i32 : i32
    %4 = arith.extui %3 : i1 to i32
    %c0_i32_3 = arith.constant 0 : i32
    %5 = arith.cmpi ne, %4, %c0_i32_3 : i32
    scf.if %5 {
      %c0_8 = arith.constant 0 : index
      %c0_9 = arith.constant 0 : index
      %12 = vector.load %arg7[%c0_8, %c0_9] : memref<8x128xf32, #tpu.memory_space<vmem>>, vector<8x128xf32>
      tpu.vector_store %arg7[%c0_8, %c0_9], %2 {strides = array<i32>} : memref<8x128xf32, #tpu.memory_space<vmem>>, vector<8x128xf32>,
    } else {
    }
    %c0_i32_4 = arith.constant 0 : i32
    %6 = arith.cmpi ne, %arg2, %c0_i32_4 : i32
    %7 = arith.extui %6 : i1 to i32
    %c0_i32_5 = arith.constant 0 : i32
    %8 = arith.cmpi ne, %7, %c0_i32_5 : i32
    scf.if %8 {
      %c0_8 = arith.constant 0 : index
      %c0_9 = arith.constant 0 : index
      %12 = vector.load %arg7[%c0_8, %c0_9] : memref<8x128xf32, #tpu.memory_space<vmem>>, vector<8x128xf32>
      %13 = arith.addf %12, %2 : vector<8x128xf32>
      %c0_10 = arith.constant 0 : index
      %c0_11 = arith.constant 0 : index
      %14 = vector.load %arg7[%c0_10, %c0_11] : memref<8x128xf32, #tpu.memory_space<vmem>>, vector<8x128xf32>
      tpu.vector_store %arg7[%c0_10, %c0_11], %13 {strides = array<i32>} : memref<8x128xf32, #tpu.memory_space<vmem>>, vector<8x128xf32>,
    } else {
    }
    %c0_i32_6 = arith.constant 0 : i32
    %9 = arith.cmpi eq, %arg2, %c0_i32_6 : i32
    %10 = arith.extui %9 : i1 to i32
    %c0_i32_7 = arith.constant 0 : i32
    %11 = arith.cmpi ne, %10, %c0_i32_7 : i32
    scf.if %11 {
      %c0_8 = arith.constant 0 : index
      %c0_9 = arith.constant 0 : index
      %12 = vector.load %arg7[%c0_8, %c0_9] : memref<8x128xf32, #tpu.memory_space<vmem>>, vector<8x128xf32>
      %c0_10 = arith.constant 0 : index
      %c0_11 = arith.constant 0 : index
      %13 = vector.load %arg5[%c0_10, %c0_11] : memref<1x128xf32, #tpu.memory_space<vmem>>, vector<1x128xf32>
      %14 = vector.broadcast %13 : vector<1x128xf32> to vector<8x128xf32>
      %15 = arith.addf %12, %14 : vector<8x128xf32>
      %cst_12 = arith.constant 0.000000e+00 : f32
      %16 = vector.broadcast %cst_12 : f32 to vector<8x128xf32>
      %17 = arith.maximumf %15, %16 : vector<8x128xf32>
      %18 = arith.truncf %17 : vector<8x128xf32> to vector<8x128xbf16>
      %c0_13 = arith.constant 0 : index
      %c0_14 = arith.constant 0 : index
      %19 = vector.load %arg6[%c0_13, %c0_14] : memref<8x128xbf16, #tpu.memory_space<vmem>>, vector<8x128xbf16>
      tpu.vector_store %arg6[%c0_13, %c0_14], %18 {strides = array<i32>} : memref<8x128xbf16, #tpu.memory_space<vmem>>, vector<8x128xbf16>,
    } else {
    }
    return
  }
  func.func @transform_0(%arg0: i32, %arg1: i32, %arg2: i32) -> (i32, i32) {
    %c0_i32 = arith.constant 0 : i32
    return %arg0, %arg2 : i32, i32
  }
  func.func @transform_1(%arg0: i32, %arg1: i32, %arg2: i32) -> (i32, i32) {
    %c0_i32 = arith.constant 0 : i32
    return %arg2, %arg1 : i32, i32
  }
  func.func @transform_2(%arg0: i32, %arg1: i32, %arg2: i32) -> (i32, i32) {
    %c0_i32 = arith.constant 0 : i32
    %c0_i32_0 = arith.constant 0 : i32
    return %c0_i32, %arg1 : i32, i32
  }
  func.func @transform_3(%arg0: i32, %arg1: i32, %arg2: i32) -> (i32, i32) {
    %c0_i32 = arith.constant 0 : i32
    return %arg0, %arg1 : i32, i32
  }
}

module attributes {stable_mosaic.version = 11 : i64} {
  func.func @kernel(%arg0: i32, %arg1: i32, %arg2: i32, %arg3: memref<8x1152xbf16, #tpu.memory_space<vmem>>, %arg4: memref<1152x128xbf16, #tpu.memory_space<vmem>>, %arg5: memref<1x128xf32, #tpu.memory_space<vmem>>, %arg6: memref<8x128xbf16, #tpu.memory_space<vmem>>, %arg7: memref<8x128xf32, #tpu.memory_space<vmem>>) attributes {dimension_semantics = [#tpu.dimension_semantics<parallel>, #tpu.dimension_semantics<parallel>, #tpu.dimension_semantics<arbitrary>], iteration_bounds = array<i64: 1, 1, 1>, scalar_prefetch = 0 : i64, scratch_operands = 1 : i64, tpu.core_type = #tpu.core_type<tc>, window_params = [{transform_indices = @transform_0, window_bounds = array<i64: 8, 1152>}, {transform_indices = @transform_1, window_bounds = array<i64: 1152, 128>}, {transform_indices = @transform_2, window_bounds = array<i64: 1, 128>}, {transform_indices = @transform_3, window_bounds = array<i64: 8, 128>}]} {
    %c0 = arith.constant 0 : index
    %c0_0 = arith.constant 0 : index
    %0 = vector.load %arg3[%c0, %c0_0] : memref<8x1152xbf16, #tpu.memory_space<vmem>>, vector<8x1152xbf16>
    %c0_1 = arith.constant 0 : index
    %c0_2 = arith.constant 0 : index
    %1 = vector.load %arg4[%c0_1, %c0_2] : memref<1152x128xbf16, #tpu.memory_space<vmem>>, vector<1152x128xbf16>
    %cst = arith.constant dense<0.000000e+00> : vector<8x128xf32>
    %2 = tpu.matmul %0, %1, %cst {dimension_numbers = #tpu.dot_dimension_numbers<[1], [0], [0], [1], [0, 0, 1, 1], [], []>} : vector<8x1152xbf16>, vector<1152x128xbf16>, vector<8x128xf32> -> vector<8x128xf32>
    %c0_i32 = arith.constant 0 : i32
    %3 = arith.cmpi eq, %arg2, %c0_i32 : i32
    %4 = arith.extui %3 : i1 to i32
    %c0_i32_3 = arith.constant 0 : i32
    %5 = arith.cmpi ne, %4, %c0_i32_3 : i32
    scf.if %5 {
      %c0_8 = arith.constant 0 : index
      %c0_9 = arith.constant 0 : index
      %12 = vector.load %arg7[%c0_8, %c0_9] : memref<8x128xf32, #tpu.memory_space<vmem>>, vector<8x128xf32>
      tpu.vector_store %arg7[%c0_8, %c0_9], %2 {strides = array<i32>} : memref<8x128xf32, #tpu.memory_space<vmem>>, vector<8x128xf32>,
    } else {
    }
    %c0_i32_4 = arith.constant 0 : i32
    %6 = arith.cmpi ne, %arg2, %c0_i32_4 : i32
    %7 = arith.extui %6 : i1 to i32
    %c0_i32_5 = arith.constant 0 : i32
    %8 = arith.cmpi ne, %7, %c0_i32_5 : i32
    scf.if %8 {
      %c0_8 = arith.constant 0 : index
      %c0_9 = arith.constant 0 : index
      %12 = vector.load %arg7[%c0_8, %c0_9] : memref<8x128xf32, #tpu.memory_space<vmem>>, vector<8x128xf32>
      %13 = arith.addf %12, %2 : vector<8x128xf32>
      %c0_10 = arith.constant 0 : index
      %c0_11 = arith.constant 0 : index
      %14 = vector.load %arg7[%c0_10, %c0_11] : memref<8x128xf32, #tpu.memory_space<vmem>>, vector<8x128xf32>
      tpu.vector_store %arg7[%c0_10, %c0_11], %13 {strides = array<i32>} : memref<8x128xf32, #tpu.memory_space<vmem>>, vector<8x128xf32>,
    } else {
    }
    %c0_i32_6 = arith.constant 0 : i32
    %9 = arith.cmpi eq, %arg2, %c0_i32_6 : i32
    %10 = arith.extui %9 : i1 to i32
    %c0_i32_7 = arith.constant 0 : i32
    %11 = arith.cmpi ne, %10, %c0_i32_7 : i32
    scf.if %11 {
      %c0_8 = arith.constant 0 : index
      %c0_9 = arith.constant 0 : index
      %12 = vector.load %arg7[%c0_8, %c0_9] : memref<8x128xf32, #tpu.memory_space<vmem>>, vector<8x128xf32>
      %c0_10 = arith.constant 0 : index
      %c0_11 = arith.constant 0 : index
      %13 = vector.load %arg5[%c0_10, %c0_11] : memref<1x128xf32, #tpu.memory_space<vmem>>, vector<1x128xf32>
      %14 = vector.broadcast %13 : vector<1x128xf32> to vector<8x128xf32>
      %15 = arith.addf %12, %14 : vector<8x128xf32>
      %cst_12 = arith.constant 0.000000e+00 : f32
      %16 = vector.broadcast %cst_12 : f32 to vector<8x128xf32>
      %17 = arith.maximumf %15, %16 : vector<8x128xf32>
      %18 = arith.truncf %17 : vector<8x128xf32> to vector<8x128xbf16>
      %c0_13 = arith.constant 0 : index
      %c0_14 = arith.constant 0 : index
      %19 = vector.load %arg6[%c0_13, %c0_14] : memref<8x128xbf16, #tpu.memory_space<vmem>>, vector<8x128xbf16>
      tpu.vector_store %arg6[%c0_13, %c0_14], %18 {strides = array<i32>} : memref<8x128xbf16, #tpu.memory_space<vmem>>, vector<8x128xbf16>,
    } else {
    }
    return
  }
  func.func @transform_0(%arg0: i32, %arg1: i32, %arg2: i32) -> (i32, i32) {
    %c0_i32 = arith.constant 0 : i32
    return %arg0, %arg2 : i32, i32
  }
  func.func @transform_1(%arg0: i32, %arg1: i32, %arg2: i32) -> (i32, i32) {
    %c0_i32 = arith.constant 0 : i32
    return %arg2, %arg1 : i32, i32
  }
  func.func @transform_2(%arg0: i32, %arg1: i32, %arg2: i32) -> (i32, i32) {
    %c0_i32 = arith.constant 0 : i32
    %c0_i32_0 = arith.constant 0 : i32
    return %c0_i32, %arg1 : i32, i32
  }
  func.func @transform_3(%arg0: i32, %arg1: i32, %arg2: i32) -> (i32, i32) {
    %c0_i32 = arith.constant 0 : i32
    return %arg0, %arg1 : i32, i32
  }
}

module attributes {stable_mosaic.version = 11 : i64} {
  func.func @kernel(%arg0: i32, %arg1: i32, %arg2: i32, %arg3: memref<8x256xbf16, #tpu.memory_space<vmem>>, %arg4: memref<256x512xbf16, #tpu.memory_space<vmem>>, %arg5: memref<1x512xf32, #tpu.memory_space<vmem>>, %arg6: memref<8x512xbf16, #tpu.memory_space<vmem>>, %arg7: memref<8x512xf32, #tpu.memory_space<vmem>>) attributes {dimension_semantics = [#tpu.dimension_semantics<parallel>, #tpu.dimension_semantics<parallel>, #tpu.dimension_semantics<arbitrary>], iteration_bounds = array<i64: 1, 1, 1>, scalar_prefetch = 0 : i64, scratch_operands = 1 : i64, tpu.core_type = #tpu.core_type<tc>, window_params = [{transform_indices = @transform_0, window_bounds = array<i64: 8, 256>}, {transform_indices = @transform_1, window_bounds = array<i64: 256, 512>}, {transform_indices = @transform_2, window_bounds = array<i64: 1, 512>}, {transform_indices = @transform_3, window_bounds = array<i64: 8, 512>}]} {
    %c0 = arith.constant 0 : index
    %c0_0 = arith.constant 0 : index
    %0 = vector.load %arg3[%c0, %c0_0] : memref<8x256xbf16, #tpu.memory_space<vmem>>, vector<8x256xbf16>
    %c0_1 = arith.constant 0 : index
    %c0_2 = arith.constant 0 : index
    %1 = vector.load %arg4[%c0_1, %c0_2] : memref<256x512xbf16, #tpu.memory_space<vmem>>, vector<256x512xbf16>
    %cst = arith.constant dense<0.000000e+00> : vector<8x512xf32>
    %2 = tpu.matmul %0, %1, %cst {dimension_numbers = #tpu.dot_dimension_numbers<[1], [0], [0], [1], [0, 0, 1, 1], [], []>} : vector<8x256xbf16>, vector<256x512xbf16>, vector<8x512xf32> -> vector<8x512xf32>
    %c0_i32 = arith.constant 0 : i32
    %3 = arith.cmpi eq, %arg2, %c0_i32 : i32
    %4 = arith.extui %3 : i1 to i32
    %c0_i32_3 = arith.constant 0 : i32
    %5 = arith.cmpi ne, %4, %c0_i32_3 : i32
    scf.if %5 {
      %c0_8 = arith.constant 0 : index
      %c0_9 = arith.constant 0 : index
      %12 = vector.load %arg7[%c0_8, %c0_9] : memref<8x512xf32, #tpu.memory_space<vmem>>, vector<8x512xf32>
      tpu.vector_store %arg7[%c0_8, %c0_9], %2 {strides = array<i32>} : memref<8x512xf32, #tpu.memory_space<vmem>>, vector<8x512xf32>,
    } else {
    }
    %c0_i32_4 = arith.constant 0 : i32
    %6 = arith.cmpi ne, %arg2, %c0_i32_4 : i32
    %7 = arith.extui %6 : i1 to i32
    %c0_i32_5 = arith.constant 0 : i32
    %8 = arith.cmpi ne, %7, %c0_i32_5 : i32
    scf.if %8 {
      %c0_8 = arith.constant 0 : index
      %c0_9 = arith.constant 0 : index
      %12 = vector.load %arg7[%c0_8, %c0_9] : memref<8x512xf32, #tpu.memory_space<vmem>>, vector<8x512xf32>
      %13 = arith.addf %12, %2 : vector<8x512xf32>
      %c0_10 = arith.constant 0 : index
      %c0_11 = arith.constant 0 : index
      %14 = vector.load %arg7[%c0_10, %c0_11] : memref<8x512xf32, #tpu.memory_space<vmem>>, vector<8x512xf32>
      tpu.vector_store %arg7[%c0_10, %c0_11], %13 {strides = array<i32>} : memref<8x512xf32, #tpu.memory_space<vmem>>, vector<8x512xf32>,
    } else {
    }
    %c0_i32_6 = arith.constant 0 : i32
    %9 = arith.cmpi eq, %arg2, %c0_i32_6 : i32
    %10 = arith.extui %9 : i1 to i32
    %c0_i32_7 = arith.constant 0 : i32
    %11 = arith.cmpi ne, %10, %c0_i32_7 : i32
    scf.if %11 {
      %c0_8 = arith.constant 0 : index
      %c0_9 = arith.constant 0 : index
      %12 = vector.load %arg7[%c0_8, %c0_9] : memref<8x512xf32, #tpu.memory_space<vmem>>, vector<8x512xf32>
      %c0_10 = arith.constant 0 : index
      %c0_11 = arith.constant 0 : index
      %13 = vector.load %arg5[%c0_10, %c0_11] : memref<1x512xf32, #tpu.memory_space<vmem>>, vector<1x512xf32>
      %14 = vector.broadcast %13 : vector<1x512xf32> to vector<8x512xf32>
      %15 = arith.addf %12, %14 : vector<8x512xf32>
      %16 = arith.truncf %15 : vector<8x512xf32> to vector<8x512xbf16>
      %c0_12 = arith.constant 0 : index
      %c0_13 = arith.constant 0 : index
      %17 = vector.load %arg6[%c0_12, %c0_13] : memref<8x512xbf16, #tpu.memory_space<vmem>>, vector<8x512xbf16>
      tpu.vector_store %arg6[%c0_12, %c0_13], %16 {strides = array<i32>} : memref<8x512xbf16, #tpu.memory_space<vmem>>, vector<8x512xbf16>,
    } else {
    }
    return
  }
  func.func @transform_0(%arg0: i32, %arg1: i32, %arg2: i32) -> (i32, i32) {
    %c0_i32 = arith.constant 0 : i32
    return %arg0, %arg2 : i32, i32
  }
  func.func @transform_1(%arg0: i32, %arg1: i32, %arg2: i32) -> (i32, i32) {
    %c0_i32 = arith.constant 0 : i32
    return %arg2, %arg1 : i32, i32
  }
  func.func @transform_2(%arg0: i32, %arg1: i32, %arg2: i32) -> (i32, i32) {
    %c0_i32 = arith.constant 0 : i32
    %c0_i32_0 = arith.constant 0 : i32
    return %c0_i32, %arg1 : i32, i32
  }
  func.func @transform_3(%arg0: i32, %arg1: i32, %arg2: i32) -> (i32, i32) {
    %c0_i32 = arith.constant 0 : i32
    return %arg0, %arg1 : i32, i32
  }
}

module attributes {stable_mosaic.version = 11 : i64} {
  func.func @kernel(%arg0: i32, %arg1: i32, %arg2: i32, %arg3: memref<8x512xbf16, #tpu.memory_space<vmem>>, %arg4: memref<512x128xbf16, #tpu.memory_space<vmem>>, %arg5: memref<1x128xf32, #tpu.memory_space<vmem>>, %arg6: memref<8x128xbf16, #tpu.memory_space<vmem>>, %arg7: memref<8x128xf32, #tpu.memory_space<vmem>>) attributes {dimension_semantics = [#tpu.dimension_semantics<parallel>, #tpu.dimension_semantics<parallel>, #tpu.dimension_semantics<arbitrary>], iteration_bounds = array<i64: 1, 1, 1>, scalar_prefetch = 0 : i64, scratch_operands = 1 : i64, tpu.core_type = #tpu.core_type<tc>, window_params = [{transform_indices = @transform_0, window_bounds = array<i64: 8, 512>}, {transform_indices = @transform_1, window_bounds = array<i64: 512, 128>}, {transform_indices = @transform_2, window_bounds = array<i64: 1, 128>}, {transform_indices = @transform_3, window_bounds = array<i64: 8, 128>}]} {
    %c0 = arith.constant 0 : index
    %c0_0 = arith.constant 0 : index
    %0 = vector.load %arg3[%c0, %c0_0] : memref<8x512xbf16, #tpu.memory_space<vmem>>, vector<8x512xbf16>
    %c0_1 = arith.constant 0 : index
    %c0_2 = arith.constant 0 : index
    %1 = vector.load %arg4[%c0_1, %c0_2] : memref<512x128xbf16, #tpu.memory_space<vmem>>, vector<512x128xbf16>
    %cst = arith.constant dense<0.000000e+00> : vector<8x128xf32>
    %2 = tpu.matmul %0, %1, %cst {dimension_numbers = #tpu.dot_dimension_numbers<[1], [0], [0], [1], [0, 0, 1, 1], [], []>} : vector<8x512xbf16>, vector<512x128xbf16>, vector<8x128xf32> -> vector<8x128xf32>
    %c0_i32 = arith.constant 0 : i32
    %3 = arith.cmpi eq, %arg2, %c0_i32 : i32
    %4 = arith.extui %3 : i1 to i32
    %c0_i32_3 = arith.constant 0 : i32
    %5 = arith.cmpi ne, %4, %c0_i32_3 : i32
    scf.if %5 {
      %c0_8 = arith.constant 0 : index
      %c0_9 = arith.constant 0 : index
      %12 = vector.load %arg7[%c0_8, %c0_9] : memref<8x128xf32, #tpu.memory_space<vmem>>, vector<8x128xf32>
      tpu.vector_store %arg7[%c0_8, %c0_9], %2 {strides = array<i32>} : memref<8x128xf32, #tpu.memory_space<vmem>>, vector<8x128xf32>,
    } else {
    }
    %c0_i32_4 = arith.constant 0 : i32
    %6 = arith.cmpi ne, %arg2, %c0_i32_4 : i32
    %7 = arith.extui %6 : i1 to i32
    %c0_i32_5 = arith.constant 0 : i32
    %8 = arith.cmpi ne, %7, %c0_i32_5 : i32
    scf.if %8 {
      %c0_8 = arith.constant 0 : index
      %c0_9 = arith.constant 0 : index
      %12 = vector.load %arg7[%c0_8, %c0_9] : memref<8x128xf32, #tpu.memory_space<vmem>>, vector<8x128xf32>
      %13 = arith.addf %12, %2 : vector<8x128xf32>
      %c0_10 = arith.constant 0 : index
      %c0_11 = arith.constant 0 : index
      %14 = vector.load %arg7[%c0_10, %c0_11] : memref<8x128xf32, #tpu.memory_space<vmem>>, vector<8x128xf32>
      tpu.vector_store %arg7[%c0_10, %c0_11], %13 {strides = array<i32>} : memref<8x128xf32, #tpu.memory_space<vmem>>, vector<8x128xf32>,
    } else {
    }
    %c0_i32_6 = arith.constant 0 : i32
    %9 = arith.cmpi eq, %arg2, %c0_i32_6 : i32
    %10 = arith.extui %9 : i1 to i32
    %c0_i32_7 = arith.constant 0 : i32
    %11 = arith.cmpi ne, %10, %c0_i32_7 : i32
    scf.if %11 {
      %c0_8 = arith.constant 0 : index
      %c0_9 = arith.constant 0 : index
      %12 = vector.load %arg7[%c0_8, %c0_9] : memref<8x128xf32, #tpu.memory_space<vmem>>, vector<8x128xf32>
      %c0_10 = arith.constant 0 : index
      %c0_11 = arith.constant 0 : index
      %13 = vector.load %arg5[%c0_10, %c0_11] : memref<1x128xf32, #tpu.memory_space<vmem>>, vector<1x128xf32>
      %14 = vector.broadcast %13 : vector<1x128xf32> to vector<8x128xf32>
      %15 = arith.addf %12, %14 : vector<8x128xf32>
      %cst_12 = arith.constant 0.000000e+00 : f32
      %16 = vector.broadcast %cst_12 : f32 to vector<8x128xf32>
      %17 = arith.maximumf %15, %16 : vector<8x128xf32>
      %18 = arith.truncf %17 : vector<8x128xf32> to vector<8x128xbf16>
      %c0_13 = arith.constant 0 : index
      %c0_14 = arith.constant 0 : index
      %19 = vector.load %arg6[%c0_13, %c0_14] : memref<8x128xbf16, #tpu.memory_space<vmem>>, vector<8x128xbf16>
      tpu.vector_store %arg6[%c0_13, %c0_14], %18 {strides = array<i32>} : memref<8x128xbf16, #tpu.memory_space<vmem>>, vector<8x128xbf16>,
    } else {
    }
    return
  }
  func.func @transform_0(%arg0: i32, %arg1: i32, %arg2: i32) -> (i32, i32) {
    %c0_i32 = arith.constant 0 : i32
    return %arg0, %arg2 : i32, i32
  }
  func.func @transform_1(%arg0: i32, %arg1: i32, %arg2: i32) -> (i32, i32) {
    %c0_i32 = arith.constant 0 : i32
    return %arg2, %arg1 : i32, i32
  }
  func.func @transform_2(%arg0: i32, %arg1: i32, %arg2: i32) -> (i32, i32) {
    %c0_i32 = arith.constant 0 : i32
    %c0_i32_0 = arith.constant 0 : i32
    return %c0_i32, %arg1 : i32, i32
  }
  func.func @transform_3(%arg0: i32, %arg1: i32, %arg2: i32) -> (i32, i32) {
    %c0_i32 = arith.constant 0 : i32
    return %arg0, %arg1 : i32, i32
  }
}

module attributes {stable_mosaic.version = 11 : i64} {
  func.func @kernel(%arg0: i32, %arg1: i32, %arg2: i32, %arg3: memref<8x128xbf16, #tpu.memory_space<vmem>>, %arg4: memref<128x512xbf16, #tpu.memory_space<vmem>>, %arg5: memref<1x512xf32, #tpu.memory_space<vmem>>, %arg6: memref<8x512xbf16, #tpu.memory_space<vmem>>, %arg7: memref<8x512xbf16, #tpu.memory_space<vmem>>, %arg8: memref<8x512xf32, #tpu.memory_space<vmem>>) attributes {dimension_semantics = [#tpu.dimension_semantics<parallel>, #tpu.dimension_semantics<parallel>, #tpu.dimension_semantics<arbitrary>], iteration_bounds = array<i64: 1, 1, 1>, scalar_prefetch = 0 : i64, scratch_operands = 1 : i64, tpu.core_type = #tpu.core_type<tc>, window_params = [{transform_indices = @transform_0, window_bounds = array<i64: 8, 128>}, {transform_indices = @transform_1, window_bounds = array<i64: 128, 512>}, {transform_indices = @transform_2, window_bounds = array<i64: 1, 512>}, {transform_indices = @transform_3, window_bounds = array<i64: 8, 512>}, {transform_indices = @transform_4, window_bounds = array<i64: 8, 512>}]} {
    %c0 = arith.constant 0 : index
    %c0_0 = arith.constant 0 : index
    %0 = vector.load %arg3[%c0, %c0_0] : memref<8x128xbf16, #tpu.memory_space<vmem>>, vector<8x128xbf16>
    %c0_1 = arith.constant 0 : index
    %c0_2 = arith.constant 0 : index
    %1 = vector.load %arg4[%c0_1, %c0_2] : memref<128x512xbf16, #tpu.memory_space<vmem>>, vector<128x512xbf16>
    %cst = arith.constant dense<0.000000e+00> : vector<8x512xf32>
    %2 = tpu.matmul %0, %1, %cst {dimension_numbers = #tpu.dot_dimension_numbers<[1], [0], [0], [1], [0, 0, 1, 1], [], []>} : vector<8x128xbf16>, vector<128x512xbf16>, vector<8x512xf32> -> vector<8x512xf32>
    %c0_i32 = arith.constant 0 : i32
    %3 = arith.cmpi eq, %arg2, %c0_i32 : i32
    %4 = arith.extui %3 : i1 to i32
    %c0_i32_3 = arith.constant 0 : i32
    %5 = arith.cmpi ne, %4, %c0_i32_3 : i32
    scf.if %5 {
      %c0_8 = arith.constant 0 : index
      %c0_9 = arith.constant 0 : index
      %12 = vector.load %arg8[%c0_8, %c0_9] : memref<8x512xf32, #tpu.memory_space<vmem>>, vector<8x512xf32>
      tpu.vector_store %arg8[%c0_8, %c0_9], %2 {strides = array<i32>} : memref<8x512xf32, #tpu.memory_space<vmem>>, vector<8x512xf32>,
    } else {
    }
    %c0_i32_4 = arith.constant 0 : i32
    %6 = arith.cmpi ne, %arg2, %c0_i32_4 : i32
    %7 = arith.extui %6 : i1 to i32
    %c0_i32_5 = arith.constant 0 : i32
    %8 = arith.cmpi ne, %7, %c0_i32_5 : i32
    scf.if %8 {
      %c0_8 = arith.constant 0 : index
      %c0_9 = arith.constant 0 : index
      %12 = vector.load %arg8[%c0_8, %c0_9] : memref<8x512xf32, #tpu.memory_space<vmem>>, vector<8x512xf32>
      %13 = arith.addf %12, %2 : vector<8x512xf32>
      %c0_10 = arith.constant 0 : index
      %c0_11 = arith.constant 0 : index
      %14 = vector.load %arg8[%c0_10, %c0_11] : memref<8x512xf32, #tpu.memory_space<vmem>>, vector<8x512xf32>
      tpu.vector_store %arg8[%c0_10, %c0_11], %13 {strides = array<i32>} : memref<8x512xf32, #tpu.memory_space<vmem>>, vector<8x512xf32>,
    } else {
    }
    %c0_i32_6 = arith.constant 0 : i32
    %9 = arith.cmpi eq, %arg2, %c0_i32_6 : i32
    %10 = arith.extui %9 : i1 to i32
    %c0_i32_7 = arith.constant 0 : i32
    %11 = arith.cmpi ne, %10, %c0_i32_7 : i32
    scf.if %11 {
      %c0_8 = arith.constant 0 : index
      %c0_9 = arith.constant 0 : index
      %12 = vector.load %arg8[%c0_8, %c0_9] : memref<8x512xf32, #tpu.memory_space<vmem>>, vector<8x512xf32>
      %c0_10 = arith.constant 0 : index
      %c0_11 = arith.constant 0 : index
      %13 = vector.load %arg5[%c0_10, %c0_11] : memref<1x512xf32, #tpu.memory_space<vmem>>, vector<1x512xf32>
      %14 = vector.broadcast %13 : vector<1x512xf32> to vector<8x512xf32>
      %15 = arith.addf %12, %14 : vector<8x512xf32>
      %c0_12 = arith.constant 0 : index
      %c0_13 = arith.constant 0 : index
      %16 = vector.load %arg6[%c0_12, %c0_13] : memref<8x512xbf16, #tpu.memory_space<vmem>>, vector<8x512xbf16>
      %17 = arith.extf %16 : vector<8x512xbf16> to vector<8x512xf32>
      %18 = arith.addf %15, %17 : vector<8x512xf32>
      %cst_14 = arith.constant 0.000000e+00 : f32
      %19 = vector.broadcast %cst_14 : f32 to vector<8x512xf32>
      %20 = arith.maximumf %18, %19 : vector<8x512xf32>
      %21 = arith.truncf %20 : vector<8x512xf32> to vector<8x512xbf16>
      %c0_15 = arith.constant 0 : index
      %c0_16 = arith.constant 0 : index
      %22 = vector.load %arg7[%c0_15, %c0_16] : memref<8x512xbf16, #tpu.memory_space<vmem>>, vector<8x512xbf16>
      tpu.vector_store %arg7[%c0_15, %c0_16], %21 {strides = array<i32>} : memref<8x512xbf16, #tpu.memory_space<vmem>>, vector<8x512xbf16>,
    } else {
    }
    return
  }
  func.func @transform_0(%arg0: i32, %arg1: i32, %arg2: i32) -> (i32, i32) {
    %c0_i32 = arith.constant 0 : i32
    return %arg0, %arg2 : i32, i32
  }
  func.func @transform_1(%arg0: i32, %arg1: i32, %arg2: i32) -> (i32, i32) {
    %c0_i32 = arith.constant 0 : i32
    return %arg2, %arg1 : i32, i32
  }
  func.func @transform_2(%arg0: i32, %arg1: i32, %arg2: i32) -> (i32, i32) {
    %c0_i32 = arith.constant 0 : i32
    %c0_i32_0 = arith.constant 0 : i32
    return %c0_i32, %arg1 : i32, i32
  }
  func.func @transform_3(%arg0: i32, %arg1: i32, %arg2: i32) -> (i32, i32) {
    %c0_i32 = arith.constant 0 : i32
    return %arg0, %arg1 : i32, i32
  }
  func.func @transform_4(%arg0: i32, %arg1: i32, %arg2: i32) -> (i32, i32) {
    %c0_i32 = arith.constant 0 : i32
    return %arg0, %arg1 : i32, i32
  }
}

module attributes {stable_mosaic.version = 11 : i64} {
  func.func @_avgpool_kernel(%arg0: memref<2x1x512xbf16, #tpu.memory_space<vmem>>, %arg1: memref<2x512xf32, #tpu.memory_space<vmem>>) attributes {dimension_semantics = [], scalar_prefetch = 0 : i64, scratch_operands = 0 : i64, tpu.core_type = #tpu.core_type<tc>} {
    %c0 = arith.constant 0 : index
    %c0_0 = arith.constant 0 : index
    %c0_1 = arith.constant 0 : index
    %0 = vector.load %arg0[%c0, %c0_0, %c0_1] : memref<2x1x512xbf16, #tpu.memory_space<vmem>>, vector<2x1x512xbf16>
    %1 = arith.extf %0 : vector<2x1x512xbf16> to vector<2x1x512xf32>
    %cst = arith.constant dense<0.000000e+00> : vector<2x512xf32>
    %2 = vector.multi_reduction <add>, %1, %cst [1] : vector<2x1x512xf32> to vector<2x512xf32>
    %cst_2 = arith.constant 1.000000e+00 : f32
    %3 = vector.broadcast %cst_2 : f32 to vector<2x512xf32>
    %4 = arith.divf %2, %3 : vector<2x512xf32>
    %c0_3 = arith.constant 0 : index
    %c0_4 = arith.constant 0 : index
    %5 = vector.load %arg1[%c0_3, %c0_4] : memref<2x512xf32, #tpu.memory_space<vmem>>, vector<2x512xf32>
    tpu.vector_store %arg1[%c0_3, %c0_4], %4 {strides = array<i32>} : memref<2x512xf32, #tpu.memory_space<vmem>>, vector<2x512xf32>,
    return
  }
}

</mosaic_0001>

<bundles_post_ra>
// kernel: encoder_forward.55
= control target key start
LH: loop header
LB: loop body
LE: loop exit
PB: predicated region body
PF: predicated region fallthrough
CT: control target
= control target key end

     0   :  { %s725_s1 = inlined_call_operand.vmem [shape: bf16[128,128], index: 1, kind: input, shape index: {}]   ;;  %s726_s0 = inlined_call_operand.vmem [shape: bf16[128,128], index: 0, kind: input, shape index: {}]   ;;  %s727_s2 = inlined_call_operand.vmem [shape: f32[1,128], index: 2, kind: input, shape index: {}]   ;;  %s728_s3 = inlined_call_operand.vmem [shape: bf16[128,128], index: 3, kind: output, shape index: {}]  }
   0x1   :  { %v614_v0 = vld [vmem:[%s725_s1 + $0x38] sm:$0xff]   ;;  %v615_v1 = vld [vmem:[%s725_s1 + $0x30] sm:$0xff]   ;;  %v616_v2 = vld [vmem:[%s725_s1 + $0x28] sm:$0xff]  }
   0x2   :  { %566 = vmatprep.subr.bf16.mxu0 %v614_v0  ;;  %598 = vmatprep.subr.bf16.mxu1 %v614_v0  ;;  %v617_v3 = vld [vmem:[%s725_s1 + $0x20] sm:$0xff]   ;;  %v618_v6 = vld [vmem:[%s725_s1 + $0x18] sm:$0xff]   ;;  %v619_v7 = vld [vmem:[%s725_s1 + $0x10] sm:$0xff]  }
   0x3   :  { %567 = vmatpush3.bf16.msra.mxu0 %v614_v0  ;;  %606 = vmatpush3.bf16.msra.mxu1 %v614_v0  ;;  %v622_v4 = vld [vmem:[%s726_s0] sm:$0xff]   ;;  %v620_v8 = vld [vmem:[%s725_s1 + $0x8] sm:$0xff]   ;;  %v626_v12 = vld [vmem:[%s726_s0 + $0x10] sm:$0xff]  }
   0x4   :  { %568 = vmatprep.subr.bf16.mxu0 %v615_v1  ;;  %599 = vmatprep.subr.bf16.mxu1 %v615_v1  ;;  %v623_v5 = vld [vmem:[%s726_s0 + $0x20] sm:$0xff]   ;;  %v624_v10 = vld [vmem:[%s726_s0 + $0x8] sm:$0xff]   ;;  %v627_v13 = vld [vmem:[%s726_s0 + $0x30] sm:$0xff]  }
   0x5   :  { %582 = vmatprep.mubr.bf16.mxu0 %v622_v4  ;;  %590 = vmatprep.mubr.bf16.mxu1 %v623_v5  ;;  %v621_v9 = vld [vmem:[%s725_s1] sm:$0xff]   ;;  %v625_v11 = vld [vmem:[%s726_s0 + $0x28] sm:$0xff]   ;;  %v628_v14 = vld [vmem:[%s726_s0 + $0x18] sm:$0xff]  }
   0x6   :  { %v629_v15 = vld [vmem:[%s726_s0 + $0x38] sm:$0xff]   ;;  %v470_v16 = vld [vmem:[%s727_s2] ss:$0 sm:$0xff] }
   0x7   :  { %569 = vmatpush3.bf16.msra.mxu0 %v615_v1  ;;  %607 = vmatpush3.bf16.msra.mxu1 %v615_v1 }
   0x8   :  { %570 = vmatprep.subr.bf16.mxu0 %v616_v2  ;;  %600 = vmatprep.subr.bf16.mxu1 %v616_v2 }
   0xb   :  { %571 = vmatpush3.bf16.msra.mxu0 %v616_v2  ;;  %608 = vmatpush3.bf16.msra.mxu1 %v616_v2 }
   0xc   :  { %572 = vmatprep.subr.bf16.mxu0 %v617_v3  ;;  %601 = vmatprep.subr.bf16.mxu1 %v617_v3 }
   0xf   :  { %573 = vmatpush3.bf16.msra.mxu0 %v617_v3  ;;  %609 = vmatpush3.bf16.msra.mxu1 %v617_v3 }
  0x10   :  { %574 = vmatprep.subr.bf16.mxu0 %v618_v6  ;;  %602 = vmatprep.subr.bf16.mxu1 %v618_v6 }
  0x13   :  { %575 = vmatpush3.bf16.msra.mxu0 %v618_v6  ;;  %610 = vmatpush3.bf16.msra.mxu1 %v618_v6 }
  0x14   :  { %576 = vmatprep.subr.bf16.mxu0 %v619_v7  ;;  %603 = vmatprep.subr.bf16.mxu1 %v619_v7 }
  0x17   :  { %577 = vmatpush3.bf16.msra.mxu0 %v619_v7  ;;  %611 = vmatpush3.bf16.msra.mxu1 %v619_v7 }
  0x18   :  { %578 = vmatprep.subr.bf16.mxu0 %v620_v8  ;;  %604 = vmatprep.subr.bf16.mxu1 %v620_v8 }
  0x1b   :  { %579 = vmatpush3.bf16.msra.mxu0 %v620_v8  ;;  %612 = vmatpush3.bf16.msra.mxu1 %v620_v8 }
  0x1c   :  { %580 = vmatprep.subr.bf16.mxu0 %v621_v9  ;;  %605 = vmatprep.subr.bf16.mxu1 %v621_v9 }
  0x1f   :  { %581 = vmatpush3.bf16.msra.mxu0 %v621_v9  ;;  %613 = vmatpush3.bf16.msra.mxu1 %v621_v9 }
  0x22   :  { %583 = vmatmul.mubr.bf16.vlgmr.msra.gmra.mxu0 %v624_v10  ;;  %591 = vmatmul.mubr.bf16.vlgmr.msra.gmra.mxu1 %v625_v11 }
  0x23   :  { %586 = vmatprep.mubr.bf16.mxu0 %v626_v12  ;;  %594 = vmatprep.mubr.bf16.mxu1 %v627_v13 }
  0x2a   :  { %587 = vmatmul.mubr.bf16.gmra.mxu0 %v628_v14  ;;  %595 = vmatmul.mubr.bf16.gmra.mxu1 %v629_v15 }
  0xe2   :  { %v584_v17 = vpop.f32.mrf.mxu0  ;;  %v592_v18 = vpop.f32.mrf.mxu1 }
  0xe3   :  { %v340_v19 = vadd.f32 %v584_v17, %v470_v16  ;;  %v348_v20 = vadd.f32 %v592_v18, %v470_v16 }
  0xe4   :  { %v177_v21 = vpop.f32.mrf.mxu0  ;;  %v209_v22 = vpop.f32.mrf.mxu1 }
  0xe5   :  { %v338_v23 = vadd.f32 %v470_v16, %v177_v21  ;;  %v346_v24 = vadd.f32 %v470_v16, %v209_v22  ;;  %v356_v29 = vmax.f32 %v340_v19, 0.0  ;;  %v364_v30 = vmax.f32 %v348_v20, 0.0 }
  0xe6   :  { %v585_v25 = vpop.f32.mrf.mxu0  ;;  %v593_v26 = vpop.f32.mrf.mxu1 }
  0xe7   :  { %v341_v27 = vadd.f32 %v585_v25, %v470_v16  ;;  %v349_v28 = vadd.f32 %v593_v26, %v470_v16  ;;  %v354_v37 = vmax.f32 %v338_v23, 0.0  ;;  %v362_v38 = vmax.f32 %v346_v24, 0.0 }
  0xe8   :  { %v180_v31 = vpop.f32.mrf.mxu0  ;;  %v212_v32 = vpop.f32.mrf.mxu1 }
  0xe9   :  { %v357_v33 = vmax.f32 %v341_v27, 0.0  ;;  %v365_v34 = vmax.f32 %v349_v28, 0.0  ;;  %v339_v35 = vadd.f32 %v470_v16, %v180_v31  ;;  %v347_v36 = vadd.f32 %v470_v16, %v212_v32 }
  0xea   :  { %v588_v39 = vpop.f32.mrf.mxu0  ;;  %v596_v40 = vpop.f32.mrf.mxu1 }
  0xeb   :  { %v511_v41 = vpack.c.bf16 %v357_v33, %v356_v29  ;;  %v531_v42 = vpack.c.bf16 %v365_v34, %v364_v30  ;;  %v355_v43 = vmax.f32 %v339_v35, 0.0  ;;  %v363_v44 = vmax.f32 %v347_v36, 0.0 }
  0xec   :  { %v344_v45 = vadd.f32 %v588_v39, %v470_v16  ;;  %v352_v46 = vadd.f32 %v596_v40, %v470_v16  ;;  %v193_v47 = vpop.f32.mrf.mxu0  ;;  %v225_v48 = vpop.f32.mrf.mxu1 }
  0xed   :  { %543 = vst [vmem:[%s728_s3 + $0x8] sm:$0xff] %v511_v41   ;;  %547 = vst [vmem:[%s728_s3 + $0x28] sm:$0xff] %v531_v42   ;;  %v506_v49 = vpack.c.bf16 %v355_v43, %v354_v37  ;;  %v526_v50 = vpack.c.bf16 %v363_v44, %v362_v38  ;;  %v342_v51 = vadd.f32 %v470_v16, %v193_v47 }
  0xee   :  { %v350_v52 = vadd.f32 %v470_v16, %v225_v48  ;;  %v589_v53 = vpop.f32.mrf.mxu0  ;;  %v597_v54 = vpop.f32.mrf.mxu1  ;;  %v360_v57 = vmax.f32 %v344_v45, 0.0  ;;  %v368_v58 = vmax.f32 %v352_v46, 0.0 }
  0xef   :  { %507 = vst [vmem:[%s728_s3] sm:$0xff] %v506_v49   ;;  %546 = vst [vmem:[%s728_s3 + $0x20] sm:$0xff] %v526_v50   ;;  %v345_v55 = vadd.f32 %v589_v53, %v470_v16  ;;  %v353_v56 = vadd.f32 %v597_v54, %v470_v16  ;;  %v358_v1 = vmax.f32 %v342_v51, 0.0 }
  0xf0   :  { %v196_v59 = vpop.f32.mrf.mxu0  ;;  %v228_v60 = vpop.f32.mrf.mxu1  ;;  %v366_v2 = vmax.f32 %v350_v52, 0.0 }
  0xf1   :  { %v361_v61 = vmax.f32 %v345_v55, 0.0  ;;  %v369_v62 = vmax.f32 %v353_v56, 0.0  ;;  %v343_v63 = vadd.f32 %v470_v16, %v196_v59  ;;  %v351_v0 = vadd.f32 %v470_v16, %v228_v60 }
  0xf3   :  { %v521_v3 = vpack.c.bf16 %v361_v61, %v360_v57  ;;  %v541_v4 = vpack.c.bf16 %v369_v62, %v368_v58  ;;  %v359_v5 = vmax.f32 %v343_v63, 0.0  ;;  %v367_v6 = vmax.f32 %v351_v0, 0.0 }
  0xf5   :  { %545 = vst [vmem:[%s728_s3 + $0x18] sm:$0xff] %v521_v3   ;;  %549 = vst [vmem:[%s728_s3 + $0x38] sm:$0xff] %v541_v4   ;;  %v516_v7 = vpack.c.bf16 %v359_v5, %v358_v1  ;;  %v536_v8 = vpack.c.bf16 %v367_v6, %v366_v2 }
  0xf7   :  { %544 = vst [vmem:[%s728_s3 + $0x10] sm:$0xff] %v516_v7   ;;  %548 = vst [vmem:[%s728_s3 + $0x30] sm:$0xff] %v536_v8  }

// kernel: encoder_forward.54
= control target key start
LH: loop header
LB: loop body
LE: loop exit
PB: predicated region body
PF: predicated region fallthrough
CT: control target
= control target key end

     0   :  { %v2151_v0 = vmov 0   ;;  %s2609_s1 = inlined_call_operand.vmem [shape: bf16[256,128], index: 1, kind: input, shape index: {}]   ;;  %s2610_s0 = inlined_call_operand.vmem [shape: bf16[512,256], index: 0, kind: input, shape index: {}]   ;;  %s2611_s2 = inlined_call_operand.vmem [shape: f32[1,128], index: 2, kind: input, shape index: {}]   ;;  %s2612_s3 = inlined_call_operand.vmem [shape: bf16[512,128], index: 3, kind: output, shape index: {}]  }
   0x1   :  { %527 = vmatprep.subr.bf16.mxu0 %v2151_v0  ;;  %2006 = vmatprep.subr.bf16.mxu1 %v2151_v0  ;;  %v2039_v1 = vld [vmem:[%s2609_s1 + $0x38] sm:$0xff]   ;;  %v2040_v2 = vld [vmem:[%s2609_s1 + $0x30] sm:$0xff]   ;;  %v2041_v3 = vld [vmem:[%s2609_s1 + $0x28] sm:$0xff]  }
   0x2   :  { %528 = vmatpush1.bf16.msra.mxu0 %v2039_v1  ;;  %2022 = vmatpush1.bf16.msra.mxu1 %v2039_v1  ;;  %v2042_v4 = vld [vmem:[%s2609_s1 + $0x20] sm:$0xff]   ;;  %v2043_v5 = vld [vmem:[%s2609_s1 + $0x18] sm:$0xff]   ;;  %v2044_v7 = vld [vmem:[%s2609_s1 + $0x10] sm:$0xff]  }
   0x3   :  { %529 = vmatprep.subr.bf16.mxu0 %v2151_v0  ;;  %2007 = vmatprep.subr.bf16.mxu1 %v2151_v0  ;;  %v2057_v6 = vld [vmem:[%s2610_s0 + $0x4] ss:$8 sps:$4 sm:$0xff]   ;;  %v2047_v11 = vld [vmem:[%s2609_s1 + $0x78] sm:$0xff]   ;;  %v2048_v12 = vld [vmem:[%s2609_s1 + $0x70] sm:$0xff]  }
   0x4   :  { %v2060_v8 = vld [vmem:[%s2610_s0 + $0x104] ss:$8 sps:$4 sm:$0xff]   ;;  %559 = vmatprep.mubr.bf16.mxu0 %v2057_v6  ;;  %v2051_v15 = vld [vmem:[%s2609_s1 + $0x58] sm:$0xff]   ;;  %v2052_v16 = vld [vmem:[%s2609_s1 + $0x50] sm:$0xff]  }
   0x5   :  { %687 = vmatprep.mubr.bf16.mxu1 %v2060_v8  ;;  %v2045_v9 = vld [vmem:[%s2609_s1 + $0x8] sm:$0xff]   ;;  %v2046_v10 = vld [vmem:[%s2609_s1] sm:$0xff]   ;;  %v2061_v21 = vld [vmem:[%s2610_s0 + $0x14] ss:$8 sps:$4 sm:$0xff]  }
   0x6   :  { %530 = vmatpush1.bf16.msra.mxu0 %v2040_v2  ;;  %2023 = vmatpush1.bf16.msra.mxu1 %v2040_v2  ;;  %v2049_v13 = vld [vmem:[%s2609_s1 + $0x68] sm:$0xff]   ;;  %v2050_v14 = vld [vmem:[%s2609_s1 + $0x60] sm:$0xff]   ;;  %v2063_v22 = vld [vmem:[%s2610_s0 + $0x114] ss:$8 sps:$4 sm:$0xff]  }
   0x7   :  { %531 = vmatprep.subr.bf16.mxu0 %v2151_v0  ;;  %2008 = vmatprep.subr.bf16.mxu1 %v2151_v0  ;;  %v2053_v17 = vld [vmem:[%s2609_s1 + $0x48] sm:$0xff]   ;;  %v2054_v18 = vld [vmem:[%s2609_s1 + $0x40] sm:$0xff]   ;;  %v2065_v23 = vld [vmem:[%s2610_s0 + $0x10] ss:$8 sps:$4 sm:$0xff]  }
   0x8   :  { %v2055_v19 = vld [vmem:[%s2610_s0] ss:$8 sps:$4 sm:$0xff]   ;;  %v2066_v24 = vld [vmem:[%s2610_s0 + $0x110] ss:$8 sps:$4 sm:$0xff]   ;;  %v2067_v25 = vld [vmem:[%s2610_s0 + $0x24] ss:$8 sps:$4 sm:$0xff]  }
   0x9   :  { %v2058_v20 = vld [vmem:[%s2610_s0 + $0x100] ss:$8 sps:$4 sm:$0xff]   ;;  %v2069_v26 = vld [vmem:[%s2610_s0 + $0x124] ss:$8 sps:$4 sm:$0xff]   ;;  %v2073_v29 = vld [vmem:[%s2610_s0 + $0x34] ss:$8 sps:$4 sm:$0xff]  }
   0xa   :  { %532 = vmatpush1.bf16.msra.mxu0 %v2041_v3  ;;  %2024 = vmatpush1.bf16.msra.mxu1 %v2041_v3  ;;  %v2071_v27 = vld [vmem:[%s2610_s0 + $0x20] ss:$8 sps:$4 sm:$0xff]   ;;  %v2075_v30 = vld [vmem:[%s2610_s0 + $0x134] ss:$8 sps:$4 sm:$0xff]   ;;  %v2077_v31 = vld [vmem:[%s2610_s0 + $0x30] ss:$8 sps:$4 sm:$0xff]  }
   0xb   :  { %533 = vmatprep.subr.bf16.mxu0 %v2151_v0  ;;  %2009 = vmatprep.subr.bf16.mxu1 %v2151_v0  ;;  %v2072_v28 = vld [vmem:[%s2610_s0 + $0x120] ss:$8 sps:$4 sm:$0xff]   ;;  %v2078_v32 = vld [vmem:[%s2610_s0 + $0x130] ss:$8 sps:$4 sm:$0xff]   ;;  %v2079_v33 = vld [vmem:[%s2610_s0 + $0x44] ss:$8 sps:$4 sm:$0xff]  }
   0xc   :  { %v2081_v34 = vld [vmem:[%s2610_s0 + $0x144] ss:$8 sps:$4 sm:$0xff]   ;;  %v2083_v35 = vld [vmem:[%s2610_s0 + $0x40] ss:$8 sps:$4 sm:$0xff]   ;;  %v2085_v37 = vld [vmem:[%s2610_s0 + $0x54] ss:$8 sps:$4 sm:$0xff]  }
   0xd   :  { %v2084_v36 = vld [vmem:[%s2610_s0 + $0x140] ss:$8 sps:$4 sm:$0xff]   ;;  %v2087_v38 = vld [vmem:[%s2610_s0 + $0x154] ss:$8 sps:$4 sm:$0xff]   ;;  %v2089_v39 = vld [vmem:[%s2610_s0 + $0x50] ss:$8 sps:$4 sm:$0xff]  }
   0xe   :  { %534 = vmatpush1.bf16.msra.mxu0 %v2042_v4  ;;  %2025 = vmatpush1.bf16.msra.mxu1 %v2042_v4  ;;  %v2090_v40 = vld [vmem:[%s2610_s0 + $0x150] ss:$8 sps:$4 sm:$0xff]   ;;  %v2091_v41 = vld [vmem:[%s2610_s0 + $0x64] ss:$8 sps:$4 sm:$0xff]   ;;  %v2095_v43 = vld [vmem:[%s2610_s0 + $0x60] ss:$8 sps:$4 sm:$0xff]  }
   0xf   :  { %535 = vmatprep.subr.bf16.mxu0 %v2151_v0  ;;  %2010 = vmatprep.subr.bf16.mxu1 %v2151_v0  ;;  %v2093_v42 = vld [vmem:[%s2610_s0 + $0x164] ss:$8 sps:$4 sm:$0xff]   ;;  %v2096_v44 = vld [vmem:[%s2610_s0 + $0x160] ss:$8 sps:$4 sm:$0xff]   ;;  %v2097_v45 = vld [vmem:[%s2610_s0 + $0x74] ss:$8 sps:$4 sm:$0xff]  }
  0x10   :  { %v2099_v46 = vld [vmem:[%s2610_s0 + $0x174] ss:$8 sps:$4 sm:$0xff]   ;;  %v2101_v47 = vld [vmem:[%s2610_s0 + $0x70] ss:$8 sps:$4 sm:$0xff]   ;;  %v2103_v49 = vld [vmem:[%s2610_s0 + $0x84] ss:$8 sps:$4 sm:$0xff]  }
  0x11   :  { %v2102_v48 = vld [vmem:[%s2610_s0 + $0x170] ss:$8 sps:$4 sm:$0xff]   ;;  %v2105_v50 = vld [vmem:[%s2610_s0 + $0x184] ss:$8 sps:$4 sm:$0xff]   ;;  %v2107_v51 = vld [vmem:[%s2610_s0 + $0x80] ss:$8 sps:$4 sm:$0xff]  }
  0x12   :  { %536 = vmatpush1.bf16.msra.mxu0 %v2043_v5  ;;  %2026 = vmatpush1.bf16.msra.mxu1 %v2043_v5  ;;  %v2108_v52 = vld [vmem:[%s2610_s0 + $0x180] ss:$8 sps:$4 sm:$0xff]   ;;  %v2109_v53 = vld [vmem:[%s2610_s0 + $0x94] ss:$8 sps:$4 sm:$0xff]   ;;  %v2113_v55 = vld [vmem:[%s2610_s0 + $0x90] ss:$8 sps:$4 sm:$0xff]  }
  0x13   :  { %537 = vmatprep.subr.bf16.mxu0 %v2151_v0  ;;  %2011 = vmatprep.subr.bf16.mxu1 %v2151_v0  ;;  %v2111_v54 = vld [vmem:[%s2610_s0 + $0x194] ss:$8 sps:$4 sm:$0xff]   ;;  %v2114_v56 = vld [vmem:[%s2610_s0 + $0x190] ss:$8 sps:$4 sm:$0xff]   ;;  %v2115_v57 = vld [vmem:[%s2610_s0 + $0xa4] ss:$8 sps:$4 sm:$0xff]  }
  0x14   :  { %v2117_v58 = vld [vmem:[%s2610_s0 + $0x1a4] ss:$8 sps:$4 sm:$0xff]   ;;  %v2119_v59 = vld [vmem:[%s2610_s0 + $0xa0] ss:$8 sps:$4 sm:$0xff]   ;;  %v2121_v61 = vld [vmem:[%s2610_s0 + $0xb4] ss:$8 sps:$4 sm:$0xff]  }
  0x15   :  { %v2120_v60 = vld [vmem:[%s2610_s0 + $0x1a0] ss:$8 sps:$4 sm:$0xff]   ;;  %v2123_v62 = vld [vmem:[%s2610_s0 + $0x1b4] ss:$8 sps:$4 sm:$0xff]   ;;  %v2125_v63 = vld [vmem:[%s2610_s0 + $0xb0] ss:$8 sps:$4 sm:$0xff]  }
  0x16   :  { %538 = vmatpush1.bf16.msra.mxu0 %v2044_v7  ;;  %2027 = vmatpush1.bf16.msra.mxu1 %v2044_v7  ;;  %v2127_v1 = vld [vmem:[%s2610_s0 + $0xc4] ss:$8 sps:$4 sm:$0xff]   ;;  %v2131_v3 = vld [vmem:[%s2610_s0 + $0xc0] ss:$8 sps:$4 sm:$0xff]   ;;  %v2133_v5 = vld [vmem:[%s2610_s0 + $0xd4] ss:$8 sps:$4 sm:$0xff]  }
  0x17   :  { %539 = vmatprep.subr.bf16.mxu0 %v2151_v0  ;;  %2012 = vmatprep.subr.bf16.mxu1 %v2151_v0  ;;  %v2129_v2 = vld [vmem:[%s2610_s0 + $0x1c4] ss:$8 sps:$4 sm:$0xff]   ;;  %v2132_v4 = vld [vmem:[%s2610_s0 + $0x1c0] ss:$8 sps:$4 sm:$0xff]   ;;  %v2135_v6 = vld [vmem:[%s2610_s0 + $0x1d4] ss:$8 sps:$4 sm:$0xff]  }
  0x18   :  { %v2137_v7 = vld [vmem:[%s2610_s0 + $0xd0] ss:$8 sps:$4 sm:$0xff]  }
  0x19   :  { %v2138_v8 = vld [vmem:[%s2610_s0 + $0x1d0] ss:$8 sps:$4 sm:$0xff]  }
  0x1a   :  { %540 = vmatpush1.bf16.msra.mxu0 %v2045_v9  ;;  %2028 = vmatpush1.bf16.msra.mxu1 %v2045_v9  ;;  %v2139_v9 = vld [vmem:[%s2610_s0 + $0xe4] ss:$8 sps:$4 sm:$0xff]  }
  0x1b   :  { %541 = vmatprep.subr.bf16.mxu0 %v2151_v0  ;;  %2013 = vmatprep.subr.bf16.mxu1 %v2151_v0 }
  0x1e   :  { %542 = vmatpush1.bf16.msra.mxu0 %v2046_v10  ;;  %2029 = vmatpush1.bf16.msra.mxu1 %v2046_v10  ;;  %v2141_v10 = vld [vmem:[%s2610_s0 + $0x1e4] ss:$8 sps:$4 sm:$0xff]  }
  0x1f   :  { %543 = vmatprep.subr.bf16.mxu0 %v2151_v0  ;;  %2014 = vmatprep.subr.bf16.mxu1 %v2151_v0 }
  0x22   :  { %544 = vmatpush2.bf16.msra.mxu0 %v2047_v11  ;;  %2030 = vmatpush2.bf16.msra.mxu1 %v2047_v11  ;;  %v2143_v11 = vld [vmem:[%s2610_s0 + $0xe0] ss:$8 sps:$4 sm:$0xff]  }
  0x23   :  { %545 = vmatprep.subr.bf16.mxu0 %v2151_v0  ;;  %2015 = vmatprep.subr.bf16.mxu1 %v2151_v0 }
  0x26   :  { %546 = vmatpush2.bf16.msra.mxu0 %v2048_v12  ;;  %2031 = vmatpush2.bf16.msra.mxu1 %v2048_v12  ;;  %v2144_v12 = vld [vmem:[%s2610_s0 + $0x1e0] ss:$8 sps:$4 sm:$0xff]  }
  0x27   :  { %547 = vmatprep.subr.bf16.mxu0 %v2151_v0  ;;  %2016 = vmatprep.subr.bf16.mxu1 %v2151_v0 }
  0x2a   :  { %548 = vmatpush2.bf16.msra.mxu0 %v2049_v13  ;;  %2032 = vmatpush2.bf16.msra.mxu1 %v2049_v13  ;;  %v2145_v13 = vld [vmem:[%s2610_s0 + $0xf4] ss:$8 sps:$4 sm:$0xff]  }
  0x2b   :  { %549 = vmatprep.subr.bf16.mxu0 %v2151_v0  ;;  %2017 = vmatprep.subr.bf16.mxu1 %v2151_v0 }
  0x2e   :  { %550 = vmatpush2.bf16.msra.mxu0 %v2050_v14  ;;  %2033 = vmatpush2.bf16.msra.mxu1 %v2050_v14  ;;  %v2147_v14 = vld [vmem:[%s2610_s0 + $0x1f4] ss:$8 sps:$4 sm:$0xff]  }
  0x2f   :  { %551 = vmatprep.subr.bf16.mxu0 %v2151_v0  ;;  %2018 = vmatprep.subr.bf16.mxu1 %v2151_v0 }
  0x32   :  { %552 = vmatpush2.bf16.msra.mxu0 %v2051_v15  ;;  %2034 = vmatpush2.bf16.msra.mxu1 %v2051_v15  ;;  %v2149_v15 = vld [vmem:[%s2610_s0 + $0xf0] ss:$8 sps:$4 sm:$0xff]  }
  0x33   :  { %553 = vmatprep.subr.bf16.mxu0 %v2151_v0  ;;  %2019 = vmatprep.subr.bf16.mxu1 %v2151_v0 }
  0x36   :  { %554 = vmatpush2.bf16.msra.mxu0 %v2052_v16  ;;  %2035 = vmatpush2.bf16.msra.mxu1 %v2052_v16  ;;  %v2150_v16 = vld [vmem:[%s2610_s0 + $0x1f0] ss:$8 sps:$4 sm:$0xff]  }
  0x37   :  { %555 = vmatprep.subr.bf16.mxu0 %v2151_v0  ;;  %2020 = vmatprep.subr.bf16.mxu1 %v2151_v0 }
  0x3a   :  { %556 = vmatpush2.bf16.msra.mxu0 %v2053_v17  ;;  %2036 = vmatpush2.bf16.msra.mxu1 %v2053_v17 }
  0x3b   :  { %557 = vmatprep.subr.bf16.mxu0 %v2151_v0  ;;  %2021 = vmatprep.subr.bf16.mxu1 %v2151_v0  ;;  %v2126_v0 = vld [vmem:[%s2610_s0 + $0x1b0] ss:$8 sps:$4 sm:$0xff]  }
  0x3e   :  { %558 = vmatpush2.bf16.msra.mxu0 %v2054_v18  ;;  %2037 = vmatpush2.bf16.msra.mxu1 %v2054_v18  ;;  %v2447_v18 = vld [vmem:[%s2611_s2] ss:$0 sm:$0xff] }
  0x41   :  { %560 = vmatmul.mubr.bf16.vlgmr.msra.gmra.mxu0 %v2055_v19  ;;  %688 = vmatmul.mubr.bf16.vlgmr.msra.gmra.mxu1 %v2058_v20 }
  0x42   :  { %567 = vmatprep.mubr.bf16.mxu0 %v2061_v21  ;;  %695 = vmatprep.mubr.bf16.mxu1 %v2063_v22 }
  0x49   :  { %568 = vmatmul.mubr.bf16.gmra.mxu0 %v2065_v23  ;;  %696 = vmatmul.mubr.bf16.gmra.mxu1 %v2066_v24 }
  0x4a   :  { %575 = vmatprep.mubr.bf16.mxu0 %v2067_v25  ;;  %703 = vmatprep.mubr.bf16.mxu1 %v2069_v26 }
  0x51   :  { %576 = vmatmul.mubr.bf16.gmra.mxu0 %v2071_v27  ;;  %704 = vmatmul.mubr.bf16.gmra.mxu1 %v2072_v28 }
  0x52   :  { %583 = vmatprep.mubr.bf16.mxu0 %v2073_v29  ;;  %711 = vmatprep.mubr.bf16.mxu1 %v2075_v30 }
  0x59   :  { %584 = vmatmul.mubr.bf16.gmra.mxu0 %v2077_v31  ;;  %712 = vmatmul.mubr.bf16.gmra.mxu1 %v2078_v32 }
  0x5a   :  { %591 = vmatprep.mubr.bf16.mxu0 %v2079_v33  ;;  %719 = vmatprep.mubr.bf16.mxu1 %v2081_v34 }
  0x61   :  { %592 = vmatmul.mubr.bf16.gmra.mxu0 %v2083_v35  ;;  %720 = vmatmul.mubr.bf16.gmra.mxu1 %v2084_v36 }
  0x62   :  { %599 = vmatprep.mubr.bf16.mxu0 %v2085_v37  ;;  %727 = vmatprep.mubr.bf16.mxu1 %v2087_v38 }
  0x69   :  { %600 = vmatmul.mubr.bf16.gmra.mxu0 %v2089_v39  ;;  %728 = vmatmul.mubr.bf16.gmra.mxu1 %v2090_v40 }
  0x6a   :  { %607 = vmatprep.mubr.bf16.mxu0 %v2091_v41  ;;  %735 = vmatprep.mubr.bf16.mxu1 %v2093_v42 }
  0x71   :  { %608 = vmatmul.mubr.bf16.gmra.mxu0 %v2095_v43  ;;  %736 = vmatmul.mubr.bf16.gmra.mxu1 %v2096_v44 }
  0x72   :  { %615 = vmatprep.mubr.bf16.mxu0 %v2097_v45  ;;  %743 = vmatprep.mubr.bf16.mxu1 %v2099_v46 }
  0x79   :  { %616 = vmatmul.mubr.bf16.gmra.mxu0 %v2101_v47  ;;  %744 = vmatmul.mubr.bf16.gmra.mxu1 %v2102_v48 }
  0x7a   :  { %623 = vmatprep.mubr.bf16.mxu0 %v2103_v49  ;;  %751 = vmatprep.mubr.bf16.mxu1 %v2105_v50 }
  0x81   :  { %624 = vmatmul.mubr.bf16.gmra.mxu0 %v2107_v51  ;;  %752 = vmatmul.mubr.bf16.gmra.mxu1 %v2108_v52 }
  0x82   :  { %631 = vmatprep.mubr.bf16.mxu0 %v2109_v53  ;;  %759 = vmatprep.mubr.bf16.mxu1 %v2111_v54 }
  0x89   :  { %632 = vmatmul.mubr.bf16.gmra.mxu0 %v2113_v55  ;;  %760 = vmatmul.mubr.bf16.gmra.mxu1 %v2114_v56 }
  0x8a   :  { %639 = vmatprep.mubr.bf16.mxu0 %v2115_v57  ;;  %767 = vmatprep.mubr.bf16.mxu1 %v2117_v58 }
  0x91   :  { %640 = vmatmul.mubr.bf16.gmra.mxu0 %v2119_v59  ;;  %768 = vmatmul.mubr.bf16.gmra.mxu1 %v2120_v60 }
  0x92   :  { %647 = vmatprep.mubr.bf16.mxu0 %v2121_v61  ;;  %775 = vmatprep.mubr.bf16.mxu1 %v2123_v62 }
  0x99   :  { %648 = vmatmul.mubr.bf16.gmra.mxu0 %v2125_v63  ;;  %776 = vmatmul.mubr.bf16.gmra.mxu1 %v2126_v0 }
  0x9a   :  { %655 = vmatprep.mubr.bf16.mxu0 %v2127_v1  ;;  %783 = vmatprep.mubr.bf16.mxu1 %v2129_v2 }
  0xa1   :  { %656 = vmatmul.mubr.bf16.gmra.mxu0 %v2131_v3  ;;  %784 = vmatmul.mubr.bf16.gmra.mxu1 %v2132_v4 }
  0xa2   :  { %663 = vmatprep.mubr.bf16.mxu0 %v2133_v5  ;;  %791 = vmatprep.mubr.bf16.mxu1 %v2135_v6 }
  0xa9   :  { %664 = vmatmul.mubr.bf16.gmra.mxu0 %v2137_v7  ;;  %792 = vmatmul.mubr.bf16.gmra.mxu1 %v2138_v8 }
  0xaa   :  { %671 = vmatprep.mubr.bf16.mxu0 %v2139_v9  ;;  %799 = vmatprep.mubr.bf16.mxu1 %v2141_v10 }
  0xb1   :  { %672 = vmatmul.mubr.bf16.gmra.mxu0 %v2143_v11  ;;  %800 = vmatmul.mubr.bf16.gmra.mxu1 %v2144_v12 }
  0xb2   :  { %679 = vmatprep.mubr.bf16.mxu0 %v2145_v13  ;;  %807 = vmatprep.mubr.bf16.mxu1 %v2147_v14 }
  0xb9   :  { %680 = vmatmul.mubr.bf16.gmra.mxu0 %v2149_v15  ;;  %808 = vmatmul.mubr.bf16.gmra.mxu1 %v2150_v16 }
 0x101   :  { %v561_v17 = vpop.f32.mrf.mxu0  ;;  %v689_v19 = vpop.f32.mrf.mxu1 }
 0x102   :  { %v1154_v22 = vadd.f32 %v2447_v18, %v561_v17  ;;  %v1186_v23 = vadd.f32 %v2447_v18, %v689_v19 }
 0x103   :  { %v563_v20 = vpop.f32.mrf.mxu0  ;;  %v691_v21 = vpop.f32.mrf.mxu1 }
 0x104   :  { %v1218_v30 = vmax.f32 %v1154_v22, 0.0  ;;  %v1250_v31 = vmax.f32 %v1186_v23, 0.0 }
 0x105   :  { %v564_v24 = vpop.f32.mrf.mxu0  ;;  %v692_v25 = vpop.f32.mrf.mxu1 }
 0x106   :  { %v1155_v26 = vadd.f32 %v2447_v18, %v564_v24  ;;  %v1187_v27 = vadd.f32 %v2447_v18, %v692_v25 }
 0x107   :  { %v566_v28 = vpop.f32.mrf.mxu0  ;;  %v694_v29 = vpop.f32.mrf.mxu1 }
 0x108   :  { %v1219_v32 = vmax.f32 %v1155_v26, 0.0  ;;  %v1251_v33 = vmax.f32 %v1187_v27, 0.0 }
 0x109   :  { %v569_v34 = vpop.f32.mrf.mxu0  ;;  %v697_v35 = vpop.f32.mrf.mxu1 }
 0x10a   :  { %v1818_v36 = vpack.c.bf16 %v1219_v32, %v1218_v30  ;;  %v1898_v37 = vpack.c.bf16 %v1251_v33, %v1250_v31  ;;  %v1156_v40 = vadd.f32 %v2447_v18, %v569_v34  ;;  %v1188_v41 = vadd.f32 %v2447_v18, %v697_v35 }
 0x10b   :  { %v571_v38 = vpop.f32.mrf.mxu0  ;;  %v699_v39 = vpop.f32.mrf.mxu1 }
 0x10c   :  { %1819 = vst [vmem:[%s2612_s3] sm:$0xff] %v1818_v36   ;;  %1990 = vst [vmem:[%s2612_s3 + $0x80] sm:$0xff] %v1898_v37   ;;  %v1220_v48 = vmax.f32 %v1156_v40, 0.0  ;;  %v1252_v49 = vmax.f32 %v1188_v41, 0.0 }
 0x10d   :  { %v572_v42 = vpop.f32.mrf.mxu0  ;;  %v700_v43 = vpop.f32.mrf.mxu1 }
 0x10e   :  { %v1157_v44 = vadd.f32 %v2447_v18, %v572_v42  ;;  %v1189_v45 = vadd.f32 %v2447_v18, %v700_v43 }
 0x10f   :  { %v574_v46 = vpop.f32.mrf.mxu0  ;;  %v702_v47 = vpop.f32.mrf.mxu1 }
 0x110   :  { %v1221_v50 = vmax.f32 %v1157_v44, 0.0  ;;  %v1253_v51 = vmax.f32 %v1189_v45, 0.0 }
 0x111   :  { %v577_v52 = vpop.f32.mrf.mxu0  ;;  %v705_v53 = vpop.f32.mrf.mxu1 }
 0x112   :  { %v1823_v54 = vpack.c.bf16 %v1221_v50, %v1220_v48  ;;  %v1903_v55 = vpack.c.bf16 %v1253_v51, %v1252_v49  ;;  %v1158_v58 = vadd.f32 %v2447_v18, %v577_v52  ;;  %v1190_v59 = vadd.f32 %v2447_v18, %v705_v53 }
 0x113   :  { %v579_v56 = vpop.f32.mrf.mxu0  ;;  %v707_v57 = vpop.f32.mrf.mxu1 }
 0x114   :  { %1975 = vst [vmem:[%s2612_s3 + $0x8] sm:$0xff] %v1823_v54   ;;  %1991 = vst [vmem:[%s2612_s3 + $0x88] sm:$0xff] %v1903_v55   ;;  %v1222_v2 = vmax.f32 %v1158_v58, 0.0  ;;  %v1254_v3 = vmax.f32 %v1190_v59, 0.0 }
 0x115   :  { %v580_v60 = vpop.f32.mrf.mxu0  ;;  %v708_v61 = vpop.f32.mrf.mxu1 }
 0x116   :  { %v1159_v62 = vadd.f32 %v2447_v18, %v580_v60  ;;  %v1191_v63 = vadd.f32 %v2447_v18, %v708_v61 }
 0x117   :  { %v582_v0 = vpop.f32.mrf.mxu0  ;;  %v710_v1 = vpop.f32.mrf.mxu1 }
 0x118   :  { %v1223_v4 = vmax.f32 %v1159_v62, 0.0  ;;  %v1255_v5 = vmax.f32 %v1191_v63, 0.0 }
 0x119   :  { %v585_v6 = vpop.f32.mrf.mxu0  ;;  %v713_v7 = vpop.f32.mrf.mxu1 }
 0x11a   :  { %v1828_v8 = vpack.c.bf16 %v1223_v4, %v1222_v2  ;;  %v1908_v9 = vpack.c.bf16 %v1255_v5, %v1254_v3  ;;  %v1160_v12 = vadd.f32 %v2447_v18, %v585_v6  ;;  %v1192_v13 = vadd.f32 %v2447_v18, %v713_v7 }
 0x11b   :  { %v587_v10 = vpop.f32.mrf.mxu0  ;;  %v715_v11 = vpop.f32.mrf.mxu1 }
 0x11c   :  { %1976 = vst [vmem:[%s2612_s3 + $0x10] sm:$0xff] %v1828_v8   ;;  %1992 = vst [vmem:[%s2612_s3 + $0x90] sm:$0xff] %v1908_v9   ;;  %v1224_v21 = vmax.f32 %v1160_v12, 0.0  ;;  %v1256_v22 = vmax.f32 %v1192_v13, 0.0 }
 0x11d   :  { %v588_v14 = vpop.f32.mrf.mxu0  ;;  %v716_v15 = vpop.f32.mrf.mxu1 }
 0x11e   :  { %v1161_v16 = vadd.f32 %v2447_v18, %v588_v14  ;;  %v1193_v17 = vadd.f32 %v2447_v18, %v716_v15 }
 0x11f   :  { %v590_v19 = vpop.f32.mrf.mxu0  ;;  %v718_v20 = vpop.f32.mrf.mxu1 }
 0x120   :  { %v1225_v23 = vmax.f32 %v1161_v16, 0.0  ;;  %v1257_v24 = vmax.f32 %v1193_v17, 0.0 }
 0x121   :  { %v593_v25 = vpop.f32.mrf.mxu0  ;;  %v721_v26 = vpop.f32.mrf.mxu1 }
 0x122   :  { %v1833_v27 = vpack.c.bf16 %v1225_v23, %v1224_v21  ;;  %v1913_v28 = vpack.c.bf16 %v1257_v24, %v1256_v22  ;;  %v1162_v31 = vadd.f32 %v2447_v18, %v593_v25  ;;  %v1194_v32 = vadd.f32 %v2447_v18, %v721_v26 }
 0x123   :  { %v595_v29 = vpop.f32.mrf.mxu0  ;;  %v723_v30 = vpop.f32.mrf.mxu1 }
 0x124   :  { %1977 = vst [vmem:[%s2612_s3 + $0x18] sm:$0xff] %v1833_v27   ;;  %1993 = vst [vmem:[%s2612_s3 + $0x98] sm:$0xff] %v1913_v28   ;;  %v1226_v39 = vmax.f32 %v1162_v31, 0.0  ;;  %v1258_v40 = vmax.f32 %v1194_v32, 0.0 }
 0x125   :  { %v596_v33 = vpop.f32.mrf.mxu0  ;;  %v724_v34 = vpop.f32.mrf.mxu1 }
 0x126   :  { %v1163_v35 = vadd.f32 %v2447_v18, %v596_v33  ;;  %v1195_v36 = vadd.f32 %v2447_v18, %v724_v34 }
 0x127   :  { %v598_v37 = vpop.f32.mrf.mxu0  ;;  %v726_v38 = vpop.f32.mrf.mxu1 }
 0x128   :  { %v1227_v41 = vmax.f32 %v1163_v35, 0.0  ;;  %v1259_v42 = vmax.f32 %v1195_v36, 0.0 }
 0x129   :  { %v601_v43 = vpop.f32.mrf.mxu0  ;;  %v729_v44 = vpop.f32.mrf.mxu1 }
 0x12a   :  { %v1838_v45 = vpack.c.bf16 %v1227_v41, %v1226_v39  ;;  %v1918_v46 = vpack.c.bf16 %v1259_v42, %v1258_v40  ;;  %v1164_v49 = vadd.f32 %v2447_v18, %v601_v43  ;;  %v1196_v50 = vadd.f32 %v2447_v18, %v729_v44 }
 0x12b   :  { %v603_v47 = vpop.f32.mrf.mxu0  ;;  %v731_v48 = vpop.f32.mrf.mxu1 }
 0x12c   :  { %1978 = vst [vmem:[%s2612_s3 + $0x20] sm:$0xff] %v1838_v45   ;;  %1994 = vst [vmem:[%s2612_s3 + $0xa0] sm:$0xff] %v1918_v46   ;;  %v1228_v57 = vmax.f32 %v1164_v49, 0.0  ;;  %v1260_v58 = vmax.f32 %v1196_v50, 0.0 }
 0x12d   :  { %v604_v51 = vpop.f32.mrf.mxu0  ;;  %v732_v52 = vpop.f32.mrf.mxu1 }
 0x12e   :  { %v1165_v53 = vadd.f32 %v2447_v18, %v604_v51  ;;  %v1197_v54 = vadd.f32 %v2447_v18, %v732_v52 }
 0x12f   :  { %v606_v55 = vpop.f32.mrf.mxu0  ;;  %v734_v56 = vpop.f32.mrf.mxu1 }
 0x130   :  { %v1229_v59 = vmax.f32 %v1165_v53, 0.0  ;;  %v1261_v60 = vmax.f32 %v1197_v54, 0.0 }
 0x131   :  { %v609_v61 = vpop.f32.mrf.mxu0  ;;  %v737_v62 = vpop.f32.mrf.mxu1 }
 0x132   :  { %v1843_v63 = vpack.c.bf16 %v1229_v59, %v1228_v57  ;;  %v1923_v0 = vpack.c.bf16 %v1261_v60, %v1260_v58  ;;  %v1166_v3 = vadd.f32 %v2447_v18, %v609_v61  ;;  %v1198_v4 = vadd.f32 %v2447_v18, %v737_v62 }
 0x133   :  { %v611_v1 = vpop.f32.mrf.mxu0  ;;  %v739_v2 = vpop.f32.mrf.mxu1 }
 0x134   :  { %1979 = vst [vmem:[%s2612_s3 + $0x28] sm:$0xff] %v1843_v63   ;;  %1995 = vst [vmem:[%s2612_s3 + $0xa8] sm:$0xff] %v1923_v0   ;;  %v1230_v11 = vmax.f32 %v1166_v3, 0.0  ;;  %v1262_v12 = vmax.f32 %v1198_v4, 0.0 }
 0x135   :  { %v612_v5 = vpop.f32.mrf.mxu0  ;;  %v740_v6 = vpop.f32.mrf.mxu1 }
 0x136   :  { %v1167_v7 = vadd.f32 %v2447_v18, %v612_v5  ;;  %v1199_v8 = vadd.f32 %v2447_v18, %v740_v6 }
 0x137   :  { %v614_v9 = vpop.f32.mrf.mxu0  ;;  %v742_v10 = vpop.f32.mrf.mxu1 }
 0x138   :  { %v1231_v13 = vmax.f32 %v1167_v7, 0.0  ;;  %v1263_v14 = vmax.f32 %v1199_v8, 0.0 }
 0x139   :  { %v617_v15 = vpop.f32.mrf.mxu0  ;;  %v745_v16 = vpop.f32.mrf.mxu1 }
 0x13a   :  { %v1848_v17 = vpack.c.bf16 %v1231_v13, %v1230_v11  ;;  %v1928_v19 = vpack.c.bf16 %v1263_v14, %v1262_v12  ;;  %v1168_v22 = vadd.f32 %v2447_v18, %v617_v15  ;;  %v1200_v23 = vadd.f32 %v2447_v18, %v745_v16 }
 0x13b   :  { %v619_v20 = vpop.f32.mrf.mxu0  ;;  %v747_v21 = vpop.f32.mrf.mxu1 }
 0x13c   :  { %1980 = vst [vmem:[%s2612_s3 + $0x30] sm:$0xff] %v1848_v17   ;;  %1996 = vst [vmem:[%s2612_s3 + $0xb0] sm:$0xff] %v1928_v19   ;;  %v1232_v30 = vmax.f32 %v1168_v22, 0.0  ;;  %v1264_v31 = vmax.f32 %v1200_v23, 0.0 }
 0x13d   :  { %v620_v24 = vpop.f32.mrf.mxu0  ;;  %v748_v25 = vpop.f32.mrf.mxu1 }
 0x13e   :  { %v1169_v26 = vadd.f32 %v2447_v18, %v620_v24  ;;  %v1201_v27 = vadd.f32 %v2447_v18, %v748_v25 }
 0x13f   :  { %v622_v28 = vpop.f32.mrf.mxu0  ;;  %v750_v29 = vpop.f32.mrf.mxu1 }
 0x140   :  { %v1233_v32 = vmax.f32 %v1169_v26, 0.0  ;;  %v1265_v33 = vmax.f32 %v1201_v27, 0.0 }
 0x141   :  { %v625_v34 = vpop.f32.mrf.mxu0  ;;  %v753_v35 = vpop.f32.mrf.mxu1 }
 0x142   :  { %v1853_v36 = vpack.c.bf16 %v1233_v32, %v1232_v30  ;;  %v1933_v37 = vpack.c.bf16 %v1265_v33, %v1264_v31  ;;  %v1170_v40 = vadd.f32 %v2447_v18, %v625_v34  ;;  %v1202_v41 = vadd.f32 %v2447_v18, %v753_v35 }
 0x143   :  { %v627_v38 = vpop.f32.mrf.mxu0  ;;  %v755_v39 = vpop.f32.mrf.mxu1 }
 0x144   :  { %1981 = vst [vmem:[%s2612_s3 + $0x38] sm:$0xff] %v1853_v36   ;;  %1997 = vst [vmem:[%s2612_s3 + $0xb8] sm:$0xff] %v1933_v37   ;;  %v1234_v48 = vmax.f32 %v1170_v40, 0.0  ;;  %v1266_v49 = vmax.f32 %v1202_v41, 0.0 }
 0x145   :  { %v628_v42 = vpop.f32.mrf.mxu0  ;;  %v756_v43 = vpop.f32.mrf.mxu1 }
 0x146   :  { %v1171_v44 = vadd.f32 %v2447_v18, %v628_v42  ;;  %v1203_v45 = vadd.f32 %v2447_v18, %v756_v43 }
 0x147   :  { %v630_v46 = vpop.f32.mrf.mxu0  ;;  %v758_v47 = vpop.f32.mrf.mxu1 }
 0x148   :  { %v1235_v50 = vmax.f32 %v1171_v44, 0.0  ;;  %v1267_v51 = vmax.f32 %v1203_v45, 0.0 }
 0x149   :  { %v633_v52 = vpop.f32.mrf.mxu0  ;;  %v761_v53 = vpop.f32.mrf.mxu1 }
 0x14a   :  { %v1858_v54 = vpack.c.bf16 %v1235_v50, %v1234_v48  ;;  %v1938_v55 = vpack.c.bf16 %v1267_v51, %v1266_v49  ;;  %v1172_v58 = vadd.f32 %v2447_v18, %v633_v52  ;;  %v1204_v59 = vadd.f32 %v2447_v18, %v761_v53 }
 0x14b   :  { %v635_v56 = vpop.f32.mrf.mxu0  ;;  %v763_v57 = vpop.f32.mrf.mxu1 }
 0x14c   :  { %1982 = vst [vmem:[%s2612_s3 + $0x40] sm:$0xff] %v1858_v54   ;;  %1998 = vst [vmem:[%s2612_s3 + $0xc0] sm:$0xff] %v1938_v55   ;;  %v1236_v2 = vmax.f32 %v1172_v58, 0.0  ;;  %v1268_v3 = vmax.f32 %v1204_v59, 0.0 }
 0x14d   :  { %v636_v60 = vpop.f32.mrf.mxu0  ;;  %v764_v61 = vpop.f32.mrf.mxu1 }
 0x14e   :  { %v1173_v62 = vadd.f32 %v2447_v18, %v636_v60  ;;  %v1205_v63 = vadd.f32 %v2447_v18, %v764_v61 }
 0x14f   :  { %v638_v0 = vpop.f32.mrf.mxu0  ;;  %v766_v1 = vpop.f32.mrf.mxu1 }
 0x150   :  { %v1237_v4 = vmax.f32 %v1173_v62, 0.0  ;;  %v1269_v5 = vmax.f32 %v1205_v63, 0.0 }
 0x151   :  { %v641_v6 = vpop.f32.mrf.mxu0  ;;  %v769_v7 = vpop.f32.mrf.mxu1 }
 0x152   :  { %v1863_v8 = vpack.c.bf16 %v1237_v4, %v1236_v2  ;;  %v1943_v9 = vpack.c.bf16 %v1269_v5, %v1268_v3  ;;  %v1174_v12 = vadd.f32 %v2447_v18, %v641_v6  ;;  %v1206_v13 = vadd.f32 %v2447_v18, %v769_v7 }
 0x153   :  { %v643_v10 = vpop.f32.mrf.mxu0  ;;  %v771_v11 = vpop.f32.mrf.mxu1 }
 0x154   :  { %1983 = vst [vmem:[%s2612_s3 + $0x48] sm:$0xff] %v1863_v8   ;;  %1999 = vst [vmem:[%s2612_s3 + $0xc8] sm:$0xff] %v1943_v9   ;;  %v1238_v21 = vmax.f32 %v1174_v12, 0.0  ;;  %v1270_v22 = vmax.f32 %v1206_v13, 0.0 }
 0x155   :  { %v644_v14 = vpop.f32.mrf.mxu0  ;;  %v772_v15 = vpop.f32.mrf.mxu1 }
 0x156   :  { %v1175_v16 = vadd.f32 %v2447_v18, %v644_v14  ;;  %v1207_v17 = vadd.f32 %v2447_v18, %v772_v15 }
 0x157   :  { %v646_v19 = vpop.f32.mrf.mxu0  ;;  %v774_v20 = vpop.f32.mrf.mxu1 }
 0x158   :  { %v1239_v23 = vmax.f32 %v1175_v16, 0.0  ;;  %v1271_v24 = vmax.f32 %v1207_v17, 0.0 }
 0x159   :  { %v649_v25 = vpop.f32.mrf.mxu0  ;;  %v777_v26 = vpop.f32.mrf.mxu1 }
 0x15a   :  { %v1868_v27 = vpack.c.bf16 %v1239_v23, %v1238_v21  ;;  %v1948_v28 = vpack.c.bf16 %v1271_v24, %v1270_v22  ;;  %v1176_v31 = vadd.f32 %v2447_v18, %v649_v25  ;;  %v1208_v32 = vadd.f32 %v2447_v18, %v777_v26 }
 0x15b   :  { %v651_v29 = vpop.f32.mrf.mxu0  ;;  %v779_v30 = vpop.f32.mrf.mxu1 }
 0x15c   :  { %1984 = vst [vmem:[%s2612_s3 + $0x50] sm:$0xff] %v1868_v27   ;;  %2000 = vst [vmem:[%s2612_s3 + $0xd0] sm:$0xff] %v1948_v28   ;;  %v1240_v39 = vmax.f32 %v1176_v31, 0.0  ;;  %v1272_v40 = vmax.f32 %v1208_v32, 0.0 }
 0x15d   :  { %v652_v33 = vpop.f32.mrf.mxu0  ;;  %v780_v34 = vpop.f32.mrf.mxu1 }
 0x15e   :  { %v1177_v35 = vadd.f32 %v2447_v18, %v652_v33  ;;  %v1209_v36 = vadd.f32 %v2447_v18, %v780_v34 }
 0x15f   :  { %v654_v37 = vpop.f32.mrf.mxu0  ;;  %v782_v38 = vpop.f32.mrf.mxu1 }
 0x160   :  { %v1241_v41 = vmax.f32 %v1177_v35, 0.0  ;;  %v1273_v42 = vmax.f32 %v1209_v36, 0.0 }
 0x161   :  { %v657_v43 = vpop.f32.mrf.mxu0  ;;  %v785_v44 = vpop.f32.mrf.mxu1 }
 0x162   :  { %v1873_v45 = vpack.c.bf16 %v1241_v41, %v1240_v39  ;;  %v1953_v46 = vpack.c.bf16 %v1273_v42, %v1272_v40  ;;  %v1178_v49 = vadd.f32 %v2447_v18, %v657_v43  ;;  %v1210_v50 = vadd.f32 %v2447_v18, %v785_v44 }
 0x163   :  { %v659_v47 = vpop.f32.mrf.mxu0  ;;  %v787_v48 = vpop.f32.mrf.mxu1 }
 0x164   :  { %1985 = vst [vmem:[%s2612_s3 + $0x58] sm:$0xff] %v1873_v45   ;;  %2001 = vst [vmem:[%s2612_s3 + $0xd8] sm:$0xff] %v1953_v46   ;;  %v1242_v57 = vmax.f32 %v1178_v49, 0.0  ;;  %v1274_v58 = vmax.f32 %v1210_v50, 0.0 }
 0x165   :  { %v660_v51 = vpop.f32.mrf.mxu0  ;;  %v788_v52 = vpop.f32.mrf.mxu1 }
 0x166   :  { %v1179_v53 = vadd.f32 %v2447_v18, %v660_v51  ;;  %v1211_v54 = vadd.f32 %v2447_v18, %v788_v52 }
 0x167   :  { %v662_v55 = vpop.f32.mrf.mxu0  ;;  %v790_v56 = vpop.f32.mrf.mxu1 }
 0x168   :  { %v1243_v59 = vmax.f32 %v1179_v53, 0.0  ;;  %v1275_v60 = vmax.f32 %v1211_v54, 0.0 }
 0x169   :  { %v665_v61 = vpop.f32.mrf.mxu0  ;;  %v793_v62 = vpop.f32.mrf.mxu1 }
 0x16a   :  { %v1878_v63 = vpack.c.bf16 %v1243_v59, %v1242_v57  ;;  %v1958_v0 = vpack.c.bf16 %v1275_v60, %v1274_v58  ;;  %v1180_v3 = vadd.f32 %v2447_v18, %v665_v61  ;;  %v1212_v4 = vadd.f32 %v2447_v18, %v793_v62 }
 0x16b   :  { %v667_v1 = vpop.f32.mrf.mxu0  ;;  %v795_v2 = vpop.f32.mrf.mxu1 }
 0x16c   :  { %1986 = vst [vmem:[%s2612_s3 + $0x60] sm:$0xff] %v1878_v63   ;;  %2002 = vst [vmem:[%s2612_s3 + $0xe0] sm:$0xff] %v1958_v0   ;;  %v1244_v11 = vmax.f32 %v1180_v3, 0.0  ;;  %v1276_v12 = vmax.f32 %v1212_v4, 0.0 }
 0x16d   :  { %v668_v5 = vpop.f32.mrf.mxu0  ;;  %v796_v6 = vpop.f32.mrf.mxu1 }
 0x16e   :  { %v1181_v7 = vadd.f32 %v2447_v18, %v668_v5  ;;  %v1213_v8 = vadd.f32 %v2447_v18, %v796_v6 }
 0x16f   :  { %v670_v9 = vpop.f32.mrf.mxu0  ;;  %v798_v10 = vpop.f32.mrf.mxu1 }
 0x170   :  { %v1245_v13 = vmax.f32 %v1181_v7, 0.0  ;;  %v1277_v14 = vmax.f32 %v1213_v8, 0.0 }
 0x171   :  { %v673_v15 = vpop.f32.mrf.mxu0  ;;  %v801_v16 = vpop.f32.mrf.mxu1 }
 0x172   :  { %v1883_v17 = vpack.c.bf16 %v1245_v13, %v1244_v11  ;;  %v1963_v19 = vpack.c.bf16 %v1277_v14, %v1276_v12  ;;  %v1182_v22 = vadd.f32 %v2447_v18, %v673_v15  ;;  %v1214_v23 = vadd.f32 %v2447_v18, %v801_v16 }
 0x173   :  { %v675_v20 = vpop.f32.mrf.mxu0  ;;  %v803_v21 = vpop.f32.mrf.mxu1 }
 0x174   :  { %1987 = vst [vmem:[%s2612_s3 + $0x68] sm:$0xff] %v1883_v17   ;;  %2003 = vst [vmem:[%s2612_s3 + $0xe8] sm:$0xff] %v1963_v19   ;;  %v1246_v30 = vmax.f32 %v1182_v22, 0.0  ;;  %v1278_v31 = vmax.f32 %v1214_v23, 0.0 }
 0x175   :  { %v676_v24 = vpop.f32.mrf.mxu0  ;;  %v804_v25 = vpop.f32.mrf.mxu1 }
 0x176   :  { %v1183_v26 = vadd.f32 %v2447_v18, %v676_v24  ;;  %v1215_v27 = vadd.f32 %v2447_v18, %v804_v25 }
 0x177   :  { %v678_v28 = vpop.f32.mrf.mxu0  ;;  %v806_v29 = vpop.f32.mrf.mxu1 }
 0x178   :  { %v1247_v32 = vmax.f32 %v1183_v26, 0.0  ;;  %v1279_v33 = vmax.f32 %v1215_v27, 0.0 }
 0x179   :  { %v681_v34 = vpop.f32.mrf.mxu0  ;;  %v809_v35 = vpop.f32.mrf.mxu1 }
 0x17a   :  { %v1888_v36 = vpack.c.bf16 %v1247_v32, %v1246_v30  ;;  %v1968_v37 = vpack.c.bf16 %v1279_v33, %v1278_v31  ;;  %v1184_v40 = vadd.f32 %v2447_v18, %v681_v34  ;;  %v1216_v41 = vadd.f32 %v2447_v18, %v809_v35 }
 0x17b   :  { %v683_v38 = vpop.f32.mrf.mxu0  ;;  %v811_v39 = vpop.f32.mrf.mxu1 }
 0x17c   :  { %1988 = vst [vmem:[%s2612_s3 + $0x70] sm:$0xff] %v1888_v36   ;;  %2004 = vst [vmem:[%s2612_s3 + $0xf0] sm:$0xff] %v1968_v37   ;;  %v1248_v48 = vmax.f32 %v1184_v40, 0.0  ;;  %v1280_v49 = vmax.f32 %v1216_v41, 0.0 }
 0x17d   :  { %v684_v42 = vpop.f32.mrf.mxu0  ;;  %v812_v43 = vpop.f32.mrf.mxu1 }
 0x17e   :  { %v1185_v44 = vadd.f32 %v2447_v18, %v684_v42  ;;  %v1217_v45 = vadd.f32 %v2447_v18, %v812_v43 }
 0x17f   :  { %v686_v46 = vpop.f32.mrf.mxu0  ;;  %v814_v47 = vpop.f32.mrf.mxu1 }
 0x180   :  { %v1249_v50 = vmax.f32 %v1185_v44, 0.0  ;;  %v1281_v51 = vmax.f32 %v1217_v45, 0.0 }
 0x182   :  { %v1893_v52 = vpack.c.bf16 %v1249_v50, %v1248_v48  ;;  %v1973_v53 = vpack.c.bf16 %v1281_v51, %v1280_v49 }
 0x184   :  { %1989 = vst [vmem:[%s2612_s3 + $0x78] sm:$0xff] %v1893_v52   ;;  %2005 = vst [vmem:[%s2612_s3 + $0xf8] sm:$0xff] %v1973_v53  }

// kernel: encoder_forward.56
= control target key start
LH: loop header
LB: loop body
LE: loop exit
PB: predicated region body
PF: predicated region fallthrough
CT: control target
= control target key end

     0   :  { %s943_s1 = inlined_call_operand.vmem [shape: bf16[256,128], index: 1, kind: input, shape index: {}]   ;;  %s944_s0 = inlined_call_operand.vmem [shape: bf16[128,256], index: 0, kind: input, shape index: {}]   ;;  %s945_s2 = inlined_call_operand.vmem [shape: f32[1,128], index: 2, kind: input, shape index: {}]   ;;  %s946_s3 = inlined_call_operand.vmem [shape: bf16[128,128], index: 3, kind: output, shape index: {}]  }
   0x1   :  { %v742_v0 = vld [vmem:[%s943_s1 + $0x78] sm:$0xff]   ;;  %v744_v2 = vld [vmem:[%s943_s1 + $0x70] sm:$0xff]   ;;  %v746_v4 = vld [vmem:[%s943_s1 + $0x68] sm:$0xff]  }
   0x2   :  { %v743_v1 = vld [vmem:[%s943_s1 + $0x38] sm:$0xff]   ;;  %662 = vmatprep.subr.bf16.mxu0 %v742_v0  ;;  %726 = vmatprep.subr.bf16.mxu1 %v742_v0  ;;  %v745_v3 = vld [vmem:[%s943_s1 + $0x30] sm:$0xff]   ;;  %v747_v5 = vld [vmem:[%s943_s1 + $0x28] sm:$0xff]  }
   0x3   :  { %663 = vmatpush3.bf16.msra.mxu0 %v743_v1  ;;  %734 = vmatpush3.bf16.msra.mxu1 %v743_v1  ;;  %v748_v6 = vld [vmem:[%s943_s1 + $0x60] sm:$0xff]   ;;  %v750_v8 = vld [vmem:[%s943_s1 + $0x58] sm:$0xff]   ;;  %v752_v10 = vld [vmem:[%s943_s1 + $0x50] sm:$0xff]  }
   0x4   :  { %664 = vmatprep.subr.bf16.mxu0 %v744_v2  ;;  %727 = vmatprep.subr.bf16.mxu1 %v744_v2  ;;  %v749_v7 = vld [vmem:[%s943_s1 + $0x20] sm:$0xff]   ;;  %v751_v9 = vld [vmem:[%s943_s1 + $0x18] sm:$0xff]   ;;  %v753_v13 = vld [vmem:[%s943_s1 + $0x10] sm:$0xff]  }
   0x5   :  { %v760_v11 = vld [vmem:[%s944_s0 + $0x4] ss:$8 sps:$4 sm:$0xff]   ;;  %v758_v18 = vld [vmem:[%s944_s0] ss:$8 sps:$4 sm:$0xff]   ;;  %v764_v20 = vld [vmem:[%s944_s0 + $0x14] ss:$8 sps:$4 sm:$0xff]  }
   0x6   :  { %v763_v12 = vld [vmem:[%s944_s0 + $0x44] ss:$8 sps:$4 sm:$0xff]   ;;  %271 = vmatprep.mubr.bf16.mxu0 %v760_v11  ;;  %v761_v19 = vld [vmem:[%s944_s0 + $0x40] ss:$8 sps:$4 sm:$0xff]   ;;  %v766_v21 = vld [vmem:[%s944_s0 + $0x54] ss:$8 sps:$4 sm:$0xff]  }
   0x7   :  { %665 = vmatpush3.bf16.msra.mxu0 %v745_v3  ;;  %735 = vmatpush3.bf16.msra.mxu1 %v745_v3  ;;  %v754_v14 = vld [vmem:[%s943_s1 + $0x48] sm:$0xff]   ;;  %v756_v16 = vld [vmem:[%s943_s1 + $0x40] sm:$0xff]   ;;  %v768_v22 = vld [vmem:[%s944_s0 + $0x10] ss:$8 sps:$4 sm:$0xff]  }
   0x8   :  { %666 = vmatprep.subr.bf16.mxu0 %v746_v4  ;;  %728 = vmatprep.subr.bf16.mxu1 %v746_v4  ;;  %v755_v15 = vld [vmem:[%s943_s1 + $0x8] sm:$0xff]   ;;  %v757_v17 = vld [vmem:[%s943_s1] sm:$0xff]   ;;  %v769_v23 = vld [vmem:[%s944_s0 + $0x50] ss:$8 sps:$4 sm:$0xff]  }
   0x9   :  { %303 = vmatprep.mubr.bf16.mxu1 %v763_v12  ;;  %v770_v24 = vld [vmem:[%s944_s0 + $0x24] ss:$8 sps:$4 sm:$0xff]   ;;  %v774_v26 = vld [vmem:[%s944_s0 + $0x20] ss:$8 sps:$4 sm:$0xff]   ;;  %v776_v28 = vld [vmem:[%s944_s0 + $0x34] ss:$8 sps:$4 sm:$0xff]  }
   0xa   :  { %v772_v25 = vld [vmem:[%s944_s0 + $0x64] ss:$8 sps:$4 sm:$0xff]   ;;  %v775_v27 = vld [vmem:[%s944_s0 + $0x60] ss:$8 sps:$4 sm:$0xff]   ;;  %v778_v29 = vld [vmem:[%s944_s0 + $0x74] ss:$8 sps:$4 sm:$0xff]  }
   0xb   :  { %667 = vmatpush3.bf16.msra.mxu0 %v747_v5  ;;  %736 = vmatpush3.bf16.msra.mxu1 %v747_v5  ;;  %v780_v30 = vld [vmem:[%s944_s0 + $0x30] ss:$8 sps:$4 sm:$0xff]   ;;  %v901_v37 = vld [vmem:[%s945_s2] ss:$0 sm:$0xff] }
   0xc   :  { %668 = vmatprep.subr.bf16.mxu0 %v748_v6  ;;  %729 = vmatprep.subr.bf16.mxu1 %v748_v6  ;;  %v781_v31 = vld [vmem:[%s944_s0 + $0x70] ss:$8 sps:$4 sm:$0xff]  }
   0xf   :  { %669 = vmatpush3.bf16.msra.mxu0 %v749_v7  ;;  %737 = vmatpush3.bf16.msra.mxu1 %v749_v7 }
  0x10   :  { %670 = vmatprep.subr.bf16.mxu0 %v750_v8  ;;  %730 = vmatprep.subr.bf16.mxu1 %v750_v8 }
  0x13   :  { %671 = vmatpush3.bf16.msra.mxu0 %v751_v9  ;;  %738 = vmatpush3.bf16.msra.mxu1 %v751_v9 }
  0x14   :  { %672 = vmatprep.subr.bf16.mxu0 %v752_v10  ;;  %731 = vmatprep.subr.bf16.mxu1 %v752_v10 }
  0x17   :  { %673 = vmatpush3.bf16.msra.mxu0 %v753_v13  ;;  %739 = vmatpush3.bf16.msra.mxu1 %v753_v13 }
  0x18   :  { %674 = vmatprep.subr.bf16.mxu0 %v754_v14  ;;  %732 = vmatprep.subr.bf16.mxu1 %v754_v14 }
  0x1b   :  { %675 = vmatpush3.bf16.msra.mxu0 %v755_v15  ;;  %740 = vmatpush3.bf16.msra.mxu1 %v755_v15 }
  0x1c   :  { %676 = vmatprep.subr.bf16.mxu0 %v756_v16  ;;  %733 = vmatprep.subr.bf16.mxu1 %v756_v16 }
  0x1f   :  { %677 = vmatpush3.bf16.msra.mxu0 %v757_v17  ;;  %741 = vmatpush3.bf16.msra.mxu1 %v757_v17 }
  0x22   :  { %272 = vmatmul.mubr.bf16.vlgmr.msra.gmra.mxu0 %v758_v18  ;;  %304 = vmatmul.mubr.bf16.vlgmr.msra.gmra.mxu1 %v761_v19 }
  0x23   :  { %279 = vmatprep.mubr.bf16.mxu0 %v764_v20  ;;  %311 = vmatprep.mubr.bf16.mxu1 %v766_v21 }
  0x2a   :  { %280 = vmatmul.mubr.bf16.gmra.mxu0 %v768_v22  ;;  %312 = vmatmul.mubr.bf16.gmra.mxu1 %v769_v23 }
  0x2b   :  { %287 = vmatprep.mubr.bf16.mxu0 %v770_v24  ;;  %319 = vmatprep.mubr.bf16.mxu1 %v772_v25 }
  0x32   :  { %288 = vmatmul.mubr.bf16.gmra.mxu0 %v774_v26  ;;  %320 = vmatmul.mubr.bf16.gmra.mxu1 %v775_v27 }
  0x33   :  { %295 = vmatprep.mubr.bf16.mxu0 %v776_v28  ;;  %327 = vmatprep.mubr.bf16.mxu1 %v778_v29 }
  0x3a   :  { %296 = vmatmul.mubr.bf16.gmra.mxu0 %v780_v30  ;;  %328 = vmatmul.mubr.bf16.gmra.mxu1 %v781_v31 }
  0xe2   :  { %v678_v32 = vpop.f32.mrf.mxu0  ;;  %v702_v33 = vpop.f32.mrf.mxu1 }
  0xe4   :  { %v679_v34 = vpop.f32.mrf.mxu0  ;;  %v703_v35 = vpop.f32.mrf.mxu1 }
  0xe5   :  { %v680_v36 = vadd.f32 %v679_v34, %v678_v32  ;;  %v704_v38 = vadd.f32 %v703_v35, %v702_v33 }
  0xe6   :  { %v681_v39 = vpop.f32.mrf.mxu0  ;;  %v705_v40 = vpop.f32.mrf.mxu1 }
  0xe7   :  { %v434_v41 = vadd.f32 %v680_v36, %v901_v37  ;;  %v442_v42 = vadd.f32 %v704_v38, %v901_v37 }
  0xe8   :  { %v682_v43 = vpop.f32.mrf.mxu0  ;;  %v706_v44 = vpop.f32.mrf.mxu1 }
  0xe9   :  { %v683_v45 = vadd.f32 %v682_v43, %v681_v39  ;;  %v707_v46 = vadd.f32 %v706_v44, %v705_v40  ;;  %v450_v51 = vmax.f32 %v434_v41, 0.0  ;;  %v458_v52 = vmax.f32 %v442_v42, 0.0 }
  0xea   :  { %v684_v47 = vpop.f32.mrf.mxu0  ;;  %v708_v48 = vpop.f32.mrf.mxu1 }
  0xeb   :  { %v435_v49 = vadd.f32 %v683_v45, %v901_v37  ;;  %v443_v50 = vadd.f32 %v707_v46, %v901_v37 }
  0xec   :  { %v685_v53 = vpop.f32.mrf.mxu0  ;;  %v709_v54 = vpop.f32.mrf.mxu1 }
  0xed   :  { %v451_v55 = vmax.f32 %v435_v49, 0.0  ;;  %v459_v56 = vmax.f32 %v443_v50, 0.0  ;;  %v686_v57 = vadd.f32 %v685_v53, %v684_v47  ;;  %v710_v58 = vadd.f32 %v709_v54, %v708_v48 }
  0xee   :  { %v687_v59 = vpop.f32.mrf.mxu0  ;;  %v711_v60 = vpop.f32.mrf.mxu1 }
  0xef   :  { %v618_v61 = vpack.c.bf16 %v451_v55, %v450_v51  ;;  %v638_v62 = vpack.c.bf16 %v459_v56, %v458_v52  ;;  %v436_v63 = vadd.f32 %v686_v57, %v901_v37  ;;  %v444_v0 = vadd.f32 %v710_v58, %v901_v37 }
  0xf0   :  { %v688_v1 = vpop.f32.mrf.mxu0  ;;  %v712_v2 = vpop.f32.mrf.mxu1 }
  0xf1   :  { %619 = vst [vmem:[%s946_s3] sm:$0xff] %v618_v61   ;;  %658 = vst [vmem:[%s946_s3 + $0x20] sm:$0xff] %v638_v62   ;;  %v689_v3 = vadd.f32 %v688_v1, %v687_v59  ;;  %v713_v4 = vadd.f32 %v712_v2, %v711_v60  ;;  %v452_v9 = vmax.f32 %v436_v63, 0.0  ;;  %v460_v10 = vmax.f32 %v444_v0, 0.0 }
  0xf2   :  { %v690_v5 = vpop.f32.mrf.mxu0  ;;  %v714_v6 = vpop.f32.mrf.mxu1 }
  0xf3   :  { %v437_v7 = vadd.f32 %v689_v3, %v901_v37  ;;  %v445_v8 = vadd.f32 %v713_v4, %v901_v37 }
  0xf4   :  { %v691_v11 = vpop.f32.mrf.mxu0  ;;  %v715_v12 = vpop.f32.mrf.mxu1 }
  0xf5   :  { %v453_v13 = vmax.f32 %v437_v7, 0.0  ;;  %v461_v14 = vmax.f32 %v445_v8, 0.0  ;;  %v692_v15 = vadd.f32 %v691_v11, %v690_v5  ;;  %v716_v16 = vadd.f32 %v715_v12, %v714_v6 }
  0xf6   :  { %v693_v17 = vpop.f32.mrf.mxu0  ;;  %v717_v18 = vpop.f32.mrf.mxu1 }
  0xf7   :  { %v623_v19 = vpack.c.bf16 %v453_v13, %v452_v9  ;;  %v643_v20 = vpack.c.bf16 %v461_v14, %v460_v10  ;;  %v438_v21 = vadd.f32 %v692_v15, %v901_v37  ;;  %v446_v22 = vadd.f32 %v716_v16, %v901_v37 }
  0xf8   :  { %v694_v23 = vpop.f32.mrf.mxu0  ;;  %v718_v24 = vpop.f32.mrf.mxu1 }
  0xf9   :  { %655 = vst [vmem:[%s946_s3 + $0x8] sm:$0xff] %v623_v19   ;;  %659 = vst [vmem:[%s946_s3 + $0x28] sm:$0xff] %v643_v20   ;;  %v695_v25 = vadd.f32 %v694_v23, %v693_v17  ;;  %v719_v26 = vadd.f32 %v718_v24, %v717_v18  ;;  %v454_v31 = vmax.f32 %v438_v21, 0.0  ;;  %v462_v32 = vmax.f32 %v446_v22, 0.0 }
  0xfa   :  { %v696_v27 = vpop.f32.mrf.mxu0  ;;  %v720_v28 = vpop.f32.mrf.mxu1 }
  0xfb   :  { %v439_v29 = vadd.f32 %v695_v25, %v901_v37  ;;  %v447_v30 = vadd.f32 %v719_v26, %v901_v37 }
  0xfc   :  { %v697_v33 = vpop.f32.mrf.mxu0  ;;  %v721_v34 = vpop.f32.mrf.mxu1 }
  0xfd   :  { %v455_v35 = vmax.f32 %v439_v29, 0.0  ;;  %v463_v36 = vmax.f32 %v447_v30, 0.0  ;;  %v698_v38 = vadd.f32 %v697_v33, %v696_v27  ;;  %v722_v39 = vadd.f32 %v721_v34, %v720_v28 }
  0xfe   :  { %v699_v40 = vpop.f32.mrf.mxu0  ;;  %v723_v41 = vpop.f32.mrf.mxu1 }
  0xff   :  { %v628_v42 = vpack.c.bf16 %v455_v35, %v454_v31  ;;  %v648_v43 = vpack.c.bf16 %v463_v36, %v462_v32  ;;  %v440_v46 = vadd.f32 %v698_v38, %v901_v37  ;;  %v448_v47 = vadd.f32 %v722_v39, %v901_v37 }
 0x100   :  { %v700_v44 = vpop.f32.mrf.mxu0  ;;  %v724_v45 = vpop.f32.mrf.mxu1 }
 0x101   :  { %656 = vst [vmem:[%s946_s3 + $0x10] sm:$0xff] %v628_v42   ;;  %660 = vst [vmem:[%s946_s3 + $0x30] sm:$0xff] %v648_v43   ;;  %v701_v48 = vadd.f32 %v700_v44, %v699_v40  ;;  %v725_v49 = vadd.f32 %v724_v45, %v723_v41  ;;  %v456_v52 = vmax.f32 %v440_v46, 0.0  ;;  %v464_v53 = vmax.f32 %v448_v47, 0.0 }
 0x103   :  { %v441_v50 = vadd.f32 %v701_v48, %v901_v37  ;;  %v449_v51 = vadd.f32 %v725_v49, %v901_v37 }
 0x105   :  { %v457_v54 = vmax.f32 %v441_v50, 0.0  ;;  %v465_v55 = vmax.f32 %v449_v51, 0.0 }
 0x107   :  { %v633_v56 = vpack.c.bf16 %v457_v54, %v456_v52  ;;  %v653_v57 = vpack.c.bf16 %v465_v55, %v464_v53 }
 0x109   :  { %657 = vst [vmem:[%s946_s3 + $0x18] sm:$0xff] %v633_v56   ;;  %661 = vst [vmem:[%s946_s3 + $0x38] sm:$0xff] %v653_v57  }

// kernel: encoder_forward.57
= control target key start
LH: loop header
LB: loop body
LE: loop exit
PB: predicated region body
PF: predicated region fallthrough
CT: control target
= control target key end

     0   :  { %s709_s1 = inlined_call_operand.vmem [shape: bf16[128,128], index: 1, kind: input, shape index: {}]   ;;  %s710_s0 = inlined_call_operand.vmem [shape: bf16[128,128], index: 0, kind: input, shape index: {}]   ;;  %s711_s2 = inlined_call_operand.vmem [shape: f32[1,128], index: 2, kind: input, shape index: {}]   ;;  %s712_s3 = inlined_call_operand.vmem [shape: bf16[128,128], index: 3, kind: output, shape index: {}]  }
   0x1   :  { %v598_v0 = vld [vmem:[%s709_s1 + $0x38] sm:$0xff]   ;;  %v599_v1 = vld [vmem:[%s709_s1 + $0x30] sm:$0xff]   ;;  %v600_v2 = vld [vmem:[%s709_s1 + $0x28] sm:$0xff]  }
   0x2   :  { %550 = vmatprep.subr.bf16.mxu0 %v598_v0  ;;  %582 = vmatprep.subr.bf16.mxu1 %v598_v0  ;;  %v601_v3 = vld [vmem:[%s709_s1 + $0x20] sm:$0xff]   ;;  %v602_v6 = vld [vmem:[%s709_s1 + $0x18] sm:$0xff]   ;;  %v603_v7 = vld [vmem:[%s709_s1 + $0x10] sm:$0xff]  }
   0x3   :  { %551 = vmatpush3.bf16.msra.mxu0 %v598_v0  ;;  %590 = vmatpush3.bf16.msra.mxu1 %v598_v0  ;;  %v606_v4 = vld [vmem:[%s710_s0] sm:$0xff]   ;;  %v604_v8 = vld [vmem:[%s709_s1 + $0x8] sm:$0xff]   ;;  %v610_v12 = vld [vmem:[%s710_s0 + $0x10] sm:$0xff]  }
   0x4   :  { %552 = vmatprep.subr.bf16.mxu0 %v599_v1  ;;  %583 = vmatprep.subr.bf16.mxu1 %v599_v1  ;;  %v607_v5 = vld [vmem:[%s710_s0 + $0x20] sm:$0xff]   ;;  %v608_v10 = vld [vmem:[%s710_s0 + $0x8] sm:$0xff]   ;;  %v611_v13 = vld [vmem:[%s710_s0 + $0x30] sm:$0xff]  }
   0x5   :  { %566 = vmatprep.mubr.bf16.mxu0 %v606_v4  ;;  %574 = vmatprep.mubr.bf16.mxu1 %v607_v5  ;;  %v605_v9 = vld [vmem:[%s709_s1] sm:$0xff]   ;;  %v609_v11 = vld [vmem:[%s710_s0 + $0x28] sm:$0xff]   ;;  %v612_v14 = vld [vmem:[%s710_s0 + $0x18] sm:$0xff]  }
   0x6   :  { %v613_v15 = vld [vmem:[%s710_s0 + $0x38] sm:$0xff]   ;;  %v454_v18 = vld [vmem:[%s711_s2] ss:$0 sm:$0xff] }
   0x7   :  { %553 = vmatpush3.bf16.msra.mxu0 %v599_v1  ;;  %591 = vmatpush3.bf16.msra.mxu1 %v599_v1 }
   0x8   :  { %554 = vmatprep.subr.bf16.mxu0 %v600_v2  ;;  %584 = vmatprep.subr.bf16.mxu1 %v600_v2 }
   0xb   :  { %555 = vmatpush3.bf16.msra.mxu0 %v600_v2  ;;  %592 = vmatpush3.bf16.msra.mxu1 %v600_v2 }
   0xc   :  { %556 = vmatprep.subr.bf16.mxu0 %v601_v3  ;;  %585 = vmatprep.subr.bf16.mxu1 %v601_v3 }
   0xf   :  { %557 = vmatpush3.bf16.msra.mxu0 %v601_v3  ;;  %593 = vmatpush3.bf16.msra.mxu1 %v601_v3 }
  0x10   :  { %558 = vmatprep.subr.bf16.mxu0 %v602_v6  ;;  %586 = vmatprep.subr.bf16.mxu1 %v602_v6 }
  0x13   :  { %559 = vmatpush3.bf16.msra.mxu0 %v602_v6  ;;  %594 = vmatpush3.bf16.msra.mxu1 %v602_v6 }
  0x14   :  { %560 = vmatprep.subr.bf16.mxu0 %v603_v7  ;;  %587 = vmatprep.subr.bf16.mxu1 %v603_v7 }
  0x17   :  { %561 = vmatpush3.bf16.msra.mxu0 %v603_v7  ;;  %595 = vmatpush3.bf16.msra.mxu1 %v603_v7 }
  0x18   :  { %562 = vmatprep.subr.bf16.mxu0 %v604_v8  ;;  %588 = vmatprep.subr.bf16.mxu1 %v604_v8 }
  0x1b   :  { %563 = vmatpush3.bf16.msra.mxu0 %v604_v8  ;;  %596 = vmatpush3.bf16.msra.mxu1 %v604_v8 }
  0x1c   :  { %564 = vmatprep.subr.bf16.mxu0 %v605_v9  ;;  %589 = vmatprep.subr.bf16.mxu1 %v605_v9 }
  0x1f   :  { %565 = vmatpush3.bf16.msra.mxu0 %v605_v9  ;;  %597 = vmatpush3.bf16.msra.mxu1 %v605_v9 }
  0x22   :  { %567 = vmatmul.mubr.bf16.vlgmr.msra.gmra.mxu0 %v608_v10  ;;  %575 = vmatmul.mubr.bf16.vlgmr.msra.gmra.mxu1 %v609_v11 }
  0x23   :  { %570 = vmatprep.mubr.bf16.mxu0 %v610_v12  ;;  %578 = vmatprep.mubr.bf16.mxu1 %v611_v13 }
  0x2a   :  { %571 = vmatmul.mubr.bf16.gmra.mxu0 %v612_v14  ;;  %579 = vmatmul.mubr.bf16.gmra.mxu1 %v613_v15 }
  0xe2   :  { %v568_v16 = vpop.f32.mrf.mxu0  ;;  %v576_v17 = vpop.f32.mrf.mxu1 }
  0xe3   :  { %v340_v23 = vadd.f32 %v568_v16, %v454_v18  ;;  %v348_v24 = vadd.f32 %v576_v17, %v454_v18 }
  0xe4   :  { %v177_v19 = vpop.f32.mrf.mxu0  ;;  %v209_v20 = vpop.f32.mrf.mxu1 }
  0xe5   :  { %v338_v27 = vadd.f32 %v454_v18, %v177_v19  ;;  %v346_v28 = vadd.f32 %v454_v18, %v209_v20 }
  0xe6   :  { %v569_v21 = vpop.f32.mrf.mxu0  ;;  %v577_v22 = vpop.f32.mrf.mxu1 }
  0xe7   :  { %v341_v25 = vadd.f32 %v569_v21, %v454_v18  ;;  %v349_v26 = vadd.f32 %v577_v22, %v454_v18 }
  0xe8   :  { %v180_v29 = vpop.f32.mrf.mxu0  ;;  %v212_v30 = vpop.f32.mrf.mxu1 }
  0xe9   :  { %v495_v31 = vpack.c.bf16 %v341_v25, %v340_v23  ;;  %v515_v32 = vpack.c.bf16 %v349_v26, %v348_v24  ;;  %v339_v33 = vadd.f32 %v454_v18, %v180_v29  ;;  %v347_v34 = vadd.f32 %v454_v18, %v212_v30 }
  0xea   :  { %v572_v35 = vpop.f32.mrf.mxu0  ;;  %v580_v36 = vpop.f32.mrf.mxu1 }
  0xeb   :  { %527 = vst [vmem:[%s712_s3 + $0x8] sm:$0xff] %v495_v31   ;;  %531 = vst [vmem:[%s712_s3 + $0x28] sm:$0xff] %v515_v32   ;;  %v490_v37 = vpack.c.bf16 %v339_v33, %v338_v27  ;;  %v510_v38 = vpack.c.bf16 %v347_v34, %v346_v28  ;;  %v344_v43 = vadd.f32 %v572_v35, %v454_v18 }
  0xec   :  { %v193_v39 = vpop.f32.mrf.mxu0  ;;  %v225_v40 = vpop.f32.mrf.mxu1  ;;  %v352_v44 = vadd.f32 %v580_v36, %v454_v18 }
  0xed   :  { %491 = vst [vmem:[%s712_s3] sm:$0xff] %v490_v37   ;;  %530 = vst [vmem:[%s712_s3 + $0x20] sm:$0xff] %v510_v38   ;;  %v342_v47 = vadd.f32 %v454_v18, %v193_v39  ;;  %v350_v48 = vadd.f32 %v454_v18, %v225_v40 }
  0xee   :  { %v573_v41 = vpop.f32.mrf.mxu0  ;;  %v581_v42 = vpop.f32.mrf.mxu1 }
  0xef   :  { %v345_v45 = vadd.f32 %v573_v41, %v454_v18  ;;  %v353_v46 = vadd.f32 %v581_v42, %v454_v18 }
  0xf0   :  { %v196_v49 = vpop.f32.mrf.mxu0  ;;  %v228_v50 = vpop.f32.mrf.mxu1 }
  0xf1   :  { %v505_v51 = vpack.c.bf16 %v345_v45, %v344_v43  ;;  %v525_v52 = vpack.c.bf16 %v353_v46, %v352_v44  ;;  %v343_v53 = vadd.f32 %v454_v18, %v196_v49  ;;  %v351_v54 = vadd.f32 %v454_v18, %v228_v50 }
  0xf3   :  { %529 = vst [vmem:[%s712_s3 + $0x18] sm:$0xff] %v505_v51   ;;  %533 = vst [vmem:[%s712_s3 + $0x38] sm:$0xff] %v525_v52   ;;  %v500_v55 = vpack.c.bf16 %v343_v53, %v342_v47  ;;  %v520_v56 = vpack.c.bf16 %v351_v54, %v350_v48 }
  0xf5   :  { %528 = vst [vmem:[%s712_s3 + $0x10] sm:$0xff] %v500_v55   ;;  %532 = vst [vmem:[%s712_s3 + $0x30] sm:$0xff] %v520_v56  }

// kernel: encoder_forward.58
= control target key start
LH: loop header
LB: loop body
LE: loop exit
PB: predicated region body
PF: predicated region fallthrough
CT: control target
= control target key end

     0   :  { %s878_s1 = inlined_call_operand.vmem [shape: bf16[128,128], index: 1, kind: input, shape index: {}]   ;;  %s879_s0 = inlined_call_operand.vmem [shape: bf16[128,128], index: 0, kind: input, shape index: {}]   ;;  %s880_s2 = inlined_call_operand.vmem [shape: f32[1,128], index: 2, kind: input, shape index: {}]   ;;  %s881_s3 = inlined_call_operand.vmem [shape: bf16[128,128], index: 3, kind: input, shape index: {}]   ;;  %s882_s4 = inlined_call_operand.vmem [shape: bf16[128,128], index: 4, kind: output, shape index: {}]  }
   0x1   :  { %v704_v0 = vld [vmem:[%s878_s1 + $0x38] sm:$0xff]   ;;  %v705_v1 = vld [vmem:[%s878_s1 + $0x30] sm:$0xff]   ;;  %v706_v2 = vld [vmem:[%s878_s1 + $0x28] sm:$0xff]  }
   0x2   :  { %656 = vmatprep.subr.bf16.mxu0 %v704_v0  ;;  %688 = vmatprep.subr.bf16.mxu1 %v704_v0  ;;  %v707_v3 = vld [vmem:[%s878_s1 + $0x20] sm:$0xff]   ;;  %v708_v6 = vld [vmem:[%s878_s1 + $0x18] sm:$0xff]   ;;  %v709_v7 = vld [vmem:[%s878_s1 + $0x10] sm:$0xff]  }
   0x3   :  { %657 = vmatpush3.bf16.msra.mxu0 %v704_v0  ;;  %696 = vmatpush3.bf16.msra.mxu1 %v704_v0  ;;  %v712_v4 = vld [vmem:[%s879_s0] sm:$0xff]   ;;  %v710_v8 = vld [vmem:[%s878_s1 + $0x8] sm:$0xff]   ;;  %v716_v12 = vld [vmem:[%s879_s0 + $0x10] sm:$0xff]  }
   0x4   :  { %658 = vmatprep.subr.bf16.mxu0 %v705_v1  ;;  %689 = vmatprep.subr.bf16.mxu1 %v705_v1  ;;  %v713_v5 = vld [vmem:[%s879_s0 + $0x20] sm:$0xff]   ;;  %v714_v10 = vld [vmem:[%s879_s0 + $0x8] sm:$0xff]   ;;  %v717_v13 = vld [vmem:[%s879_s0 + $0x30] sm:$0xff]  }
   0x5   :  { %672 = vmatprep.mubr.bf16.mxu0 %v712_v4  ;;  %680 = vmatprep.mubr.bf16.mxu1 %v713_v5  ;;  %v711_v9 = vld [vmem:[%s878_s1] sm:$0xff]   ;;  %v715_v11 = vld [vmem:[%s879_s0 + $0x28] sm:$0xff]   ;;  %v718_v14 = vld [vmem:[%s879_s0 + $0x18] sm:$0xff]  }
   0x6   :  { %v719_v15 = vld [vmem:[%s879_s0 + $0x38] sm:$0xff]   ;;  %v796_v16 = vld [vmem:[%s880_s2] ss:$0 sm:$0xff]  ;;  %v626_v17 = vld [vmem:[%s881_s3 + $0x8] sm:$0xff]  }
   0x7   :  { %659 = vmatpush3.bf16.msra.mxu0 %v705_v1  ;;  %697 = vmatpush3.bf16.msra.mxu1 %v705_v1  ;;  %v630_v18 = vld [vmem:[%s881_s3 + $0x28] sm:$0xff]   ;;  %v555_v21 = vld [vmem:[%s881_s3] sm:$0xff]   ;;  %v560_v24 = vunpack.c.l.bf16 %v626_v17  ;;  %v815_v29 = vld [vmem:[%s881_s3 + $0x18] sm:$0xff]   ;;  %v561_v38 = vunpack.c.h.bf16 %v626_v17 }
   0x8   :  { %660 = vmatprep.subr.bf16.mxu0 %v706_v2  ;;  %690 = vmatprep.subr.bf16.mxu1 %v706_v2  ;;  %v629_v22 = vld [vmem:[%s881_s3 + $0x20] sm:$0xff]   ;;  %v576_v26 = vunpack.c.l.bf16 %v630_v18  ;;  %v820_v30 = vld [vmem:[%s881_s3 + $0x38] sm:$0xff]   ;;  %v556_v32 = vunpack.c.l.bf16 %v555_v21  ;;  %v827_v35 = vld [vmem:[%s881_s3 + $0x10] sm:$0xff]   ;;  %v577_v40 = vunpack.c.h.bf16 %v630_v18  ;;  %v557_v41 = vunpack.c.h.bf16 %v555_v21 }
   0x9   :  { %v572_v34 = vunpack.c.l.bf16 %v629_v22  ;;  %v832_v36 = vld [vmem:[%s881_s3 + $0x30] sm:$0xff]   ;;  %v573_v42 = vunpack.c.h.bf16 %v629_v22  ;;  %v568_v45 = vunpack.c.l.bf16 %v815_v29  ;;  %v584_v46 = vunpack.c.l.bf16 %v820_v30 }
   0xa   :  { %v564_v51 = vunpack.c.l.bf16 %v827_v35  ;;  %v580_v52 = vunpack.c.l.bf16 %v832_v36  ;;  %v569_v61 = vunpack.c.h.bf16 %v815_v29  ;;  %v585_v62 = vunpack.c.h.bf16 %v820_v30 }
   0xb   :  { %661 = vmatpush3.bf16.msra.mxu0 %v706_v2  ;;  %698 = vmatpush3.bf16.msra.mxu1 %v706_v2  ;;  %v565_v22 = vunpack.c.h.bf16 %v827_v35 }
   0xc   :  { %662 = vmatprep.subr.bf16.mxu0 %v707_v3  ;;  %691 = vmatprep.subr.bf16.mxu1 %v707_v3 }
   0xf   :  { %663 = vmatpush3.bf16.msra.mxu0 %v707_v3  ;;  %699 = vmatpush3.bf16.msra.mxu1 %v707_v3 }
  0x10   :  { %664 = vmatprep.subr.bf16.mxu0 %v708_v6  ;;  %692 = vmatprep.subr.bf16.mxu1 %v708_v6 }
  0x13   :  { %665 = vmatpush3.bf16.msra.mxu0 %v708_v6  ;;  %700 = vmatpush3.bf16.msra.mxu1 %v708_v6 }
  0x14   :  { %666 = vmatprep.subr.bf16.mxu0 %v709_v7  ;;  %693 = vmatprep.subr.bf16.mxu1 %v709_v7 }
  0x17   :  { %667 = vmatpush3.bf16.msra.mxu0 %v709_v7  ;;  %701 = vmatpush3.bf16.msra.mxu1 %v709_v7 }
  0x18   :  { %668 = vmatprep.subr.bf16.mxu0 %v710_v8  ;;  %694 = vmatprep.subr.bf16.mxu1 %v710_v8 }
  0x1b   :  { %669 = vmatpush3.bf16.msra.mxu0 %v710_v8  ;;  %702 = vmatpush3.bf16.msra.mxu1 %v710_v8 }
  0x1c   :  { %670 = vmatprep.subr.bf16.mxu0 %v711_v9  ;;  %695 = vmatprep.subr.bf16.mxu1 %v711_v9 }
  0x1f   :  { %671 = vmatpush3.bf16.msra.mxu0 %v711_v9  ;;  %703 = vmatpush3.bf16.msra.mxu1 %v711_v9 }
  0x22   :  { %673 = vmatmul.mubr.bf16.vlgmr.msra.gmra.mxu0 %v714_v10  ;;  %681 = vmatmul.mubr.bf16.vlgmr.msra.gmra.mxu1 %v715_v11 }
  0x23   :  { %676 = vmatprep.mubr.bf16.mxu0 %v716_v12  ;;  %684 = vmatprep.mubr.bf16.mxu1 %v717_v13 }
  0x2a   :  { %677 = vmatmul.mubr.bf16.gmra.mxu0 %v718_v14  ;;  %685 = vmatmul.mubr.bf16.gmra.mxu1 %v719_v15 }
  0xe2   :  { %v674_v19 = vpop.f32.mrf.mxu0  ;;  %v682_v20 = vpop.f32.mrf.mxu1 }
  0xe3   :  { %v343_v23 = vadd.f32 %v674_v19, %v796_v16  ;;  %v351_v25 = vadd.f32 %v682_v20, %v796_v16 }
  0xe4   :  { %v180_v27 = vpop.f32.mrf.mxu0  ;;  %v212_v28 = vpop.f32.mrf.mxu1 }
  0xe5   :  { %v341_v31 = vadd.f32 %v796_v16, %v180_v27  ;;  %v349_v33 = vadd.f32 %v796_v16, %v212_v28  ;;  %v391_v43 = vadd.f32 %v560_v24, %v343_v23  ;;  %v399_v44 = vadd.f32 %v576_v26, %v351_v25 }
  0xe6   :  { %v675_v37 = vpop.f32.mrf.mxu0  ;;  %v683_v39 = vpop.f32.mrf.mxu1  ;;  %v581_v23 = vunpack.c.h.bf16 %v832_v36 }
  0xe7   :  { %v344_v47 = vadd.f32 %v675_v37, %v796_v16  ;;  %v352_v48 = vadd.f32 %v683_v39, %v796_v16  ;;  %v389_v53 = vadd.f32 %v556_v32, %v341_v31  ;;  %v397_v54 = vadd.f32 %v572_v34, %v349_v33 }
  0xe8   :  { %v183_v49 = vpop.f32.mrf.mxu0  ;;  %v215_v50 = vpop.f32.mrf.mxu1  ;;  %v407_v63 = vmax.f32 %v391_v43, 0.0  ;;  %v415_v0 = vmax.f32 %v399_v44, 0.0 }
  0xe9   :  { %v342_v55 = vadd.f32 %v796_v16, %v183_v49  ;;  %v350_v56 = vadd.f32 %v796_v16, %v215_v50  ;;  %v392_v57 = vadd.f32 %v561_v38, %v344_v47  ;;  %v400_v58 = vadd.f32 %v577_v40, %v352_v48 }
  0xea   :  { %v678_v59 = vpop.f32.mrf.mxu0  ;;  %v686_v60 = vpop.f32.mrf.mxu1  ;;  %v405_v9 = vmax.f32 %v389_v53, 0.0  ;;  %v413_v10 = vmax.f32 %v397_v54, 0.0 }
  0xeb   :  { %v390_v1 = vadd.f32 %v557_v41, %v342_v55  ;;  %v398_v2 = vadd.f32 %v573_v42, %v350_v56  ;;  %v408_v3 = vmax.f32 %v392_v57, 0.0  ;;  %v416_v4 = vmax.f32 %v400_v58, 0.0 }
  0xec   :  { %v347_v5 = vadd.f32 %v678_v59, %v796_v16  ;;  %v355_v6 = vadd.f32 %v686_v60, %v796_v16  ;;  %v196_v7 = vpop.f32.mrf.mxu0  ;;  %v228_v8 = vpop.f32.mrf.mxu1 }
  0xed   :  { %v406_v11 = vmax.f32 %v390_v1, 0.0  ;;  %v414_v12 = vmax.f32 %v398_v2, 0.0  ;;  %v594_v13 = vpack.c.bf16 %v408_v3, %v407_v63  ;;  %v614_v14 = vpack.c.bf16 %v416_v4, %v415_v0 }
  0xee   :  { %v345_v15 = vadd.f32 %v796_v16, %v196_v7  ;;  %v353_v17 = vadd.f32 %v796_v16, %v228_v8  ;;  %v679_v18 = vpop.f32.mrf.mxu0  ;;  %v687_v19 = vpop.f32.mrf.mxu1  ;;  %v395_v24 = vadd.f32 %v568_v45, %v347_v5  ;;  %v403_v25 = vadd.f32 %v584_v46, %v355_v6 }
  0xef   :  { %v589_v20 = vpack.c.bf16 %v406_v11, %v405_v9  ;;  %v609_v21 = vpack.c.bf16 %v414_v12, %v413_v10  ;;  %633 = vst [vmem:[%s882_s4 + $0x8] sm:$0xff] %v594_v13   ;;  %637 = vst [vmem:[%s882_s4 + $0x28] sm:$0xff] %v614_v14   ;;  %v348_v26 = vadd.f32 %v679_v18, %v796_v16 }
  0xf0   :  { %v356_v27 = vadd.f32 %v687_v19, %v796_v16  ;;  %v199_v28 = vpop.f32.mrf.mxu0  ;;  %v231_v29 = vpop.f32.mrf.mxu1  ;;  %v393_v30 = vadd.f32 %v564_v51, %v345_v15  ;;  %v401_v31 = vadd.f32 %v580_v52, %v353_v17  ;;  %v411_v38 = vmax.f32 %v395_v24, 0.0 }
  0xf1   :  { %590 = vst [vmem:[%s882_s4] sm:$0xff] %v589_v20   ;;  %636 = vst [vmem:[%s882_s4 + $0x20] sm:$0xff] %v609_v21   ;;  %v346_v32 = vadd.f32 %v796_v16, %v199_v28  ;;  %v354_v33 = vadd.f32 %v796_v16, %v231_v29  ;;  %v396_v34 = vadd.f32 %v569_v61, %v348_v26  ;;  %v419_v39 = vmax.f32 %v403_v25, 0.0 }
  0xf2   :  { %v404_v35 = vadd.f32 %v585_v62, %v356_v27  ;;  %v409_v42 = vmax.f32 %v393_v30, 0.0  ;;  %v417_v43 = vmax.f32 %v401_v31, 0.0 }
  0xf3   :  { %v394_v36 = vadd.f32 %v565_v22, %v346_v32  ;;  %v402_v37 = vadd.f32 %v581_v23, %v354_v33  ;;  %v412_v40 = vmax.f32 %v396_v34, 0.0 }
  0xf4   :  { %v420_v41 = vmax.f32 %v404_v35, 0.0 }
  0xf5   :  { %v410_v44 = vmax.f32 %v394_v36, 0.0  ;;  %v418_v45 = vmax.f32 %v402_v37, 0.0  ;;  %v604_v46 = vpack.c.bf16 %v412_v40, %v411_v38 }
  0xf6   :  { %v624_v47 = vpack.c.bf16 %v420_v41, %v419_v39 }
  0xf7   :  { %v599_v48 = vpack.c.bf16 %v410_v44, %v409_v42  ;;  %v619_v49 = vpack.c.bf16 %v418_v45, %v417_v43  ;;  %635 = vst [vmem:[%s882_s4 + $0x18] sm:$0xff] %v604_v46  }
  0xf8   :  { %639 = vst [vmem:[%s882_s4 + $0x38] sm:$0xff] %v624_v47  }
  0xf9   :  { %634 = vst [vmem:[%s882_s4 + $0x10] sm:$0xff] %v599_v48   ;;  %638 = vst [vmem:[%s882_s4 + $0x30] sm:$0xff] %v619_v49  }

// kernel: encoder_forward.67
= control target key start
LH: loop header
LB: loop body
LE: loop exit
PB: predicated region body
PF: predicated region fallthrough
CT: control target
= control target key end

     0   :  { %s339_s1 = inlined_call_operand.vmem [shape: bf16[128,128], index: 1, kind: input, shape index: {}]   ;;  %s340_s0 = inlined_call_operand.vmem [shape: bf16[32,128], index: 0, kind: input, shape index: {}]   ;;  %s341_s2 = inlined_call_operand.vmem [shape: f32[1,128], index: 2, kind: input, shape index: {}]   ;;  %s342_s3 = inlined_call_operand.vmem [shape: bf16[32,128], index: 3, kind: output, shape index: {}]  }
   0x1   :  { %v270_v0 = vld [vmem:[%s339_s1 + $0x38] sm:$0xff]   ;;  %v271_v1 = vld [vmem:[%s339_s1 + $0x30] sm:$0xff]   ;;  %v272_v2 = vld [vmem:[%s339_s1 + $0x28] sm:$0xff]  }
   0x2   :  { %250 = vmatprep.subr.bf16.mxu0 %v270_v0  ;;  %v273_v3 = vld [vmem:[%s339_s1 + $0x20] sm:$0xff]   ;;  %v274_v5 = vld [vmem:[%s339_s1 + $0x18] sm:$0xff]   ;;  %v275_v6 = vld [vmem:[%s339_s1 + $0x10] sm:$0xff]  }
   0x3   :  { %251 = vmatpush3.bf16.msra.mxu0 %v270_v0  ;;  %v278_v4 = vld [vmem:[%s340_s0] sm:$0xff]   ;;  %v276_v7 = vld [vmem:[%s339_s1 + $0x8] sm:$0xff]  }
   0x4   :  { %252 = vmatprep.subr.bf16.mxu0 %v271_v1  ;;  %266 = vmatprep.mubr.bf16.mxu0 %v278_v4  ;;  %v277_v8 = vld [vmem:[%s339_s1] sm:$0xff]   ;;  %v279_v9 = vld [vmem:[%s340_s0 + $0x8] sm:$0xff]  }
   0x5   :  { %v220_v11 = vld [vmem:[%s341_s2] ss:$0 sm:$0xff] }
   0x7   :  { %253 = vmatpush3.bf16.msra.mxu0 %v271_v1 }
   0x8   :  { %254 = vmatprep.subr.bf16.mxu0 %v272_v2 }
   0xb   :  { %255 = vmatpush3.bf16.msra.mxu0 %v272_v2 }
   0xc   :  { %256 = vmatprep.subr.bf16.mxu0 %v273_v3 }
   0xf   :  { %257 = vmatpush3.bf16.msra.mxu0 %v273_v3 }
  0x10   :  { %258 = vmatprep.subr.bf16.mxu0 %v274_v5 }
  0x13   :  { %259 = vmatpush3.bf16.msra.mxu0 %v274_v5 }
  0x14   :  { %260 = vmatprep.subr.bf16.mxu0 %v275_v6 }
  0x17   :  { %261 = vmatpush3.bf16.msra.mxu0 %v275_v6 }
  0x18   :  { %262 = vmatprep.subr.bf16.mxu0 %v276_v7 }
  0x1b   :  { %263 = vmatpush3.bf16.msra.mxu0 %v276_v7 }
  0x1c   :  { %264 = vmatprep.subr.bf16.mxu0 %v277_v8 }
  0x1f   :  { %265 = vmatpush3.bf16.msra.mxu0 %v277_v8 }
  0x22   :  { %267 = vmatmul.mubr.bf16.vlgmr.msra.gmra.mxu0 %v279_v9 }
  0xe2   :  { %v268_v10 = vpop.f32.mrf.mxu0 }
  0xe3   :  { %v184_v14 = vadd.f32 %v268_v10, %v220_v11 }
  0xe4   :  { %v129_v12 = vpop.f32.mrf.mxu0 }
  0xe5   :  { %v182_v17 = vadd.f32 %v220_v11, %v129_v12 }
  0xe6   :  { %v269_v13 = vpop.f32.mrf.mxu0 }
  0xe7   :  { %v185_v15 = vadd.f32 %v269_v13, %v220_v11 }
  0xe8   :  { %v132_v16 = vpop.f32.mrf.mxu0 }
  0xe9   :  { %v237_v18 = vpack.c.bf16 %v185_v15, %v184_v14  ;;  %v183_v19 = vadd.f32 %v220_v11, %v132_v16 }
  0xeb   :  { %239 = vst [vmem:[%s342_s3 + $0x8] sm:$0xff] %v237_v18   ;;  %v232_v20 = vpack.c.bf16 %v183_v19, %v182_v17 }
  0xed   :  { %233 = vst [vmem:[%s342_s3] sm:$0xff] %v232_v20  }

// kernel: encoder_forward.66
= control target key start
LH: loop header
LB: loop body
LE: loop exit
PB: predicated region body
PF: predicated region fallthrough
CT: control target
= control target key end

     0   :  { %s674_s1 = inlined_call_operand.vmem [shape: bf16[384,128], index: 1, kind: input, shape index: {}]   ;;  %s675_s0 = inlined_call_operand.vmem [shape: bf16[32,384], index: 0, kind: input, shape index: {}]   ;;  %s676_s2 = inlined_call_operand.vmem [shape: f32[1,128], index: 2, kind: input, shape index: {}]   ;;  %s677_s3 = inlined_call_operand.vmem [shape: bf16[32,128], index: 3, kind: output, shape index: {}]  }
   0x1   :  { %v523_v0 = vld [vmem:[%s674_s1 + $0x78] sm:$0xff]   ;;  %v526_v3 = vld [vmem:[%s674_s1 + $0x70] sm:$0xff]   ;;  %v529_v6 = vld [vmem:[%s674_s1 + $0x68] sm:$0xff]  }
   0x2   :  { %v524_v1 = vld [vmem:[%s674_s1 + $0x38] sm:$0xff]   ;;  %465 = vmatprep.subr.bf16.mxu0 %v523_v0  ;;  %v527_v4 = vld [vmem:[%s674_s1 + $0x30] sm:$0xff]   ;;  %v530_v7 = vld [vmem:[%s674_s1 + $0x28] sm:$0xff]  }
   0x3   :  { %v525_v2 = vld [vmem:[%s674_s1 + $0xb8] sm:$0xff]   ;;  %466 = vmatpush3.bf16.msra.mxu0 %v524_v1  ;;  %v528_v5 = vld [vmem:[%s674_s1 + $0xb0] sm:$0xff]   ;;  %v531_v8 = vld [vmem:[%s674_s1 + $0xa8] sm:$0xff]  }
   0x4   :  { %503 = vmatprep.subr.bf16.mxu1 %v525_v2  ;;  %467 = vmatprep.subr.bf16.mxu0 %v526_v3  ;;  %v532_v9 = vld [vmem:[%s674_s1 + $0x60] sm:$0xff]   ;;  %v535_v12 = vld [vmem:[%s674_s1 + $0x58] sm:$0xff]   ;;  %v538_v15 = vld [vmem:[%s674_s1 + $0x50] sm:$0xff]  }
   0x5   :  { %504 = vmatpush3.bf16.msra.mxu1 %v525_v2  ;;  %v533_v10 = vld [vmem:[%s674_s1 + $0x20] sm:$0xff]   ;;  %v537_v13 = vld [vmem:[%s674_s1 + $0x98] sm:$0xff]   ;;  %v540_v16 = vld [vmem:[%s674_s1 + $0x90] sm:$0xff]  }
   0x6   :  { %505 = vmatprep.subr.bf16.mxu1 %v528_v5  ;;  %v534_v11 = vld [vmem:[%s674_s1 + $0xa0] sm:$0xff]   ;;  %v536_v14 = vld [vmem:[%s674_s1 + $0x18] sm:$0xff]   ;;  %v539_v17 = vld [vmem:[%s674_s1 + $0x10] sm:$0xff]  }
   0x7   :  { %468 = vmatpush3.bf16.msra.mxu0 %v527_v4  ;;  %v541_v18 = vld [vmem:[%s674_s1 + $0x48] sm:$0xff]   ;;  %v544_v21 = vld [vmem:[%s674_s1 + $0x40] sm:$0xff]  }
   0x8   :  { %469 = vmatprep.subr.bf16.mxu0 %v529_v6  ;;  %v542_v19 = vld [vmem:[%s674_s1 + $0x8] sm:$0xff]   ;;  %v546_v22 = vld [vmem:[%s674_s1 + $0x80] sm:$0xff]  }
   0x9   :  { %506 = vmatpush3.bf16.msra.mxu1 %v528_v5  ;;  %v543_v20 = vld [vmem:[%s674_s1 + $0x88] sm:$0xff]   ;;  %v549_v23 = vld [vmem:[%s675_s0 + $0x4] ss:$12 sps:$4 sm:$0xff]   ;;  %v445_v37 = vld [vmem:[%s676_s2] ss:$0 sm:$0xff] }
   0xa   :  { %507 = vmatprep.subr.bf16.mxu1 %v531_v8  ;;  %v550_v24 = vld [vmem:[%s675_s0 + $0x8] ss:$12 sps:$4 sm:$0xff]   ;;  %v545_v25 = vld [vmem:[%s674_s1] sm:$0xff]   ;;  %279 = vmatprep.mubr.bf16.mxu0 %v549_v23 }
   0xb   :  { %470 = vmatpush3.bf16.msra.mxu0 %v530_v7  ;;  %519 = vmatprep.mubr.bf16.mxu1 %v550_v24  ;;  %v547_v26 = vld [vmem:[%s675_s0] ss:$12 sps:$4 sm:$0xff]   ;;  %v552_v27 = vld [vmem:[%s675_s0 + $0x1c] ss:$12 sps:$4 sm:$0xff]   ;;  %v554_v29 = vld [vmem:[%s675_s0 + $0x18] ss:$12 sps:$4 sm:$0xff]  }
   0xc   :  { %471 = vmatprep.subr.bf16.mxu0 %v532_v9  ;;  %v551_v28 = vld [vmem:[%s675_s0 + $0x20] ss:$12 sps:$4 sm:$0xff]  }
   0xd   :  { %508 = vmatpush3.bf16.msra.mxu1 %v531_v8 }
   0xe   :  { %509 = vmatprep.subr.bf16.mxu1 %v534_v11 }
   0xf   :  { %472 = vmatpush3.bf16.msra.mxu0 %v533_v10 }
  0x10   :  { %473 = vmatprep.subr.bf16.mxu0 %v535_v12 }
  0x11   :  { %510 = vmatpush3.bf16.msra.mxu1 %v534_v11 }
  0x12   :  { %511 = vmatprep.subr.bf16.mxu1 %v537_v13 }
  0x13   :  { %474 = vmatpush3.bf16.msra.mxu0 %v536_v14 }
  0x14   :  { %475 = vmatprep.subr.bf16.mxu0 %v538_v15 }
  0x15   :  { %512 = vmatpush3.bf16.msra.mxu1 %v537_v13 }
  0x16   :  { %513 = vmatprep.subr.bf16.mxu1 %v540_v16 }
  0x17   :  { %476 = vmatpush3.bf16.msra.mxu0 %v539_v17 }
  0x18   :  { %477 = vmatprep.subr.bf16.mxu0 %v541_v18 }
  0x19   :  { %514 = vmatpush3.bf16.msra.mxu1 %v540_v16 }
  0x1a   :  { %515 = vmatprep.subr.bf16.mxu1 %v543_v20 }
  0x1b   :  { %478 = vmatpush3.bf16.msra.mxu0 %v542_v19 }
  0x1c   :  { %479 = vmatprep.subr.bf16.mxu0 %v544_v21 }
  0x1d   :  { %516 = vmatpush3.bf16.msra.mxu1 %v543_v20 }
  0x1e   :  { %517 = vmatprep.subr.bf16.mxu1 %v546_v22 }
  0x1f   :  { %480 = vmatpush3.bf16.msra.mxu0 %v545_v25 }
  0x21   :  { %518 = vmatpush3.bf16.msra.mxu1 %v546_v22 }
  0x22   :  { %280 = vmatmul.mubr.bf16.vlgmr.msra.gmra.mxu0 %v547_v26 }
  0x23   :  { %287 = vmatprep.mubr.bf16.mxu0 %v552_v27 }
  0x24   :  { %520 = vmatmul.mubr.bf16.vlgmr.msra.gmra.mxu1 %v551_v28 }
  0x2a   :  { %288 = vmatmul.mubr.bf16.gmra.mxu0 %v554_v29 }
  0xe2   :  { %v481_v30 = vpop.f32.mrf.mxu0 }
  0xe4   :  { %v482_v31 = vpop.f32.mrf.mxu0  ;;  %v521_v32 = vpop.f32.mrf.mxu1 }
  0xe5   :  { %v483_v33 = vadd.f32 %v482_v31, %v481_v30 }
  0xe6   :  { %v484_v34 = vpop.f32.mrf.mxu0  ;;  %v330_v35 = vpop.f32.mrf.mxu1 }
  0xe7   :  { %v331_v36 = vadd.f32 %v483_v33, %v330_v35 }
  0xe8   :  { %v485_v38 = vpop.f32.mrf.mxu0  ;;  %v522_v39 = vpop.f32.mrf.mxu1 }
  0xe9   :  { %v486_v40 = vadd.f32 %v485_v38, %v484_v34  ;;  %v383_v43 = vadd.f32 %v445_v37, %v331_v36 }
  0xea   :  { %v487_v41 = vpop.f32.mrf.mxu0  ;;  %v333_v42 = vpop.f32.mrf.mxu1 }
  0xeb   :  { %v334_v44 = vadd.f32 %v486_v40, %v333_v42  ;;  %v387_v49 = vmax.f32 %v383_v43, 0.0 }
  0xec   :  { %v488_v45 = vpop.f32.mrf.mxu0 }
  0xed   :  { %v384_v46 = vadd.f32 %v445_v37, %v334_v44  ;;  %v489_v47 = vadd.f32 %v488_v45, %v487_v41 }
  0xee   :  { %v490_v48 = vpop.f32.mrf.mxu0 }
  0xef   :  { %v388_v50 = vmax.f32 %v384_v46, 0.0  ;;  %v339_v51 = vadd.f32 %v521_v32, %v489_v47 }
  0xf0   :  { %v491_v52 = vpop.f32.mrf.mxu0 }
  0xf1   :  { %v457_v53 = vpack.c.bf16 %v388_v50, %v387_v49  ;;  %v492_v54 = vadd.f32 %v491_v52, %v490_v48  ;;  %v385_v55 = vadd.f32 %v445_v37, %v339_v51 }
  0xf3   :  { %458 = vst [vmem:[%s677_s3] sm:$0xff] %v457_v53   ;;  %v342_v56 = vadd.f32 %v522_v39, %v492_v54  ;;  %v389_v58 = vmax.f32 %v385_v55, 0.0 }
  0xf5   :  { %v386_v57 = vadd.f32 %v445_v37, %v342_v56 }
  0xf7   :  { %v390_v59 = vmax.f32 %v386_v57, 0.0 }
  0xf9   :  { %v462_v60 = vpack.c.bf16 %v390_v59, %v389_v58 }
  0xfb   :  { %464 = vst [vmem:[%s677_s3 + $0x8] sm:$0xff] %v462_v60  }

// kernel: encoder_forward.68
= control target key start
LH: loop header
LB: loop body
LE: loop exit
PB: predicated region body
PF: predicated region fallthrough
CT: control target
= control target key end

     0   :  { %s378_s1 = inlined_call_operand.vmem [shape: bf16[128,128], index: 1, kind: input, shape index: {}]   ;;  %s379_s0 = inlined_call_operand.vmem [shape: bf16[32,128], index: 0, kind: input, shape index: {}]   ;;  %s380_s2 = inlined_call_operand.vmem [shape: f32[1,128], index: 2, kind: input, shape index: {}]   ;;  %s381_s3 = inlined_call_operand.vmem [shape: bf16[32,128], index: 3, kind: input, shape index: {}]   ;;  %s382_s4 = inlined_call_operand.vmem [shape: bf16[32,128], index: 4, kind: output, shape index: {}]  }
   0x1   :  { %v298_v0 = vld [vmem:[%s378_s1 + $0x38] sm:$0xff]   ;;  %v299_v1 = vld [vmem:[%s378_s1 + $0x30] sm:$0xff]   ;;  %v300_v2 = vld [vmem:[%s378_s1 + $0x28] sm:$0xff]  }
   0x2   :  { %278 = vmatprep.subr.bf16.mxu0 %v298_v0  ;;  %v301_v3 = vld [vmem:[%s378_s1 + $0x20] sm:$0xff]   ;;  %v302_v5 = vld [vmem:[%s378_s1 + $0x18] sm:$0xff]   ;;  %v303_v6 = vld [vmem:[%s378_s1 + $0x10] sm:$0xff]  }
   0x3   :  { %279 = vmatpush3.bf16.msra.mxu0 %v298_v0  ;;  %v306_v4 = vld [vmem:[%s379_s0] sm:$0xff]   ;;  %v304_v7 = vld [vmem:[%s378_s1 + $0x8] sm:$0xff]  }
   0x4   :  { %280 = vmatprep.subr.bf16.mxu0 %v299_v1  ;;  %294 = vmatprep.mubr.bf16.mxu0 %v306_v4  ;;  %v305_v8 = vld [vmem:[%s378_s1] sm:$0xff]   ;;  %v307_v9 = vld [vmem:[%s379_s0 + $0x8] sm:$0xff]  }
   0x5   :  { %v239_v10 = vld [vmem:[%s380_s2] ss:$0 sm:$0xff]  ;;  %v266_v11 = vld [vmem:[%s381_s3 + $0x8] sm:$0xff]  }
   0x6   :  { %v249_v13 = vld [vmem:[%s381_s3] sm:$0xff]   ;;  %v254_v15 = vunpack.c.l.bf16 %v266_v11  ;;  %v255_v19 = vunpack.c.h.bf16 %v266_v11 }
   0x7   :  { %281 = vmatpush3.bf16.msra.mxu0 %v299_v1  ;;  %v250_v18 = vunpack.c.l.bf16 %v249_v13  ;;  %v251_v23 = vunpack.c.h.bf16 %v249_v13 }
   0x8   :  { %282 = vmatprep.subr.bf16.mxu0 %v300_v2 }
   0xb   :  { %283 = vmatpush3.bf16.msra.mxu0 %v300_v2 }
   0xc   :  { %284 = vmatprep.subr.bf16.mxu0 %v301_v3 }
   0xf   :  { %285 = vmatpush3.bf16.msra.mxu0 %v301_v3 }
  0x10   :  { %286 = vmatprep.subr.bf16.mxu0 %v302_v5 }
  0x13   :  { %287 = vmatpush3.bf16.msra.mxu0 %v302_v5 }
  0x14   :  { %288 = vmatprep.subr.bf16.mxu0 %v303_v6 }
  0x17   :  { %289 = vmatpush3.bf16.msra.mxu0 %v303_v6 }
  0x18   :  { %290 = vmatprep.subr.bf16.mxu0 %v304_v7 }
  0x1b   :  { %291 = vmatpush3.bf16.msra.mxu0 %v304_v7 }
  0x1c   :  { %292 = vmatprep.subr.bf16.mxu0 %v305_v8 }
  0x1f   :  { %293 = vmatpush3.bf16.msra.mxu0 %v305_v8 }
  0x22   :  { %295 = vmatmul.mubr.bf16.vlgmr.msra.gmra.mxu0 %v307_v9 }
  0xe2   :  { %v296_v12 = vpop.f32.mrf.mxu0 }
  0xe3   :  { %v187_v14 = vadd.f32 %v296_v12, %v239_v10 }
  0xe4   :  { %v132_v16 = vpop.f32.mrf.mxu0 }
  0xe5   :  { %v185_v17 = vadd.f32 %v239_v10, %v132_v16  ;;  %v199_v21 = vadd.f32 %v254_v15, %v187_v14 }
  0xe6   :  { %v297_v20 = vpop.f32.mrf.mxu0 }
  0xe7   :  { %v188_v22 = vadd.f32 %v297_v20, %v239_v10  ;;  %v197_v25 = vadd.f32 %v250_v18, %v185_v17  ;;  %v203_v28 = vmax.f32 %v199_v21, 0.0 }
  0xe8   :  { %v135_v24 = vpop.f32.mrf.mxu0 }
  0xe9   :  { %v200_v26 = vadd.f32 %v255_v19, %v188_v22  ;;  %v186_v27 = vadd.f32 %v239_v10, %v135_v24  ;;  %v201_v31 = vmax.f32 %v197_v25, 0.0 }
  0xeb   :  { %v204_v29 = vmax.f32 %v200_v26, 0.0  ;;  %v198_v30 = vadd.f32 %v251_v23, %v186_v27 }
  0xed   :  { %v264_v32 = vpack.c.bf16 %v204_v29, %v203_v28  ;;  %v202_v33 = vmax.f32 %v198_v30, 0.0 }
  0xef   :  { %267 = vst [vmem:[%s382_s4 + $0x8] sm:$0xff] %v264_v32   ;;  %v259_v34 = vpack.c.bf16 %v202_v33, %v201_v31 }
  0xf1   :  { %260 = vst [vmem:[%s382_s4] sm:$0xff] %v259_v34  }

// kernel: encoder_forward.69
= control target key start
LH: loop header
LB: loop body
LE: loop exit
PB: predicated region body
PF: predicated region fallthrough
CT: control target
= control target key end

     0   :  { %s343_s1 = inlined_call_operand.vmem [shape: bf16[128,128], index: 1, kind: input, shape index: {}]   ;;  %s344_s0 = inlined_call_operand.vmem [shape: bf16[32,128], index: 0, kind: input, shape index: {}]   ;;  %s345_s2 = inlined_call_operand.vmem [shape: f32[1,128], index: 2, kind: input, shape index: {}]   ;;  %s346_s3 = inlined_call_operand.vmem [shape: bf16[32,128], index: 3, kind: output, shape index: {}]  }
   0x1   :  { %v274_v0 = vld [vmem:[%s343_s1 + $0x38] sm:$0xff]   ;;  %v275_v1 = vld [vmem:[%s343_s1 + $0x30] sm:$0xff]   ;;  %v276_v2 = vld [vmem:[%s343_s1 + $0x28] sm:$0xff]  }
   0x2   :  { %254 = vmatprep.subr.bf16.mxu0 %v274_v0  ;;  %v277_v3 = vld [vmem:[%s343_s1 + $0x20] sm:$0xff]   ;;  %v278_v5 = vld [vmem:[%s343_s1 + $0x18] sm:$0xff]   ;;  %v279_v6 = vld [vmem:[%s343_s1 + $0x10] sm:$0xff]  }
   0x3   :  { %255 = vmatpush3.bf16.msra.mxu0 %v274_v0  ;;  %v282_v4 = vld [vmem:[%s344_s0] sm:$0xff]   ;;  %v280_v7 = vld [vmem:[%s343_s1 + $0x8] sm:$0xff]  }
   0x4   :  { %256 = vmatprep.subr.bf16.mxu0 %v275_v1  ;;  %270 = vmatprep.mubr.bf16.mxu0 %v282_v4  ;;  %v281_v8 = vld [vmem:[%s343_s1] sm:$0xff]   ;;  %v283_v9 = vld [vmem:[%s344_s0 + $0x8] sm:$0xff]  }
   0x5   :  { %v224_v11 = vld [vmem:[%s345_s2] ss:$0 sm:$0xff] }
   0x7   :  { %257 = vmatpush3.bf16.msra.mxu0 %v275_v1 }
   0x8   :  { %258 = vmatprep.subr.bf16.mxu0 %v276_v2 }
   0xb   :  { %259 = vmatpush3.bf16.msra.mxu0 %v276_v2 }
   0xc   :  { %260 = vmatprep.subr.bf16.mxu0 %v277_v3 }
   0xf   :  { %261 = vmatpush3.bf16.msra.mxu0 %v277_v3 }
  0x10   :  { %262 = vmatprep.subr.bf16.mxu0 %v278_v5 }
  0x13   :  { %263 = vmatpush3.bf16.msra.mxu0 %v278_v5 }
  0x14   :  { %264 = vmatprep.subr.bf16.mxu0 %v279_v6 }
  0x17   :  { %265 = vmatpush3.bf16.msra.mxu0 %v279_v6 }
  0x18   :  { %266 = vmatprep.subr.bf16.mxu0 %v280_v7 }
  0x1b   :  { %267 = vmatpush3.bf16.msra.mxu0 %v280_v7 }
  0x1c   :  { %268 = vmatprep.subr.bf16.mxu0 %v281_v8 }
  0x1f   :  { %269 = vmatpush3.bf16.msra.mxu0 %v281_v8 }
  0x22   :  { %271 = vmatmul.mubr.bf16.vlgmr.msra.gmra.mxu0 %v283_v9 }
  0xe2   :  { %v272_v10 = vpop.f32.mrf.mxu0 }
  0xe3   :  { %v184_v13 = vadd.f32 %v272_v10, %v224_v11 }
  0xe4   :  { %v129_v12 = vpop.f32.mrf.mxu0 }
  0xe5   :  { %v182_v15 = vadd.f32 %v224_v11, %v129_v12  ;;  %v188_v18 = vmax.f32 %v184_v13, 0.0 }
  0xe6   :  { %v273_v14 = vpop.f32.mrf.mxu0 }
  0xe7   :  { %v185_v16 = vadd.f32 %v273_v14, %v224_v11  ;;  %v186_v21 = vmax.f32 %v182_v15, 0.0 }
  0xe8   :  { %v132_v17 = vpop.f32.mrf.mxu0 }
  0xe9   :  { %v189_v19 = vmax.f32 %v185_v16, 0.0  ;;  %v183_v20 = vadd.f32 %v224_v11, %v132_v17 }
  0xeb   :  { %v241_v22 = vpack.c.bf16 %v189_v19, %v188_v18  ;;  %v187_v23 = vmax.f32 %v183_v20, 0.0 }
  0xed   :  { %243 = vst [vmem:[%s346_s3 + $0x8] sm:$0xff] %v241_v22   ;;  %v236_v24 = vpack.c.bf16 %v187_v23, %v186_v21 }
  0xef   :  { %237 = vst [vmem:[%s346_s3] sm:$0xff] %v236_v24  }

// kernel: encoder_forward.80
= control target key start
LH: loop header
LB: loop body
LE: loop exit
PB: predicated region body
PF: predicated region fallthrough
CT: control target
= control target key end

     0   :  { %v244_v1 = vmov 0   ;;  %v176_v18 = vlaneseq  ;;  %s322_s1 = inlined_call_operand.vmem [shape: bf16[128,256], index: 1, kind: input, shape index: {}]   ;;  %s323_s0 = inlined_call_operand.vmem [shape: bf16[8,128], index: 0, kind: input, shape index: {}]   ;;  %s324_s2 = inlined_call_operand.vmem [shape: f32[1,256], index: 2, kind: input, shape index: {}]   ;;  %s325_s3 = inlined_call_operand.vmem [shape: bf16[8,256], index: 3, kind: output, shape index: {}]  }
   0x1   :  { %v220_v0 = vld [vmem:[%s322_s1 + $0x74] ss:$8 sps:$4 sm:$0xff]   ;;  %144 = vmatprep.mubr.bf16.mxu0 %v244_v1  ;;  %v222_v2 = vld [vmem:[%s322_s1 + $0x70] ss:$8 sps:$4 sm:$0xff]   ;;  %v223_v3 = vld [vmem:[%s322_s1 + $0x64] ss:$8 sps:$4 sm:$0xff]  }
   0x2   :  { %112 = vmatprep.subr.bf16.mxu0 %v220_v0  ;;  %v225_v4 = vld [vmem:[%s322_s1 + $0x60] ss:$8 sps:$4 sm:$0xff]   ;;  %v226_v5 = vld [vmem:[%s322_s1 + $0x54] ss:$8 sps:$4 sm:$0xff]   ;;  %v228_v6 = vld [vmem:[%s322_s1 + $0x50] ss:$8 sps:$4 sm:$0xff]  }
   0x3   :  { %113 = vmatpush1.bf16.msra.mxu0 %v222_v2  ;;  %v229_v7 = vld [vmem:[%s322_s1 + $0x44] ss:$8 sps:$4 sm:$0xff]   ;;  %v231_v8 = vld [vmem:[%s322_s1 + $0x40] ss:$8 sps:$4 sm:$0xff]   ;;  %v232_v9 = vld [vmem:[%s322_s1 + $0x34] ss:$8 sps:$4 sm:$0xff]  }
   0x4   :  { %114 = vmatprep.subr.bf16.mxu0 %v223_v3  ;;  %v234_v10 = vld [vmem:[%s322_s1 + $0x30] ss:$8 sps:$4 sm:$0xff]   ;;  %v235_v11 = vld [vmem:[%s322_s1 + $0x24] ss:$8 sps:$4 sm:$0xff]   ;;  %v237_v12 = vld [vmem:[%s322_s1 + $0x20] ss:$8 sps:$4 sm:$0xff]  }
   0x5   :  { %v238_v13 = vld [vmem:[%s322_s1 + $0x14] ss:$8 sps:$4 sm:$0xff]   ;;  %v240_v14 = vld [vmem:[%s322_s1 + $0x10] ss:$8 sps:$4 sm:$0xff]   ;;  %v241_v15 = vld [vmem:[%s322_s1 + $0x4] ss:$8 sps:$4 sm:$0xff]  }
   0x6   :  { %v243_v16 = vld [vmem:[%s322_s1] ss:$8 sps:$4 sm:$0xff]   ;;  %v177_v19 = vshrl.u32 %v176_v18, 7 }
   0x7   :  { %115 = vmatpush1.bf16.msra.mxu0 %v225_v4  ;;  %v15_v17 = vld [vmem:[%s323_s0] sm:$0xf] }
   0x8   :  { %116 = vmatprep.subr.bf16.mxu0 %v226_v5  ;;  %v178_v20 = vsub.s32 0, %v177_v19  ;;  %v182_v21 = vsub.s32 1, %v177_v19  ;;  %v174_v22 = vld [vmem:[%s324_s2] sm:$0x3] }
   0xa   :  { %v179_v23 = vrot.slane %v174_v22, %v178_v20  ;;  %v183_v24 = vrot.slane %v174_v22, %v182_v21 }
   0xb   :  { %117 = vmatpush1.bf16.msra.mxu0 %v228_v6 }
   0xc   :  { %118 = vmatprep.subr.bf16.mxu0 %v229_v7 }
   0xf   :  { %119 = vmatpush1.bf16.msra.mxu0 %v231_v8 }
  0x10   :  { %120 = vmatprep.subr.bf16.mxu0 %v232_v9 }
  0x13   :  { %121 = vmatpush1.bf16.msra.mxu0 %v234_v10 }
  0x14   :  { %122 = vmatprep.subr.bf16.mxu0 %v235_v11 }
  0x17   :  { %123 = vmatpush1.bf16.msra.mxu0 %v237_v12 }
  0x18   :  { %124 = vmatprep.subr.bf16.mxu0 %v238_v13 }
  0x1b   :  { %125 = vmatpush1.bf16.msra.mxu0 %v240_v14 }
  0x1c   :  { %126 = vmatprep.subr.bf16.mxu0 %v241_v15 }
  0x1f   :  { %127 = vmatpush1.bf16.msra.mxu0 %v243_v16 }
  0x22   :  { %145 = vmatmul.mubr.bf16.vlgmr.msra.gmra.mxu0 %v15_v17 }
  0xe2   :  { %v146_v25 = vpop.f32.mrf.mxu0 }
  0xe3   :  { %v186_v27 = vadd.f32 %v179_v23, %v146_v25 }
  0xe4   :  { %v148_v26 = vpop.f32.mrf.mxu0 }
  0xe5   :  { %v187_v28 = vadd.f32 %v183_v24, %v148_v26 }
  0xe6   :  { %v150_v29 = vpop.f32.mrf.mxu0 }
  0xe7   :  { %v218_v30 = vpack.c.bf16 %v187_v28, %v186_v27 }
  0xe8   :  { %v151_v31 = vpop.f32.mrf.mxu0 }
  0xe9   :  { %196 = vst [vmem:[%s325_s3] sm:$0xff] %v218_v30 }

// kernel: encoder_forward.79
= control target key start
LH: loop header
LB: loop body
LE: loop exit
PB: predicated region body
PF: predicated region fallthrough
CT: control target
= control target key end

     0   :  { %v673_v36 = vmov 0.0   ;;  %vm674_vm0 = vmmov 0   ;;  %s830_s1 = inlined_call_operand.vmem [shape: bf16[640,128], index: 1, kind: input, shape index: {}]   ;;  %s831_s0 = inlined_call_operand.vmem [shape: bf16[8,640], index: 0, kind: input, shape index: {}]   ;;  %s832_s2 = inlined_call_operand.vmem [shape: f32[1,128], index: 2, kind: input, shape index: {}]   ;;  %s833_s3 = inlined_call_operand.vmem [shape: bf16[8,128], index: 3, kind: output, shape index: {}]  }
   0x1   :  { %v628_v0 = vld [vmem:[%s830_s1 + $0x78] sm:$0xff]   ;;  %v632_v4 = vld [vmem:[%s830_s1 + $0x70] sm:$0xff]   ;;  %v636_v8 = vld [vmem:[%s830_s1 + $0x68] sm:$0xff]  }
   0x2   :  { %v629_v1 = vld [vmem:[%s830_s1 + $0xf8] sm:$0xff]   ;;  %553 = vmatprep.subr.bf16.mxu0 %v628_v0  ;;  %v633_v5 = vld [vmem:[%s830_s1 + $0xf0] sm:$0xff]   ;;  %v637_v9 = vld [vmem:[%s830_s1 + $0xe8] sm:$0xff]  }
   0x3   :  { %v630_v2 = vld [vmem:[%s830_s1 + $0x38] sm:$0xff]   ;;  %575 = vmatprep.subr.bf16.mxu1 %v629_v1  ;;  %v634_v6 = vld [vmem:[%s830_s1 + $0x30] sm:$0xff]   ;;  %v638_v10 = vld [vmem:[%s830_s1 + $0x28] sm:$0xff]  }
   0x4   :  { %v631_v3 = vld [vmem:[%s830_s1 + $0xb8] sm:$0xff]   ;;  %554 = vmatpush3.bf16.msra.mxu0 %v630_v2  ;;  %v635_v7 = vld [vmem:[%s830_s1 + $0xb0] sm:$0xff]   ;;  %v639_v11 = vld [vmem:[%s830_s1 + $0xa8] sm:$0xff]  }
   0x5   :  { %576 = vmatpush3.bf16.msra.mxu1 %v631_v3  ;;  %555 = vmatprep.subr.bf16.mxu0 %v632_v4  ;;  %v640_v12 = vld [vmem:[%s830_s1 + $0x60] sm:$0xff]   ;;  %v644_v16 = vld [vmem:[%s830_s1 + $0x58] sm:$0xff]   ;;  %v648_v20 = vld [vmem:[%s830_s1 + $0x50] sm:$0xff]  }
   0x6   :  { %577 = vmatprep.subr.bf16.mxu1 %v633_v5  ;;  %v641_v13 = vld [vmem:[%s830_s1 + $0xe0] sm:$0xff]   ;;  %v645_v17 = vld [vmem:[%s830_s1 + $0xd8] sm:$0xff]   ;;  %v649_v21 = vld [vmem:[%s830_s1 + $0xd0] sm:$0xff]  }
   0x7   :  { %v642_v14 = vld [vmem:[%s830_s1 + $0x20] sm:$0xff]   ;;  %v646_v18 = vld [vmem:[%s830_s1 + $0x18] sm:$0xff]   ;;  %v650_v22 = vld [vmem:[%s830_s1 + $0x10] sm:$0xff]  }
   0x8   :  { %556 = vmatpush3.bf16.msra.mxu0 %v634_v6  ;;  %v643_v15 = vld [vmem:[%s830_s1 + $0xa0] sm:$0xff]   ;;  %v647_v19 = vld [vmem:[%s830_s1 + $0x98] sm:$0xff]   ;;  %v651_v23 = vld [vmem:[%s830_s1 + $0x90] sm:$0xff]  }
   0x9   :  { %578 = vmatpush3.bf16.msra.mxu1 %v635_v7  ;;  %557 = vmatprep.subr.bf16.mxu0 %v636_v8  ;;  %v652_v24 = vld [vmem:[%s830_s1 + $0x48] sm:$0xff]   ;;  %v656_v28 = vld [vmem:[%s830_s1 + $0x40] sm:$0xff]   ;;  %v665_v39 = vld [vmem:[%s830_s1 + $0x138] sm:$0xff]  }
   0xa   :  { %579 = vmatprep.subr.bf16.mxu1 %v637_v9  ;;  %v653_v25 = vld [vmem:[%s830_s1 + $0xc8] sm:$0xff]   ;;  %v657_v29 = vld [vmem:[%s830_s1 + $0xc0] sm:$0xff]   ;;  %v666_v40 = vld [vmem:[%s830_s1 + $0x130] sm:$0xff]  }
   0xb   :  { %v654_v26 = vld [vmem:[%s830_s1 + $0x8] sm:$0xff]   ;;  %v658_v30 = vld [vmem:[%s830_s1] sm:$0xff]   ;;  %v669_v43 = vld [vmem:[%s830_s1 + $0x118] sm:$0xff]  }
   0xc   :  { %558 = vmatpush3.bf16.msra.mxu0 %v638_v10  ;;  %v655_v27 = vld [vmem:[%s830_s1 + $0x88] sm:$0xff]   ;;  %v659_v31 = vld [vmem:[%s830_s1 + $0x80] sm:$0xff]   ;;  %v670_v44 = vld [vmem:[%s830_s1 + $0x110] sm:$0xff]  }
   0xd   :  { %580 = vmatpush3.bf16.msra.mxu1 %v639_v11  ;;  %559 = vmatprep.subr.bf16.mxu0 %v640_v12  ;;  %v15_v32 = vld [vmem:[%s831_s0] sm:$0xff]  ;;  %v16_v35 = vld [vmem:[%s831_s0 + $0x8] sm:$0xff]  ;;  %v662_v47 = vld [vmem:[%s831_s0 + $0x10] ss:$0 sps:$4 sm:$0xff]  }
   0xe   :  { %581 = vmatprep.subr.bf16.mxu1 %v641_v13  ;;  %v507_v33 = vcombine.low %v15_v32, %v15_v32  ;;  %v508_v34 = vcombine.high %v15_v32, %v15_v32  ;;  %v509_v37 = vcombine.low %v16_v35, %v16_v35  ;;  %v510_v38 = vcombine.high %v16_v35, %v16_v35  ;;  %v667_v41 = vld [vmem:[%s830_s1 + $0x128] sm:$0xff]   ;;  %v668_v42 = vld [vmem:[%s830_s1 + $0x120] sm:$0xff]  }
   0xf   :  { %v671_v45 = vld [vmem:[%s830_s1 + $0x108] sm:$0xff]   ;;  %v672_v46 = vld [vmem:[%s830_s1 + $0x100] sm:$0xff]  }
  0x10   :  { %560 = vmatpush3.bf16.msra.mxu0 %v642_v14  ;;  %388 = vmatprep.mubr.bf16.mxu0 %v508_v34  ;;  %v552_v60 = vld [vmem:[%s832_s2] ss:$0 sm:$0xff] }
  0x11   :  { %582 = vmatpush3.bf16.msra.mxu1 %v643_v15  ;;  %561 = vmatprep.subr.bf16.mxu0 %v644_v16 }
  0x12   :  { %583 = vmatprep.subr.bf16.mxu1 %v645_v17  ;;  %428 = vmatprep.mubr.bf16.mxu1 %v510_v38 }
  0x14   :  { %562 = vmatpush3.bf16.msra.mxu0 %v646_v18 }
  0x15   :  { %584 = vmatpush3.bf16.msra.mxu1 %v647_v19  ;;  %563 = vmatprep.subr.bf16.mxu0 %v648_v20 }
  0x16   :  { %585 = vmatprep.subr.bf16.mxu1 %v649_v21 }
  0x18   :  { %564 = vmatpush3.bf16.msra.mxu0 %v650_v22 }
  0x19   :  { %586 = vmatpush3.bf16.msra.mxu1 %v651_v23  ;;  %565 = vmatprep.subr.bf16.mxu0 %v652_v24 }
  0x1a   :  { %587 = vmatprep.subr.bf16.mxu1 %v653_v25 }
  0x1c   :  { %566 = vmatpush3.bf16.msra.mxu0 %v654_v26 }
  0x1d   :  { %588 = vmatpush3.bf16.msra.mxu1 %v655_v27  ;;  %567 = vmatprep.subr.bf16.mxu0 %v656_v28 }
  0x1e   :  { %589 = vmatprep.subr.bf16.mxu1 %v657_v29 }
  0x20   :  { %568 = vmatpush3.bf16.msra.mxu0 %v658_v30 }
  0x21   :  { %590 = vmatpush3.bf16.msra.mxu1 %v659_v31  ;;  %606 = vmatprep.subr.bf16.mxu0 %v673_v36 }
  0x23   :  { %389 = vmatmul.mubr.bf16.vlgmr.msra.gmra.mxu0 %v507_v33 }
  0x24   :  { %429 = vmatmul.mubr.bf16.vlgmr.msra.gmra.mxu1 %v509_v37  ;;  %607 = vmatpush3.bf16.msra.mxu0 %v665_v39 }
  0x25   :  { %608 = vmatprep.subr.bf16.mxu0 %v673_v36  ;;  %622 = vmatprep.mubr.msk.bf16.mxu0 %vm674_vm0, %v673_v36 }
  0x28   :  { %609 = vmatpush3.bf16.msra.mxu0 %v666_v40 }
  0x29   :  { %610 = vmatprep.subr.bf16.mxu0 %v673_v36 }
  0x2c   :  { %611 = vmatpush3.bf16.msra.mxu0 %v667_v41 }
  0x2d   :  { %612 = vmatprep.subr.bf16.mxu0 %v673_v36 }
  0x30   :  { %613 = vmatpush3.bf16.msra.mxu0 %v668_v42 }
  0x31   :  { %614 = vmatprep.subr.bf16.mxu0 %v673_v36 }
  0x34   :  { %615 = vmatpush3.bf16.msra.mxu0 %v669_v43 }
  0x35   :  { %616 = vmatprep.subr.bf16.mxu0 %v673_v36 }
  0x38   :  { %617 = vmatpush3.bf16.msra.mxu0 %v670_v44 }
  0x39   :  { %618 = vmatprep.subr.bf16.mxu0 %v673_v36 }
  0x3c   :  { %619 = vmatpush3.bf16.msra.mxu0 %v671_v45 }
  0x3d   :  { %620 = vmatprep.subr.bf16.mxu0 %v673_v36 }
  0x40   :  { %621 = vmatpush3.bf16.msra.mxu0 %v672_v46 }
  0x43   :  { %623 = vmatmul.mubr.bf16.vlgmr.msra.gmra.mxu0 %v662_v47 }
  0xe3   :  { %v569_v48 = vpop.f32.mrf.mxu0 }
  0xe4   :  { %v591_v49 = vpop.f32.mrf.mxu1 }
  0xe5   :  { %v570_v50 = vpop.f32.mrf.mxu0 }
  0xe6   :  { %v592_v51 = vpop.f32.mrf.mxu1  ;;  %v571_v56 = vadd.f32 %v570_v50, %v569_v48 }
  0xe7   :  { %v572_v52 = vpop.f32.mrf.mxu0  ;;  %v593_v57 = vadd.f32 %v592_v51, %v591_v49 }
  0xe8   :  { %v594_v53 = vpop.f32.mrf.mxu1 }
  0xe9   :  { %v573_v54 = vpop.f32.mrf.mxu0  ;;  %v431_v58 = vadd.f32 %v593_v57, %v571_v56 }
  0xea   :  { %v595_v55 = vpop.f32.mrf.mxu1 }
 0x103   :  { %v470_v59 = vpop.f32.mrf.mxu0 }
 0x104   :  { %v471_v61 = vadd.f32 %v470_v59, %v431_v58 }
 0x105   :  { %v624_v62 = vpop.f32.mrf.mxu0 }
 0x106   :  { %v499_v63 = vadd.f32 %v552_v60, %v471_v61 }
 0x107   :  { %v473_v0 = vpop.f32.mrf.mxu0 }
 0x108   :  { %v500_v1 = vmax.f32 %v499_v63, 0.0 }
 0x109   :  { %v625_v2 = vpop.f32.mrf.mxu0 }
 0x10a   :  { %v501_v3 = vpack.c.bf16 %v500_v1, %v500_v1 }
 0x10c   :  { %502 = vst [vmem:[%s833_s3] sm:$0xf] %v501_v3 }

// kernel: encoder_forward.81
= control target key start
LH: loop header
LB: loop body
LE: loop exit
PB: predicated region body
PF: predicated region fallthrough
CT: control target
= control target key end

     0   :  { %v254_v1 = vmov 0   ;;  %v179_v18 = vlaneseq  ;;  %s340_s1 = inlined_call_operand.vmem [shape: bf16[128,256], index: 1, kind: input, shape index: {}]   ;;  %s341_s0 = inlined_call_operand.vmem [shape: bf16[8,128], index: 0, kind: input, shape index: {}]   ;;  %s342_s2 = inlined_call_operand.vmem [shape: f32[1,256], index: 2, kind: input, shape index: {}]   ;;  %s343_s3 = inlined_call_operand.vmem [shape: bf16[8,256], index: 3, kind: input, shape index: {}]   ;;  %s344_s4 = inlined_call_operand.vmem [shape: bf16[8,256], index: 4, kind: output, shape index: {}]  }
   0x1   :  { %v230_v0 = vld [vmem:[%s340_s1 + $0x74] ss:$8 sps:$4 sm:$0xff]   ;;  %147 = vmatprep.mubr.bf16.mxu0 %v254_v1  ;;  %v232_v2 = vld [vmem:[%s340_s1 + $0x70] ss:$8 sps:$4 sm:$0xff]   ;;  %v233_v3 = vld [vmem:[%s340_s1 + $0x64] ss:$8 sps:$4 sm:$0xff]  }
   0x2   :  { %115 = vmatprep.subr.bf16.mxu0 %v230_v0  ;;  %v235_v4 = vld [vmem:[%s340_s1 + $0x60] ss:$8 sps:$4 sm:$0xff]   ;;  %v236_v5 = vld [vmem:[%s340_s1 + $0x54] ss:$8 sps:$4 sm:$0xff]   ;;  %v238_v6 = vld [vmem:[%s340_s1 + $0x50] ss:$8 sps:$4 sm:$0xff]  }
   0x3   :  { %116 = vmatpush1.bf16.msra.mxu0 %v232_v2  ;;  %v239_v7 = vld [vmem:[%s340_s1 + $0x44] ss:$8 sps:$4 sm:$0xff]   ;;  %v241_v8 = vld [vmem:[%s340_s1 + $0x40] ss:$8 sps:$4 sm:$0xff]   ;;  %v242_v9 = vld [vmem:[%s340_s1 + $0x34] ss:$8 sps:$4 sm:$0xff]  }
   0x4   :  { %117 = vmatprep.subr.bf16.mxu0 %v233_v3  ;;  %v244_v10 = vld [vmem:[%s340_s1 + $0x30] ss:$8 sps:$4 sm:$0xff]   ;;  %v245_v11 = vld [vmem:[%s340_s1 + $0x24] ss:$8 sps:$4 sm:$0xff]   ;;  %v247_v12 = vld [vmem:[%s340_s1 + $0x20] ss:$8 sps:$4 sm:$0xff]  }
   0x5   :  { %v248_v13 = vld [vmem:[%s340_s1 + $0x14] ss:$8 sps:$4 sm:$0xff]   ;;  %v250_v14 = vld [vmem:[%s340_s1 + $0x10] ss:$8 sps:$4 sm:$0xff]   ;;  %v251_v15 = vld [vmem:[%s340_s1 + $0x4] ss:$8 sps:$4 sm:$0xff]  }
   0x6   :  { %v253_v16 = vld [vmem:[%s340_s1] ss:$8 sps:$4 sm:$0xff]   ;;  %v180_v19 = vshrl.u32 %v179_v18, 7 }
   0x7   :  { %118 = vmatpush1.bf16.msra.mxu0 %v235_v4  ;;  %v18_v17 = vld [vmem:[%s341_s0] sm:$0xf] }
   0x8   :  { %119 = vmatprep.subr.bf16.mxu0 %v236_v5  ;;  %v181_v20 = vsub.s32 0, %v180_v19  ;;  %v177_v21 = vld [vmem:[%s342_s2] sm:$0x3]  ;;  %v185_v22 = vsub.s32 1, %v180_v19 }
   0x9   :  { %v191_v23 = vld [vmem:[%s343_s3] sm:$0xff] }
   0xa   :  { %v182_v24 = vrot.slane %v177_v21, %v181_v20  ;;  %v192_v25 = vunpack.c.l.bf16 %v191_v23  ;;  %v186_v26 = vrot.slane %v177_v21, %v185_v22  ;;  %v193_v29 = vunpack.c.h.bf16 %v191_v23 }
   0xb   :  { %120 = vmatpush1.bf16.msra.mxu0 %v238_v6 }
   0xc   :  { %121 = vmatprep.subr.bf16.mxu0 %v239_v7 }
   0xf   :  { %122 = vmatpush1.bf16.msra.mxu0 %v241_v8 }
  0x10   :  { %123 = vmatprep.subr.bf16.mxu0 %v242_v9 }
  0x13   :  { %124 = vmatpush1.bf16.msra.mxu0 %v244_v10 }
  0x14   :  { %125 = vmatprep.subr.bf16.mxu0 %v245_v11 }
  0x17   :  { %126 = vmatpush1.bf16.msra.mxu0 %v247_v12 }
  0x18   :  { %127 = vmatprep.subr.bf16.mxu0 %v248_v13 }
  0x1b   :  { %128 = vmatpush1.bf16.msra.mxu0 %v250_v14 }
  0x1c   :  { %129 = vmatprep.subr.bf16.mxu0 %v251_v15 }
  0x1f   :  { %130 = vmatpush1.bf16.msra.mxu0 %v253_v16 }
  0x22   :  { %148 = vmatmul.mubr.bf16.vlgmr.msra.gmra.mxu0 %v18_v17 }
  0xe2   :  { %v149_v27 = vpop.f32.mrf.mxu0 }
  0xe3   :  { %v189_v28 = vadd.f32 %v182_v24, %v149_v27 }
  0xe4   :  { %v151_v30 = vpop.f32.mrf.mxu0 }
  0xe5   :  { %v194_v31 = vadd.f32 %v192_v25, %v189_v28  ;;  %v190_v32 = vadd.f32 %v186_v26, %v151_v30 }
  0xe6   :  { %v153_v33 = vpop.f32.mrf.mxu0 }
  0xe7   :  { %v195_v34 = vadd.f32 %v193_v29, %v190_v32  ;;  %v196_v36 = vmax.f32 %v194_v31, 0.0 }
  0xe8   :  { %v154_v35 = vpop.f32.mrf.mxu0 }
  0xe9   :  { %v197_v37 = vmax.f32 %v195_v34, 0.0 }
  0xeb   :  { %v228_v38 = vpack.c.bf16 %v197_v37, %v196_v36 }
  0xed   :  { %206 = vst [vmem:[%s344_s4] sm:$0xff] %v228_v38 }

// kernel: encoder_forward.82
= control target key start
LH: loop header
LB: loop body
LE: loop exit
PB: predicated region body
PF: predicated region fallthrough
CT: control target
= control target key end

     0   :  { %s358_s1 = inlined_call_operand.vmem [shape: bf16[256,128], index: 1, kind: input, shape index: {}]   ;;  %s359_s0 = inlined_call_operand.vmem [shape: bf16[8,256], index: 0, kind: input, shape index: {}]   ;;  %s360_s2 = inlined_call_operand.vmem [shape: f32[1,128], index: 2, kind: input, shape index: {}]   ;;  %s361_s3 = inlined_call_operand.vmem [shape: bf16[8,128], index: 3, kind: output, shape index: {}]  }
   0x1   :  { %v263_v0 = vld [vmem:[%s358_s1 + $0x78] sm:$0xff]   ;;  %v265_v2 = vld [vmem:[%s358_s1 + $0x70] sm:$0xff]   ;;  %v267_v4 = vld [vmem:[%s358_s1 + $0x68] sm:$0xff]  }
   0x2   :  { %v264_v1 = vld [vmem:[%s358_s1 + $0x38] sm:$0xff]   ;;  %241 = vmatprep.subr.bf16.mxu0 %v263_v0  ;;  %v266_v3 = vld [vmem:[%s358_s1 + $0x30] sm:$0xff]   ;;  %v268_v5 = vld [vmem:[%s358_s1 + $0x28] sm:$0xff]  }
   0x3   :  { %242 = vmatpush3.bf16.msra.mxu0 %v264_v1  ;;  %v269_v6 = vld [vmem:[%s358_s1 + $0x60] sm:$0xff]   ;;  %v271_v8 = vld [vmem:[%s358_s1 + $0x58] sm:$0xff]   ;;  %v273_v10 = vld [vmem:[%s358_s1 + $0x50] sm:$0xff]  }
   0x4   :  { %243 = vmatprep.subr.bf16.mxu0 %v265_v2  ;;  %v270_v7 = vld [vmem:[%s358_s1 + $0x20] sm:$0xff]   ;;  %v272_v9 = vld [vmem:[%s358_s1 + $0x18] sm:$0xff]   ;;  %v274_v13 = vld [vmem:[%s358_s1 + $0x10] sm:$0xff]  }
   0x5   :  { %v15_v11 = vld [vmem:[%s359_s0] sm:$0xff]  ;;  %v275_v14 = vld [vmem:[%s358_s1 + $0x48] sm:$0xff]  }
   0x6   :  { %v223_v12 = vcombine.high %v15_v11, %v15_v11  ;;  %v276_v15 = vld [vmem:[%s358_s1 + $0x8] sm:$0xff]   ;;  %v277_v16 = vld [vmem:[%s358_s1 + $0x40] sm:$0xff]   ;;  %v222_v18 = vcombine.low %v15_v11, %v15_v11 }
   0x7   :  { %244 = vmatpush3.bf16.msra.mxu0 %v266_v3  ;;  %v278_v17 = vld [vmem:[%s358_s1] sm:$0xff]  }
   0x8   :  { %245 = vmatprep.subr.bf16.mxu0 %v267_v4  ;;  %183 = vmatprep.mubr.bf16.mxu0 %v223_v12  ;;  %v240_v21 = vld [vmem:[%s360_s2] ss:$0 sm:$0xff] }
   0xb   :  { %246 = vmatpush3.bf16.msra.mxu0 %v268_v5 }
   0xc   :  { %247 = vmatprep.subr.bf16.mxu0 %v269_v6 }
   0xf   :  { %248 = vmatpush3.bf16.msra.mxu0 %v270_v7 }
  0x10   :  { %249 = vmatprep.subr.bf16.mxu0 %v271_v8 }
  0x13   :  { %250 = vmatpush3.bf16.msra.mxu0 %v272_v9 }
  0x14   :  { %251 = vmatprep.subr.bf16.mxu0 %v273_v10 }
  0x17   :  { %252 = vmatpush3.bf16.msra.mxu0 %v274_v13 }
  0x18   :  { %253 = vmatprep.subr.bf16.mxu0 %v275_v14 }
  0x1b   :  { %254 = vmatpush3.bf16.msra.mxu0 %v276_v15 }
  0x1c   :  { %255 = vmatprep.subr.bf16.mxu0 %v277_v16 }
  0x1f   :  { %256 = vmatpush3.bf16.msra.mxu0 %v278_v17 }
  0x22   :  { %184 = vmatmul.mubr.bf16.vlgmr.msra.gmra.mxu0 %v222_v18 }
  0xe2   :  { %v257_v19 = vpop.f32.mrf.mxu0 }
  0xe4   :  { %v258_v20 = vpop.f32.mrf.mxu0 }
  0xe5   :  { %v259_v22 = vadd.f32 %v258_v20, %v257_v19 }
  0xe6   :  { %v260_v23 = vpop.f32.mrf.mxu0 }
  0xe7   :  { %v214_v24 = vadd.f32 %v259_v22, %v240_v21 }
  0xe8   :  { %v261_v25 = vpop.f32.mrf.mxu0 }
  0xe9   :  { %v215_v26 = vmax.f32 %v214_v24, 0.0 }
  0xeb   :  { %v216_v27 = vpack.c.bf16 %v215_v26, %v215_v26 }
  0xed   :  { %217 = vst [vmem:[%s361_s3] sm:$0xf] %v216_v27 }

// kernel: encoder_forward.99
= control target key start
LH: loop header
LB: loop body
LE: loop exit
PB: predicated region body
PF: predicated region fallthrough
CT: control target
= control target key end

     0   :  { %s959_s1 = inlined_call_operand.vmem [shape: bf16[256,512], index: 1, kind: input, shape index: {}]   ;;  %s960_s0 = inlined_call_operand.vmem [shape: bf16[8,256], index: 0, kind: input, shape index: {}]   ;;  %s961_s2 = inlined_call_operand.vmem [shape: f32[1,512], index: 2, kind: input, shape index: {}]   ;;  %s962_s3 = inlined_call_operand.vmem [shape: bf16[8,512], index: 3, kind: output, shape index: {}]  }
   0x1   :  { %v637_v0 = vld [vmem:[%s959_s1 + $0xe4] ss:$16 sps:$4 sm:$0xff]   ;;  %v639_v1 = vld [vmem:[%s959_s1 + $0xec] ss:$16 sps:$4 sm:$0xff]   ;;  %v641_v2 = vld [vmem:[%s959_s1 + $0xe0] ss:$16 sps:$4 sm:$0xff]  }
   0x2   :  { %406 = vmatprep.subr.bf16.mxu0 %v637_v0  ;;  %v642_v3 = vld [vmem:[%s959_s1 + $0xe8] ss:$16 sps:$4 sm:$0xff]   ;;  %447 = vmatprep.subr.bf16.mxu1 %v639_v1  ;;  %v643_v4 = vld [vmem:[%s959_s1 + $0xc4] ss:$16 sps:$4 sm:$0xff]   ;;  %v645_v5 = vld [vmem:[%s959_s1 + $0xcc] ss:$16 sps:$4 sm:$0xff]  }
   0x3   :  { %407 = vmatpush1.bf16.msra.mxu0 %v641_v2  ;;  %448 = vmatpush1.bf16.msra.mxu1 %v642_v3  ;;  %v647_v6 = vld [vmem:[%s959_s1 + $0xc0] ss:$16 sps:$4 sm:$0xff]   ;;  %v648_v7 = vld [vmem:[%s959_s1 + $0xc8] ss:$16 sps:$4 sm:$0xff]   ;;  %v649_v8 = vld [vmem:[%s959_s1 + $0xa4] ss:$16 sps:$4 sm:$0xff]   ;;  %v521_v3 = vlaneseq }
   0x4   :  { %408 = vmatprep.subr.bf16.mxu0 %v643_v4  ;;  %449 = vmatprep.subr.bf16.mxu1 %v645_v5  ;;  %v651_v9 = vld [vmem:[%s959_s1 + $0xac] ss:$16 sps:$4 sm:$0xff]   ;;  %v653_v10 = vld [vmem:[%s959_s1 + $0xa0] ss:$16 sps:$4 sm:$0xff]   ;;  %v654_v11 = vld [vmem:[%s959_s1 + $0xa8] ss:$16 sps:$4 sm:$0xff]  }
   0x5   :  { %v655_v12 = vld [vmem:[%s959_s1 + $0x84] ss:$16 sps:$4 sm:$0xff]   ;;  %v657_v13 = vld [vmem:[%s959_s1 + $0x8c] ss:$16 sps:$4 sm:$0xff]   ;;  %v659_v14 = vld [vmem:[%s959_s1 + $0x80] ss:$16 sps:$4 sm:$0xff]  }
   0x6   :  { %v660_v15 = vld [vmem:[%s959_s1 + $0x88] ss:$16 sps:$4 sm:$0xff]   ;;  %v661_v16 = vld [vmem:[%s959_s1 + $0x64] ss:$16 sps:$4 sm:$0xff]   ;;  %v663_v17 = vld [vmem:[%s959_s1 + $0x6c] ss:$16 sps:$4 sm:$0xff]  }
   0x7   :  { %409 = vmatpush1.bf16.msra.mxu0 %v647_v6  ;;  %450 = vmatpush1.bf16.msra.mxu1 %v648_v7  ;;  %v665_v18 = vld [vmem:[%s959_s1 + $0x60] ss:$16 sps:$4 sm:$0xff]   ;;  %v666_v19 = vld [vmem:[%s959_s1 + $0x68] ss:$16 sps:$4 sm:$0xff]   ;;  %v667_v20 = vld [vmem:[%s959_s1 + $0x44] ss:$16 sps:$4 sm:$0xff]  }
   0x8   :  { %410 = vmatprep.subr.bf16.mxu0 %v649_v8  ;;  %451 = vmatprep.subr.bf16.mxu1 %v651_v9  ;;  %v669_v21 = vld [vmem:[%s959_s1 + $0x4c] ss:$16 sps:$4 sm:$0xff]   ;;  %v671_v22 = vld [vmem:[%s959_s1 + $0x40] ss:$16 sps:$4 sm:$0xff]   ;;  %v672_v23 = vld [vmem:[%s959_s1 + $0x48] ss:$16 sps:$4 sm:$0xff]  }
   0x9   :  { %v673_v24 = vld [vmem:[%s959_s1 + $0x24] ss:$16 sps:$4 sm:$0xff]   ;;  %v675_v25 = vld [vmem:[%s959_s1 + $0x2c] ss:$16 sps:$4 sm:$0xff]   ;;  %v677_v26 = vld [vmem:[%s959_s1 + $0x20] ss:$16 sps:$4 sm:$0xff]  }
   0xa   :  { %v678_v27 = vld [vmem:[%s959_s1 + $0x28] ss:$16 sps:$4 sm:$0xff]   ;;  %v679_v28 = vld [vmem:[%s959_s1 + $0x4] ss:$16 sps:$4 sm:$0xff]   ;;  %v681_v29 = vld [vmem:[%s959_s1 + $0xc] ss:$16 sps:$4 sm:$0xff]  }
   0xb   :  { %411 = vmatpush1.bf16.msra.mxu0 %v653_v10  ;;  %452 = vmatpush1.bf16.msra.mxu1 %v654_v11  ;;  %v683_v30 = vld [vmem:[%s959_s1] ss:$16 sps:$4 sm:$0xff]   ;;  %v684_v31 = vld [vmem:[%s959_s1 + $0x8] ss:$16 sps:$4 sm:$0xff]   ;;  %v685_v32 = vld [vmem:[%s959_s1 + $0x1e4] ss:$16 sps:$4 sm:$0xff]  }
   0xc   :  { %412 = vmatprep.subr.bf16.mxu0 %v655_v12  ;;  %453 = vmatprep.subr.bf16.mxu1 %v657_v13  ;;  %v687_v33 = vld [vmem:[%s959_s1 + $0x1ec] ss:$16 sps:$4 sm:$0xff]   ;;  %v689_v34 = vld [vmem:[%s959_s1 + $0x1e0] ss:$16 sps:$4 sm:$0xff]   ;;  %v690_v35 = vld [vmem:[%s959_s1 + $0x1e8] ss:$16 sps:$4 sm:$0xff]  }
   0xd   :  { %v691_v36 = vld [vmem:[%s959_s1 + $0x1c4] ss:$16 sps:$4 sm:$0xff]   ;;  %v693_v37 = vld [vmem:[%s959_s1 + $0x1cc] ss:$16 sps:$4 sm:$0xff]   ;;  %v695_v38 = vld [vmem:[%s959_s1 + $0x1c0] ss:$16 sps:$4 sm:$0xff]  }
   0xe   :  { %v696_v39 = vld [vmem:[%s959_s1 + $0x1c8] ss:$16 sps:$4 sm:$0xff]   ;;  %v697_v40 = vld [vmem:[%s959_s1 + $0x1a4] ss:$16 sps:$4 sm:$0xff]   ;;  %v699_v41 = vld [vmem:[%s959_s1 + $0x1ac] ss:$16 sps:$4 sm:$0xff]  }
   0xf   :  { %413 = vmatpush1.bf16.msra.mxu0 %v659_v14  ;;  %454 = vmatpush1.bf16.msra.mxu1 %v660_v15  ;;  %v701_v42 = vld [vmem:[%s959_s1 + $0x1a0] ss:$16 sps:$4 sm:$0xff]   ;;  %v702_v43 = vld [vmem:[%s959_s1 + $0x1a8] ss:$16 sps:$4 sm:$0xff]   ;;  %v703_v44 = vld [vmem:[%s959_s1 + $0x184] ss:$16 sps:$4 sm:$0xff]  }
  0x10   :  { %414 = vmatprep.subr.bf16.mxu0 %v661_v16  ;;  %455 = vmatprep.subr.bf16.mxu1 %v663_v17  ;;  %v705_v45 = vld [vmem:[%s959_s1 + $0x18c] ss:$16 sps:$4 sm:$0xff]   ;;  %v14_v46 = vld [vmem:[%s960_s0] sm:$0xff]  ;;  %v708_v49 = vld [vmem:[%s959_s1 + $0x188] ss:$16 sps:$4 sm:$0xff]   ;;  %v522_v4 = vshrl.u32 %v521_v3, 7 }
  0x11   :  { %v568_v47 = vcombine.high %v14_v46, %v14_v46  ;;  %v707_v48 = vld [vmem:[%s959_s1 + $0x180] ss:$16 sps:$4 sm:$0xff]   ;;  %v709_v50 = vld [vmem:[%s959_s1 + $0x164] ss:$16 sps:$4 sm:$0xff]   ;;  %v711_v51 = vld [vmem:[%s959_s1 + $0x16c] ss:$16 sps:$4 sm:$0xff]   ;;  %v567_v2 = vcombine.low %v14_v46, %v14_v46 }
  0x12   :  { %v713_v52 = vld [vmem:[%s959_s1 + $0x160] ss:$16 sps:$4 sm:$0xff]   ;;  %v714_v53 = vld [vmem:[%s959_s1 + $0x168] ss:$16 sps:$4 sm:$0xff]   ;;  %v715_v54 = vld [vmem:[%s959_s1 + $0x144] ss:$16 sps:$4 sm:$0xff]  }
  0x13   :  { %415 = vmatpush1.bf16.msra.mxu0 %v665_v18  ;;  %456 = vmatpush1.bf16.msra.mxu1 %v666_v19  ;;  %v717_v55 = vld [vmem:[%s959_s1 + $0x14c] ss:$16 sps:$4 sm:$0xff]   ;;  %v719_v56 = vld [vmem:[%s959_s1 + $0x140] ss:$16 sps:$4 sm:$0xff]   ;;  %v720_v57 = vld [vmem:[%s959_s1 + $0x148] ss:$16 sps:$4 sm:$0xff]  }
  0x14   :  { %416 = vmatprep.subr.bf16.mxu0 %v667_v20  ;;  %457 = vmatprep.subr.bf16.mxu1 %v669_v21  ;;  %v721_v58 = vld [vmem:[%s959_s1 + $0x124] ss:$16 sps:$4 sm:$0xff]   ;;  %v723_v59 = vld [vmem:[%s959_s1 + $0x12c] ss:$16 sps:$4 sm:$0xff]   ;;  %v725_v60 = vld [vmem:[%s959_s1 + $0x120] ss:$16 sps:$4 sm:$0xff]  }
  0x15   :  { %438 = vmatprep.mubr.bf16.mxu0 %v568_v47  ;;  %479 = vmatprep.mubr.bf16.mxu1 %v568_v47  ;;  %v726_v61 = vld [vmem:[%s959_s1 + $0x128] ss:$16 sps:$4 sm:$0xff]   ;;  %v727_v62 = vld [vmem:[%s959_s1 + $0x104] ss:$16 sps:$4 sm:$0xff]   ;;  %v729_v63 = vld [vmem:[%s959_s1 + $0x10c] ss:$16 sps:$4 sm:$0xff]  }
  0x16   :  { %v731_v0 = vld [vmem:[%s959_s1 + $0x100] ss:$16 sps:$4 sm:$0xff]   ;;  %v732_v1 = vld [vmem:[%s959_s1 + $0x108] ss:$16 sps:$4 sm:$0xff]   ;;  %v523_v5 = vsub.s32 0, %v522_v4  ;;  %v531_v6 = vsub.s32 2, %v522_v4 }
  0x17   :  { %417 = vmatpush1.bf16.msra.mxu0 %v671_v22  ;;  %458 = vmatpush1.bf16.msra.mxu1 %v672_v23  ;;  %v527_v7 = vsub.s32 1, %v522_v4  ;;  %v535_v8 = vsub.s32 3, %v522_v4  ;;  %v519_v9 = vld [vmem:[%s961_s2] sm:$0xf] }
  0x18   :  { %418 = vmatprep.subr.bf16.mxu0 %v673_v24  ;;  %459 = vmatprep.subr.bf16.mxu1 %v675_v25  ;;  %v524_v10 = vrot.slane %v519_v9, %v523_v5  ;;  %v532_v11 = vrot.slane %v519_v9, %v531_v6 }
  0x19   :  { %v528_v12 = vrot.slane %v519_v9, %v527_v7  ;;  %v536_v13 = vrot.slane %v519_v9, %v535_v8 }
  0x1b   :  { %419 = vmatpush1.bf16.msra.mxu0 %v677_v26  ;;  %460 = vmatpush1.bf16.msra.mxu1 %v678_v27 }
  0x1c   :  { %420 = vmatprep.subr.bf16.mxu0 %v679_v28  ;;  %461 = vmatprep.subr.bf16.mxu1 %v681_v29 }
  0x1f   :  { %421 = vmatpush1.bf16.msra.mxu0 %v683_v30  ;;  %462 = vmatpush1.bf16.msra.mxu1 %v684_v31 }
  0x20   :  { %422 = vmatprep.subr.bf16.mxu0 %v685_v32  ;;  %463 = vmatprep.subr.bf16.mxu1 %v687_v33 }
  0x23   :  { %423 = vmatpush2.bf16.msra.mxu0 %v689_v34  ;;  %464 = vmatpush2.bf16.msra.mxu1 %v690_v35 }
  0x24   :  { %424 = vmatprep.subr.bf16.mxu0 %v691_v36  ;;  %465 = vmatprep.subr.bf16.mxu1 %v693_v37 }
  0x27   :  { %425 = vmatpush2.bf16.msra.mxu0 %v695_v38  ;;  %466 = vmatpush2.bf16.msra.mxu1 %v696_v39 }
  0x28   :  { %426 = vmatprep.subr.bf16.mxu0 %v697_v40  ;;  %467 = vmatprep.subr.bf16.mxu1 %v699_v41 }
  0x2b   :  { %427 = vmatpush2.bf16.msra.mxu0 %v701_v42  ;;  %468 = vmatpush2.bf16.msra.mxu1 %v702_v43 }
  0x2c   :  { %428 = vmatprep.subr.bf16.mxu0 %v703_v44  ;;  %469 = vmatprep.subr.bf16.mxu1 %v705_v45 }
  0x2f   :  { %429 = vmatpush2.bf16.msra.mxu0 %v707_v48  ;;  %470 = vmatpush2.bf16.msra.mxu1 %v708_v49 }
  0x30   :  { %430 = vmatprep.subr.bf16.mxu0 %v709_v50  ;;  %471 = vmatprep.subr.bf16.mxu1 %v711_v51 }
  0x33   :  { %431 = vmatpush2.bf16.msra.mxu0 %v713_v52  ;;  %472 = vmatpush2.bf16.msra.mxu1 %v714_v53 }
  0x34   :  { %432 = vmatprep.subr.bf16.mxu0 %v715_v54  ;;  %473 = vmatprep.subr.bf16.mxu1 %v717_v55 }
  0x37   :  { %433 = vmatpush2.bf16.msra.mxu0 %v719_v56  ;;  %474 = vmatpush2.bf16.msra.mxu1 %v720_v57 }
  0x38   :  { %434 = vmatprep.subr.bf16.mxu0 %v721_v58  ;;  %475 = vmatprep.subr.bf16.mxu1 %v723_v59 }
  0x3b   :  { %435 = vmatpush2.bf16.msra.mxu0 %v725_v60  ;;  %476 = vmatpush2.bf16.msra.mxu1 %v726_v61 }
  0x3c   :  { %436 = vmatprep.subr.bf16.mxu0 %v727_v62  ;;  %477 = vmatprep.subr.bf16.mxu1 %v729_v63 }
  0x3f   :  { %437 = vmatpush2.bf16.msra.mxu0 %v731_v0  ;;  %478 = vmatpush2.bf16.msra.mxu1 %v732_v1 }
  0x42   :  { %439 = vmatmul.mubr.bf16.vlgmr.msra.gmra.mxu0 %v567_v2  ;;  %480 = vmatmul.mubr.bf16.vlgmr.msra.gmra.mxu1 %v567_v2 }
 0x102   :  { %v440_v14 = vpop.f32.mrf.mxu0  ;;  %v481_v15 = vpop.f32.mrf.mxu1 }
 0x103   :  { %v541_v18 = vadd.f32 %v524_v10, %v440_v14  ;;  %v543_v19 = vadd.f32 %v532_v11, %v481_v15 }
 0x104   :  { %v442_v16 = vpop.f32.mrf.mxu0  ;;  %v483_v17 = vpop.f32.mrf.mxu1 }
 0x105   :  { %v542_v20 = vadd.f32 %v528_v12, %v442_v16  ;;  %v544_v21 = vadd.f32 %v536_v13, %v483_v17 }
 0x106   :  { %v444_v22 = vpop.f32.mrf.mxu0  ;;  %v485_v23 = vpop.f32.mrf.mxu1 }
 0x107   :  { %v635_v24 = vpack.c.bf16 %v542_v20, %v541_v18  ;;  %v636_v25 = vpack.c.bf16 %v544_v21, %v543_v19 }
 0x108   :  { %v445_v26 = vpop.f32.mrf.mxu0  ;;  %v486_v27 = vpop.f32.mrf.mxu1 }
 0x109   :  { %561 = vst [vmem:[%s962_s3] sm:$0xff] %v635_v24  ;;  %562 = vst [vmem:[%s962_s3 + $0x8] sm:$0xff] %v636_v25 }

// kernel: encoder_forward.101
= control target key start
LH: loop header
LB: loop body
LE: loop exit
PB: predicated region body
PF: predicated region fallthrough
CT: control target
= control target key end

     0   :  { %s643_s1 = inlined_call_operand.vmem [shape: bf16[512,128], index: 1, kind: input, shape index: {}]   ;;  %s644_s0 = inlined_call_operand.vmem [shape: bf16[8,512], index: 0, kind: input, shape index: {}]   ;;  %s645_s2 = inlined_call_operand.vmem [shape: f32[1,128], index: 2, kind: input, shape index: {}]   ;;  %s646_s3 = inlined_call_operand.vmem [shape: bf16[8,128], index: 3, kind: output, shape index: {}]  }
   0x1   :  { %v479_v0 = vld [vmem:[%s643_s1 + $0x78] sm:$0xff]   ;;  %v483_v4 = vld [vmem:[%s643_s1 + $0x70] sm:$0xff]   ;;  %v487_v8 = vld [vmem:[%s643_s1 + $0x68] sm:$0xff]  }
   0x2   :  { %v480_v1 = vld [vmem:[%s643_s1 + $0xf8] sm:$0xff]   ;;  %435 = vmatprep.subr.bf16.mxu0 %v479_v0  ;;  %v484_v5 = vld [vmem:[%s643_s1 + $0xf0] sm:$0xff]   ;;  %v488_v9 = vld [vmem:[%s643_s1 + $0xe8] sm:$0xff]  }
   0x3   :  { %v481_v2 = vld [vmem:[%s643_s1 + $0x38] sm:$0xff]   ;;  %457 = vmatprep.subr.bf16.mxu1 %v480_v1  ;;  %v485_v6 = vld [vmem:[%s643_s1 + $0x30] sm:$0xff]   ;;  %v489_v10 = vld [vmem:[%s643_s1 + $0x28] sm:$0xff]  }
   0x4   :  { %v482_v3 = vld [vmem:[%s643_s1 + $0xb8] sm:$0xff]   ;;  %436 = vmatpush3.bf16.msra.mxu0 %v481_v2  ;;  %v486_v7 = vld [vmem:[%s643_s1 + $0xb0] sm:$0xff]   ;;  %v490_v11 = vld [vmem:[%s643_s1 + $0xa8] sm:$0xff]  }
   0x5   :  { %458 = vmatpush3.bf16.msra.mxu1 %v482_v3  ;;  %437 = vmatprep.subr.bf16.mxu0 %v483_v4  ;;  %v491_v12 = vld [vmem:[%s643_s1 + $0x60] sm:$0xff]   ;;  %v495_v16 = vld [vmem:[%s643_s1 + $0x58] sm:$0xff]   ;;  %v499_v20 = vld [vmem:[%s643_s1 + $0x50] sm:$0xff]  }
   0x6   :  { %459 = vmatprep.subr.bf16.mxu1 %v484_v5  ;;  %v492_v13 = vld [vmem:[%s643_s1 + $0xe0] sm:$0xff]   ;;  %v496_v17 = vld [vmem:[%s643_s1 + $0xd8] sm:$0xff]   ;;  %v500_v21 = vld [vmem:[%s643_s1 + $0xd0] sm:$0xff]  }
   0x7   :  { %v493_v14 = vld [vmem:[%s643_s1 + $0x20] sm:$0xff]   ;;  %v497_v18 = vld [vmem:[%s643_s1 + $0x18] sm:$0xff]   ;;  %v501_v22 = vld [vmem:[%s643_s1 + $0x10] sm:$0xff]  }
   0x8   :  { %438 = vmatpush3.bf16.msra.mxu0 %v485_v6  ;;  %v494_v15 = vld [vmem:[%s643_s1 + $0xa0] sm:$0xff]   ;;  %v498_v19 = vld [vmem:[%s643_s1 + $0x98] sm:$0xff]   ;;  %v502_v23 = vld [vmem:[%s643_s1 + $0x90] sm:$0xff]  }
   0x9   :  { %460 = vmatpush3.bf16.msra.mxu1 %v486_v7  ;;  %439 = vmatprep.subr.bf16.mxu0 %v487_v8  ;;  %v503_v24 = vld [vmem:[%s643_s1 + $0x48] sm:$0xff]   ;;  %v507_v28 = vld [vmem:[%s643_s1 + $0x40] sm:$0xff]  }
   0xa   :  { %461 = vmatprep.subr.bf16.mxu1 %v488_v9  ;;  %v504_v25 = vld [vmem:[%s643_s1 + $0xc8] sm:$0xff]   ;;  %v508_v29 = vld [vmem:[%s643_s1 + $0xc0] sm:$0xff]  }
   0xb   :  { %v505_v26 = vld [vmem:[%s643_s1 + $0x8] sm:$0xff]   ;;  %v509_v30 = vld [vmem:[%s643_s1] sm:$0xff]  }
   0xc   :  { %440 = vmatpush3.bf16.msra.mxu0 %v489_v10  ;;  %v506_v27 = vld [vmem:[%s643_s1 + $0x88] sm:$0xff]   ;;  %v510_v31 = vld [vmem:[%s643_s1 + $0x80] sm:$0xff]  }
   0xd   :  { %462 = vmatpush3.bf16.msra.mxu1 %v490_v11  ;;  %441 = vmatprep.subr.bf16.mxu0 %v491_v12  ;;  %v15_v32 = vld [vmem:[%s644_s0] sm:$0xff]  ;;  %v16_v33 = vld [vmem:[%s644_s0 + $0x8] sm:$0xff] }
   0xe   :  { %463 = vmatprep.subr.bf16.mxu1 %v492_v13  ;;  %v398_v34 = vcombine.low %v15_v32, %v15_v32  ;;  %v399_v35 = vcombine.high %v15_v32, %v15_v32  ;;  %v400_v36 = vcombine.low %v16_v33, %v16_v33  ;;  %v401_v37 = vcombine.high %v16_v33, %v16_v33  ;;  %v434_v44 = vld [vmem:[%s645_s2] ss:$0 sm:$0xff] }
  0x10   :  { %442 = vmatpush3.bf16.msra.mxu0 %v493_v14  ;;  %319 = vmatprep.mubr.bf16.mxu0 %v399_v35 }
  0x11   :  { %464 = vmatpush3.bf16.msra.mxu1 %v494_v15  ;;  %443 = vmatprep.subr.bf16.mxu0 %v495_v16 }
  0x12   :  { %465 = vmatprep.subr.bf16.mxu1 %v496_v17  ;;  %359 = vmatprep.mubr.bf16.mxu1 %v401_v37 }
  0x14   :  { %444 = vmatpush3.bf16.msra.mxu0 %v497_v18 }
  0x15   :  { %466 = vmatpush3.bf16.msra.mxu1 %v498_v19  ;;  %445 = vmatprep.subr.bf16.mxu0 %v499_v20 }
  0x16   :  { %467 = vmatprep.subr.bf16.mxu1 %v500_v21 }
  0x18   :  { %446 = vmatpush3.bf16.msra.mxu0 %v501_v22 }
  0x19   :  { %468 = vmatpush3.bf16.msra.mxu1 %v502_v23  ;;  %447 = vmatprep.subr.bf16.mxu0 %v503_v24 }
  0x1a   :  { %469 = vmatprep.subr.bf16.mxu1 %v504_v25 }
  0x1c   :  { %448 = vmatpush3.bf16.msra.mxu0 %v505_v26 }
  0x1d   :  { %470 = vmatpush3.bf16.msra.mxu1 %v506_v27  ;;  %449 = vmatprep.subr.bf16.mxu0 %v507_v28 }
  0x1e   :  { %471 = vmatprep.subr.bf16.mxu1 %v508_v29 }
  0x20   :  { %450 = vmatpush3.bf16.msra.mxu0 %v509_v30 }
  0x21   :  { %472 = vmatpush3.bf16.msra.mxu1 %v510_v31 }
  0x23   :  { %320 = vmatmul.mubr.bf16.vlgmr.msra.gmra.mxu0 %v398_v34 }
  0x24   :  { %360 = vmatmul.mubr.bf16.vlgmr.msra.gmra.mxu1 %v400_v36 }
  0xe3   :  { %v451_v38 = vpop.f32.mrf.mxu0 }
  0xe4   :  { %v473_v39 = vpop.f32.mrf.mxu1 }
  0xe5   :  { %v452_v40 = vpop.f32.mrf.mxu0 }
  0xe6   :  { %v474_v41 = vpop.f32.mrf.mxu1  ;;  %v453_v42 = vadd.f32 %v452_v40, %v451_v38 }
  0xe7   :  { %v475_v43 = vadd.f32 %v474_v41, %v473_v39  ;;  %v454_v45 = vpop.f32.mrf.mxu0 }
  0xe8   :  { %v476_v46 = vpop.f32.mrf.mxu1 }
  0xe9   :  { %v362_v47 = vadd.f32 %v475_v43, %v453_v42  ;;  %v455_v48 = vpop.f32.mrf.mxu0 }
  0xea   :  { %v477_v49 = vpop.f32.mrf.mxu1 }
  0xeb   :  { %v390_v50 = vadd.f32 %v434_v44, %v362_v47 }
  0xed   :  { %v391_v51 = vmax.f32 %v390_v50, 0.0 }
  0xef   :  { %v392_v52 = vpack.c.bf16 %v391_v51, %v391_v51 }
  0xf1   :  { %393 = vst [vmem:[%s646_s3] sm:$0xf] %v392_v52 }

// kernel: encoder_forward.100
= control target key start
LH: loop header
LB: loop body
LE: loop exit
PB: predicated region body
PF: predicated region fallthrough
CT: control target
= control target key end

     0   :  { %v471_v1 = vmov 0   ;;  %v326_v34 = vlaneseq  ;;  %s611_s1 = inlined_call_operand.vmem [shape: bf16[128,512], index: 1, kind: input, shape index: {}]   ;;  %s612_s0 = inlined_call_operand.vmem [shape: bf16[8,128], index: 0, kind: input, shape index: {}]   ;;  %s613_s2 = inlined_call_operand.vmem [shape: f32[1,512], index: 2, kind: input, shape index: {}]   ;;  %s614_s3 = inlined_call_operand.vmem [shape: bf16[8,512], index: 3, kind: input, shape index: {}]   ;;  %s615_s4 = inlined_call_operand.vmem [shape: bf16[8,512], index: 4, kind: output, shape index: {}]  }
   0x1   :  { %v423_v0 = vld [vmem:[%s611_s1 + $0xe4] ss:$16 sps:$4 sm:$0xff]   ;;  %243 = vmatprep.mubr.bf16.mxu0 %v471_v1  ;;  %284 = vmatprep.mubr.bf16.mxu1 %v471_v1  ;;  %v425_v2 = vld [vmem:[%s611_s1 + $0xec] ss:$16 sps:$4 sm:$0xff]   ;;  %v427_v3 = vld [vmem:[%s611_s1 + $0xe0] ss:$16 sps:$4 sm:$0xff]  }
   0x2   :  { %211 = vmatprep.subr.bf16.mxu0 %v423_v0  ;;  %v428_v4 = vld [vmem:[%s611_s1 + $0xe8] ss:$16 sps:$4 sm:$0xff]   ;;  %252 = vmatprep.subr.bf16.mxu1 %v425_v2  ;;  %v429_v5 = vld [vmem:[%s611_s1 + $0xc4] ss:$16 sps:$4 sm:$0xff]   ;;  %v431_v6 = vld [vmem:[%s611_s1 + $0xcc] ss:$16 sps:$4 sm:$0xff]  }
   0x3   :  { %212 = vmatpush1.bf16.msra.mxu0 %v427_v3  ;;  %253 = vmatpush1.bf16.msra.mxu1 %v428_v4  ;;  %v433_v7 = vld [vmem:[%s611_s1 + $0xc0] ss:$16 sps:$4 sm:$0xff]   ;;  %v434_v8 = vld [vmem:[%s611_s1 + $0xc8] ss:$16 sps:$4 sm:$0xff]   ;;  %v435_v9 = vld [vmem:[%s611_s1 + $0xa4] ss:$16 sps:$4 sm:$0xff]  }
   0x4   :  { %213 = vmatprep.subr.bf16.mxu0 %v429_v5  ;;  %254 = vmatprep.subr.bf16.mxu1 %v431_v6  ;;  %v437_v10 = vld [vmem:[%s611_s1 + $0xac] ss:$16 sps:$4 sm:$0xff]   ;;  %v439_v11 = vld [vmem:[%s611_s1 + $0xa0] ss:$16 sps:$4 sm:$0xff]   ;;  %v440_v12 = vld [vmem:[%s611_s1 + $0xa8] ss:$16 sps:$4 sm:$0xff]  }
   0x5   :  { %v441_v13 = vld [vmem:[%s611_s1 + $0x84] ss:$16 sps:$4 sm:$0xff]   ;;  %v443_v14 = vld [vmem:[%s611_s1 + $0x8c] ss:$16 sps:$4 sm:$0xff]   ;;  %v445_v15 = vld [vmem:[%s611_s1 + $0x80] ss:$16 sps:$4 sm:$0xff]  }
   0x6   :  { %v446_v16 = vld [vmem:[%s611_s1 + $0x88] ss:$16 sps:$4 sm:$0xff]   ;;  %v447_v17 = vld [vmem:[%s611_s1 + $0x64] ss:$16 sps:$4 sm:$0xff]   ;;  %v449_v18 = vld [vmem:[%s611_s1 + $0x6c] ss:$16 sps:$4 sm:$0xff]  }
   0x7   :  { %214 = vmatpush1.bf16.msra.mxu0 %v433_v7  ;;  %255 = vmatpush1.bf16.msra.mxu1 %v434_v8  ;;  %v451_v19 = vld [vmem:[%s611_s1 + $0x60] ss:$16 sps:$4 sm:$0xff]   ;;  %v452_v20 = vld [vmem:[%s611_s1 + $0x68] ss:$16 sps:$4 sm:$0xff]   ;;  %v453_v21 = vld [vmem:[%s611_s1 + $0x44] ss:$16 sps:$4 sm:$0xff]  }
   0x8   :  { %215 = vmatprep.subr.bf16.mxu0 %v435_v9  ;;  %256 = vmatprep.subr.bf16.mxu1 %v437_v10  ;;  %v455_v22 = vld [vmem:[%s611_s1 + $0x4c] ss:$16 sps:$4 sm:$0xff]   ;;  %v457_v23 = vld [vmem:[%s611_s1 + $0x40] ss:$16 sps:$4 sm:$0xff]   ;;  %v458_v24 = vld [vmem:[%s611_s1 + $0x48] ss:$16 sps:$4 sm:$0xff]  }
   0x9   :  { %v459_v25 = vld [vmem:[%s611_s1 + $0x24] ss:$16 sps:$4 sm:$0xff]   ;;  %v461_v26 = vld [vmem:[%s611_s1 + $0x2c] ss:$16 sps:$4 sm:$0xff]   ;;  %v463_v27 = vld [vmem:[%s611_s1 + $0x20] ss:$16 sps:$4 sm:$0xff]  }
   0xa   :  { %v464_v28 = vld [vmem:[%s611_s1 + $0x28] ss:$16 sps:$4 sm:$0xff]   ;;  %v465_v29 = vld [vmem:[%s611_s1 + $0x4] ss:$16 sps:$4 sm:$0xff]   ;;  %v467_v30 = vld [vmem:[%s611_s1 + $0xc] ss:$16 sps:$4 sm:$0xff]  }
   0xb   :  { %216 = vmatpush1.bf16.msra.mxu0 %v439_v11  ;;  %257 = vmatpush1.bf16.msra.mxu1 %v440_v12  ;;  %v469_v31 = vld [vmem:[%s611_s1] ss:$16 sps:$4 sm:$0xff]   ;;  %v470_v32 = vld [vmem:[%s611_s1 + $0x8] ss:$16 sps:$4 sm:$0xff]   ;;  %v327_v35 = vshrl.u32 %v326_v34, 7 }
   0xc   :  { %217 = vmatprep.subr.bf16.mxu0 %v441_v13  ;;  %258 = vmatprep.subr.bf16.mxu1 %v443_v14  ;;  %v18_v33 = vld [vmem:[%s612_s0] sm:$0xf]  ;;  %v351_v42 = vld [vmem:[%s614_s3 + $0x8] sm:$0xff] }
   0xd   :  { %v328_v36 = vsub.s32 0, %v327_v35  ;;  %v336_v37 = vsub.s32 2, %v327_v35  ;;  %v324_v38 = vld [vmem:[%s613_s2] sm:$0xf]  ;;  %v332_v39 = vsub.s32 1, %v327_v35  ;;  %v340_v40 = vsub.s32 3, %v327_v35 }
   0xe   :  { %v350_v41 = vld [vmem:[%s614_s3] sm:$0xff]  ;;  %v354_v46 = vunpack.c.l.bf16 %v351_v42  ;;  %v355_v54 = vunpack.c.h.bf16 %v351_v42 }
   0xf   :  { %218 = vmatpush1.bf16.msra.mxu0 %v445_v15  ;;  %259 = vmatpush1.bf16.msra.mxu1 %v446_v16  ;;  %v329_v43 = vrot.slane %v324_v38, %v328_v36  ;;  %v337_v44 = vrot.slane %v324_v38, %v336_v37  ;;  %v352_v45 = vunpack.c.l.bf16 %v350_v41  ;;  %v333_v47 = vrot.slane %v324_v38, %v332_v39 }
  0x10   :  { %219 = vmatprep.subr.bf16.mxu0 %v447_v17  ;;  %260 = vmatprep.subr.bf16.mxu1 %v449_v18  ;;  %v341_v48 = vrot.slane %v324_v38, %v340_v40  ;;  %v353_v53 = vunpack.c.h.bf16 %v350_v41 }
  0x13   :  { %220 = vmatpush1.bf16.msra.mxu0 %v451_v19  ;;  %261 = vmatpush1.bf16.msra.mxu1 %v452_v20 }
  0x14   :  { %221 = vmatprep.subr.bf16.mxu0 %v453_v21  ;;  %262 = vmatprep.subr.bf16.mxu1 %v455_v22 }
  0x17   :  { %222 = vmatpush1.bf16.msra.mxu0 %v457_v23  ;;  %263 = vmatpush1.bf16.msra.mxu1 %v458_v24 }
  0x18   :  { %223 = vmatprep.subr.bf16.mxu0 %v459_v25  ;;  %264 = vmatprep.subr.bf16.mxu1 %v461_v26 }
  0x1b   :  { %224 = vmatpush1.bf16.msra.mxu0 %v463_v27  ;;  %265 = vmatpush1.bf16.msra.mxu1 %v464_v28 }
  0x1c   :  { %225 = vmatprep.subr.bf16.mxu0 %v465_v29  ;;  %266 = vmatprep.subr.bf16.mxu1 %v467_v30 }
  0x1f   :  { %226 = vmatpush1.bf16.msra.mxu0 %v469_v31  ;;  %267 = vmatpush1.bf16.msra.mxu1 %v470_v32 }
  0x22   :  { %244 = vmatmul.mubr.bf16.vlgmr.msra.gmra.mxu0 %v18_v33  ;;  %285 = vmatmul.mubr.bf16.vlgmr.msra.gmra.mxu1 %v18_v33 }
  0xe2   :  { %v245_v49 = vpop.f32.mrf.mxu0  ;;  %v286_v50 = vpop.f32.mrf.mxu1 }
  0xe3   :  { %v346_v51 = vadd.f32 %v329_v43, %v245_v49  ;;  %v348_v52 = vadd.f32 %v337_v44, %v286_v50 }
  0xe4   :  { %v247_v55 = vpop.f32.mrf.mxu0  ;;  %v288_v56 = vpop.f32.mrf.mxu1 }
  0xe5   :  { %v356_v57 = vadd.f32 %v352_v45, %v346_v51  ;;  %v358_v58 = vadd.f32 %v354_v46, %v348_v52  ;;  %v347_v59 = vadd.f32 %v333_v47, %v247_v55  ;;  %v349_v60 = vadd.f32 %v341_v48, %v288_v56 }
  0xe6   :  { %v249_v61 = vpop.f32.mrf.mxu0  ;;  %v290_v62 = vpop.f32.mrf.mxu1 }
  0xe7   :  { %v357_v63 = vadd.f32 %v353_v53, %v347_v59  ;;  %v359_v0 = vadd.f32 %v355_v54, %v349_v60  ;;  %v360_v3 = vmax.f32 %v356_v57, 0.0  ;;  %v362_v4 = vmax.f32 %v358_v58, 0.0 }
  0xe8   :  { %v250_v1 = vpop.f32.mrf.mxu0  ;;  %v291_v2 = vpop.f32.mrf.mxu1 }
  0xe9   :  { %v361_v5 = vmax.f32 %v357_v63, 0.0  ;;  %v363_v6 = vmax.f32 %v359_v0, 0.0 }
  0xeb   :  { %v420_v7 = vpack.c.bf16 %v361_v5, %v360_v3  ;;  %v421_v8 = vpack.c.bf16 %v363_v6, %v362_v4 }
  0xed   :  { %380 = vst [vmem:[%s615_s4] sm:$0xff] %v420_v7  ;;  %381 = vst [vmem:[%s615_s4 + $0x8] sm:$0xff] %v421_v8 }

// kernel: encoder_forward.98
= control target key start
LH: loop header
LB: loop body
LE: loop exit
PB: predicated region body
PF: predicated region fallthrough
CT: control target
= control target key end

     0   :  { %vm1142_vm0 = vmmov 0   ;;  %s1400_s1 = inlined_call_operand.vmem [shape: bf16[1152,128], index: 1, kind: input, shape index: {}]   ;;  %s1401_s0 = inlined_call_operand.vmem [shape: bf16[8,1152], index: 0, kind: input, shape index: {}]   ;;  %s1402_s2 = inlined_call_operand.vmem [shape: f32[1,128], index: 2, kind: input, shape index: {}]   ;;  %s1403_s3 = inlined_call_operand.vmem [shape: bf16[8,128], index: 3, kind: output, shape index: {}]  }
   0x1   :  { %v1060_v0 = vld [vmem:[%s1400_s1 + $0x78] sm:$0xff]   ;;  %v1064_v4 = vld [vmem:[%s1400_s1 + $0x70] sm:$0xff]   ;;  %v1068_v8 = vld [vmem:[%s1400_s1 + $0x68] sm:$0xff]  }
   0x2   :  { %v1061_v1 = vld [vmem:[%s1400_s1 + $0xf8] sm:$0xff]   ;;  %941 = vmatprep.subr.bf16.mxu0 %v1060_v0  ;;  %v1065_v5 = vld [vmem:[%s1400_s1 + $0xf0] sm:$0xff]   ;;  %v1069_v9 = vld [vmem:[%s1400_s1 + $0xe8] sm:$0xff]  }
   0x3   :  { %v1062_v2 = vld [vmem:[%s1400_s1 + $0x38] sm:$0xff]   ;;  %963 = vmatprep.subr.bf16.mxu1 %v1061_v1  ;;  %v1066_v6 = vld [vmem:[%s1400_s1 + $0x30] sm:$0xff]   ;;  %v1070_v10 = vld [vmem:[%s1400_s1 + $0x28] sm:$0xff]  }
   0x4   :  { %v1063_v3 = vld [vmem:[%s1400_s1 + $0xb8] sm:$0xff]   ;;  %942 = vmatpush3.bf16.msra.mxu0 %v1062_v2  ;;  %v1067_v7 = vld [vmem:[%s1400_s1 + $0xb0] sm:$0xff]   ;;  %v1071_v11 = vld [vmem:[%s1400_s1 + $0xa8] sm:$0xff]  }
   0x5   :  { %964 = vmatpush3.bf16.msra.mxu1 %v1063_v3  ;;  %943 = vmatprep.subr.bf16.mxu0 %v1064_v4  ;;  %v1072_v12 = vld [vmem:[%s1400_s1 + $0x60] sm:$0xff]   ;;  %v1076_v16 = vld [vmem:[%s1400_s1 + $0x58] sm:$0xff]   ;;  %v1080_v20 = vld [vmem:[%s1400_s1 + $0x50] sm:$0xff]  }
   0x6   :  { %965 = vmatprep.subr.bf16.mxu1 %v1065_v5  ;;  %v1073_v13 = vld [vmem:[%s1400_s1 + $0xe0] sm:$0xff]   ;;  %v1077_v17 = vld [vmem:[%s1400_s1 + $0xd8] sm:$0xff]   ;;  %v1081_v21 = vld [vmem:[%s1400_s1 + $0xd0] sm:$0xff]  }
   0x7   :  { %v1074_v14 = vld [vmem:[%s1400_s1 + $0x20] sm:$0xff]   ;;  %v1078_v18 = vld [vmem:[%s1400_s1 + $0x18] sm:$0xff]   ;;  %v1082_v22 = vld [vmem:[%s1400_s1 + $0x10] sm:$0xff]  }
   0x8   :  { %944 = vmatpush3.bf16.msra.mxu0 %v1066_v6  ;;  %v1075_v15 = vld [vmem:[%s1400_s1 + $0xa0] sm:$0xff]   ;;  %v1079_v19 = vld [vmem:[%s1400_s1 + $0x98] sm:$0xff]   ;;  %v1083_v23 = vld [vmem:[%s1400_s1 + $0x90] sm:$0xff]  }
   0x9   :  { %966 = vmatpush3.bf16.msra.mxu1 %v1067_v7  ;;  %945 = vmatprep.subr.bf16.mxu0 %v1068_v8  ;;  %v1084_v24 = vld [vmem:[%s1400_s1 + $0x48] sm:$0xff]   ;;  %v1088_v28 = vld [vmem:[%s1400_s1 + $0x40] sm:$0xff]   ;;  %v1096_v38 = vld [vmem:[%s1400_s1 + $0x178] sm:$0xff]  }
   0xa   :  { %967 = vmatprep.subr.bf16.mxu1 %v1069_v9  ;;  %v1085_v25 = vld [vmem:[%s1400_s1 + $0xc8] sm:$0xff]   ;;  %v1089_v29 = vld [vmem:[%s1400_s1 + $0xc0] sm:$0xff]   ;;  %v1097_v39 = vld [vmem:[%s1400_s1 + $0x138] sm:$0xff]  }
   0xb   :  { %v1086_v26 = vld [vmem:[%s1400_s1 + $0x8] sm:$0xff]   ;;  %v1090_v30 = vld [vmem:[%s1400_s1] sm:$0xff]   ;;  %v1098_v40 = vld [vmem:[%s1400_s1 + $0x1f8] sm:$0xff]  }
   0xc   :  { %946 = vmatpush3.bf16.msra.mxu0 %v1070_v10  ;;  %v1087_v27 = vld [vmem:[%s1400_s1 + $0x88] sm:$0xff]   ;;  %v1091_v31 = vld [vmem:[%s1400_s1 + $0x80] sm:$0xff]   ;;  %v1099_v41 = vld [vmem:[%s1400_s1 + $0x1b8] sm:$0xff]  }
   0xd   :  { %968 = vmatpush3.bf16.msra.mxu1 %v1071_v11  ;;  %947 = vmatprep.subr.bf16.mxu0 %v1072_v12  ;;  %v15_v32 = vld [vmem:[%s1401_s0] sm:$0xff]  ;;  %v16_v33 = vld [vmem:[%s1401_s0 + $0x8] sm:$0xff]  ;;  %v1100_v42 = vld [vmem:[%s1400_s1 + $0x170] sm:$0xff]  }
   0xe   :  { %969 = vmatprep.subr.bf16.mxu1 %v1073_v13  ;;  %v859_v34 = vcombine.low %v15_v32, %v15_v32  ;;  %v860_v35 = vcombine.high %v15_v32, %v15_v32  ;;  %v861_v36 = vcombine.low %v16_v33, %v16_v33  ;;  %v862_v37 = vcombine.high %v16_v33, %v16_v33  ;;  %v1101_v43 = vld [vmem:[%s1400_s1 + $0x130] sm:$0xff]   ;;  %v1104_v46 = vld [vmem:[%s1400_s1 + $0x168] sm:$0xff]   ;;  %v1108_v50 = vld [vmem:[%s1400_s1 + $0x160] sm:$0xff]  }
   0xf   :  { %v1102_v44 = vld [vmem:[%s1400_s1 + $0x1f0] sm:$0xff]   ;;  %v1105_v47 = vld [vmem:[%s1400_s1 + $0x128] sm:$0xff]   ;;  %v1109_v51 = vld [vmem:[%s1400_s1 + $0x120] sm:$0xff]   ;;  %v1141_v13 = vmov 0.0  }
  0x10   :  { %948 = vmatpush3.bf16.msra.mxu0 %v1074_v14  ;;  %660 = vmatprep.mubr.bf16.mxu0 %v860_v35  ;;  %v1103_v45 = vld [vmem:[%s1400_s1 + $0x1b0] sm:$0xff]   ;;  %v1106_v48 = vld [vmem:[%s1400_s1 + $0x1e8] sm:$0xff]   ;;  %v1110_v52 = vld [vmem:[%s1400_s1 + $0x1e0] sm:$0xff]  }
  0x11   :  { %970 = vmatpush3.bf16.msra.mxu1 %v1075_v15  ;;  %949 = vmatprep.subr.bf16.mxu0 %v1076_v16  ;;  %v1107_v49 = vld [vmem:[%s1400_s1 + $0x1a8] sm:$0xff]   ;;  %v1111_v53 = vld [vmem:[%s1400_s1 + $0x1a0] sm:$0xff]   ;;  %v1112_v54 = vld [vmem:[%s1400_s1 + $0x158] sm:$0xff]  }
  0x12   :  { %971 = vmatprep.subr.bf16.mxu1 %v1077_v17  ;;  %700 = vmatprep.mubr.bf16.mxu1 %v862_v37  ;;  %v1113_v55 = vld [vmem:[%s1400_s1 + $0x118] sm:$0xff]   ;;  %v1116_v58 = vld [vmem:[%s1400_s1 + $0x150] sm:$0xff]   ;;  %v1120_v62 = vld [vmem:[%s1400_s1 + $0x148] sm:$0xff]  }
  0x13   :  { %v1114_v56 = vld [vmem:[%s1400_s1 + $0x1d8] sm:$0xff]   ;;  %v1117_v59 = vld [vmem:[%s1400_s1 + $0x110] sm:$0xff]   ;;  %v1121_v63 = vld [vmem:[%s1400_s1 + $0x108] sm:$0xff]  }
  0x14   :  { %950 = vmatpush3.bf16.msra.mxu0 %v1078_v18  ;;  %v1115_v57 = vld [vmem:[%s1400_s1 + $0x198] sm:$0xff]   ;;  %v1118_v60 = vld [vmem:[%s1400_s1 + $0x1d0] sm:$0xff]   ;;  %v1122_v0 = vld [vmem:[%s1400_s1 + $0x1c8] sm:$0xff]  }
  0x15   :  { %972 = vmatpush3.bf16.msra.mxu1 %v1079_v19  ;;  %951 = vmatprep.subr.bf16.mxu0 %v1080_v20  ;;  %v1119_v61 = vld [vmem:[%s1400_s1 + $0x190] sm:$0xff]   ;;  %v1123_v1 = vld [vmem:[%s1400_s1 + $0x188] sm:$0xff]   ;;  %v1124_v2 = vld [vmem:[%s1400_s1 + $0x140] sm:$0xff]  }
  0x16   :  { %973 = vmatprep.subr.bf16.mxu1 %v1081_v21  ;;  %v1125_v3 = vld [vmem:[%s1400_s1 + $0x100] sm:$0xff]   ;;  %v17_v5 = vld [vmem:[%s1401_s0 + $0x10] sm:$0xff]  ;;  %v18_v9 = vld [vmem:[%s1401_s0 + $0x18] sm:$0xff] }
  0x17   :  { %v1126_v4 = vld [vmem:[%s1400_s1 + $0x1c0] sm:$0xff]   ;;  %v864_v6 = vcombine.high %v17_v5, %v17_v5  ;;  %v863_v8 = vcombine.low %v17_v5, %v17_v5  ;;  %v865_v10 = vcombine.low %v18_v9, %v18_v9  ;;  %v866_v11 = vcombine.high %v18_v9, %v18_v9  ;;  %v1132_v12 = vld [vmem:[%s1400_s1 + $0x238] sm:$0xff]   ;;  %v1133_v14 = vld [vmem:[%s1400_s1 + $0x230] sm:$0xff]  }
  0x18   :  { %952 = vmatpush3.bf16.msra.mxu0 %v1082_v22  ;;  %v1129_v7 = vld [vmem:[%s1400_s1 + $0x180] sm:$0xff]   ;;  %v1134_v15 = vld [vmem:[%s1400_s1 + $0x228] sm:$0xff]   ;;  %v1136_v17 = vld [vmem:[%s1400_s1 + $0x218] sm:$0xff]  }
  0x19   :  { %974 = vmatpush3.bf16.msra.mxu1 %v1083_v23  ;;  %953 = vmatprep.subr.bf16.mxu0 %v1084_v24  ;;  %v1135_v16 = vld [vmem:[%s1400_s1 + $0x220] sm:$0xff]   ;;  %v1137_v18 = vld [vmem:[%s1400_s1 + $0x210] sm:$0xff]   ;;  %v1138_v19 = vld [vmem:[%s1400_s1 + $0x208] sm:$0xff]  }
  0x1a   :  { %975 = vmatprep.subr.bf16.mxu1 %v1085_v25  ;;  %v1139_v20 = vld [vmem:[%s1400_s1 + $0x200] sm:$0xff]  }
  0x1b   :  { %v1140_v21 = vld [vmem:[%s1401_s0 + $0x20] ss:$0 sps:$4 sm:$0xff]  }
  0x1c   :  { %954 = vmatpush3.bf16.msra.mxu0 %v1086_v26 }
  0x1d   :  { %976 = vmatpush3.bf16.msra.mxu1 %v1087_v27  ;;  %955 = vmatprep.subr.bf16.mxu0 %v1088_v28 }
  0x1e   :  { %977 = vmatprep.subr.bf16.mxu1 %v1089_v29 }
  0x20   :  { %956 = vmatpush3.bf16.msra.mxu0 %v1090_v30 }
  0x21   :  { %978 = vmatpush3.bf16.msra.mxu1 %v1091_v31  ;;  %985 = vmatprep.subr.bf16.mxu0 %v1096_v38 }
  0x22   :  { %1007 = vmatprep.subr.bf16.mxu1 %v1098_v40 }
  0x23   :  { %661 = vmatmul.mubr.bf16.vlgmr.msra.gmra.mxu0 %v859_v34 }
  0x24   :  { %701 = vmatmul.mubr.bf16.vlgmr.msra.gmra.mxu1 %v861_v36  ;;  %986 = vmatpush3.bf16.msra.mxu0 %v1097_v39 }
  0x25   :  { %1008 = vmatpush3.bf16.msra.mxu1 %v1099_v41  ;;  %987 = vmatprep.subr.bf16.mxu0 %v1100_v42 }
  0x26   :  { %1009 = vmatprep.subr.bf16.mxu1 %v1102_v44  ;;  %740 = vmatprep.mubr.bf16.mxu0 %v864_v6 }
  0x27   :  { %780 = vmatprep.mubr.bf16.mxu1 %v866_v11 }
  0x28   :  { %988 = vmatpush3.bf16.msra.mxu0 %v1101_v43 }
  0x29   :  { %1010 = vmatpush3.bf16.msra.mxu1 %v1103_v45  ;;  %989 = vmatprep.subr.bf16.mxu0 %v1104_v46  ;;  %v940_v46 = vld [vmem:[%s1402_s2] ss:$0 sm:$0xff] }
  0x2a   :  { %1011 = vmatprep.subr.bf16.mxu1 %v1106_v48 }
  0x2c   :  { %990 = vmatpush3.bf16.msra.mxu0 %v1105_v47 }
  0x2d   :  { %1012 = vmatpush3.bf16.msra.mxu1 %v1107_v49  ;;  %991 = vmatprep.subr.bf16.mxu0 %v1108_v50 }
  0x2e   :  { %1013 = vmatprep.subr.bf16.mxu1 %v1110_v52 }
  0x30   :  { %992 = vmatpush3.bf16.msra.mxu0 %v1109_v51 }
  0x31   :  { %1014 = vmatpush3.bf16.msra.mxu1 %v1111_v53  ;;  %993 = vmatprep.subr.bf16.mxu0 %v1112_v54 }
  0x32   :  { %1015 = vmatprep.subr.bf16.mxu1 %v1114_v56 }
  0x34   :  { %994 = vmatpush3.bf16.msra.mxu0 %v1113_v55 }
  0x35   :  { %1016 = vmatpush3.bf16.msra.mxu1 %v1115_v57  ;;  %995 = vmatprep.subr.bf16.mxu0 %v1116_v58 }
  0x36   :  { %1017 = vmatprep.subr.bf16.mxu1 %v1118_v60 }
  0x38   :  { %996 = vmatpush3.bf16.msra.mxu0 %v1117_v59 }
  0x39   :  { %1018 = vmatpush3.bf16.msra.mxu1 %v1119_v61  ;;  %997 = vmatprep.subr.bf16.mxu0 %v1120_v62 }
  0x3a   :  { %1019 = vmatprep.subr.bf16.mxu1 %v1122_v0 }
  0x3c   :  { %998 = vmatpush3.bf16.msra.mxu0 %v1121_v63 }
  0x3d   :  { %1020 = vmatpush3.bf16.msra.mxu1 %v1123_v1  ;;  %999 = vmatprep.subr.bf16.mxu0 %v1124_v2 }
  0x3e   :  { %1021 = vmatprep.subr.bf16.mxu1 %v1126_v4 }
  0x40   :  { %1000 = vmatpush3.bf16.msra.mxu0 %v1125_v3 }
  0x41   :  { %1022 = vmatpush3.bf16.msra.mxu1 %v1129_v7  ;;  %1038 = vmatprep.subr.bf16.mxu0 %v1141_v13 }
  0x43   :  { %741 = vmatmul.mubr.bf16.vlgmr.msra.gmra.mxu0 %v863_v8 }
  0x44   :  { %1039 = vmatpush3.bf16.msra.mxu0 %v1132_v12  ;;  %781 = vmatmul.mubr.bf16.vlgmr.msra.gmra.mxu1 %v865_v10 }
  0x45   :  { %1040 = vmatprep.subr.bf16.mxu0 %v1141_v13  ;;  %1054 = vmatprep.mubr.msk.bf16.mxu0 %vm1142_vm0, %v1141_v13 }
  0x48   :  { %1041 = vmatpush3.bf16.msra.mxu0 %v1133_v14 }
  0x49   :  { %1042 = vmatprep.subr.bf16.mxu0 %v1141_v13 }
  0x4c   :  { %1043 = vmatpush3.bf16.msra.mxu0 %v1134_v15 }
  0x4d   :  { %1044 = vmatprep.subr.bf16.mxu0 %v1141_v13 }
  0x50   :  { %1045 = vmatpush3.bf16.msra.mxu0 %v1135_v16 }
  0x51   :  { %1046 = vmatprep.subr.bf16.mxu0 %v1141_v13 }
  0x54   :  { %1047 = vmatpush3.bf16.msra.mxu0 %v1136_v17 }
  0x55   :  { %1048 = vmatprep.subr.bf16.mxu0 %v1141_v13 }
  0x58   :  { %1049 = vmatpush3.bf16.msra.mxu0 %v1137_v18 }
  0x59   :  { %1050 = vmatprep.subr.bf16.mxu0 %v1141_v13 }
  0x5c   :  { %1051 = vmatpush3.bf16.msra.mxu0 %v1138_v19 }
  0x5d   :  { %1052 = vmatprep.subr.bf16.mxu0 %v1141_v13 }
  0x60   :  { %1053 = vmatpush3.bf16.msra.mxu0 %v1139_v20 }
  0x63   :  { %1055 = vmatmul.mubr.bf16.vlgmr.msra.gmra.mxu0 %v1140_v21 }
  0xe3   :  { %v957_v22 = vpop.f32.mrf.mxu0 }
  0xe4   :  { %v979_v23 = vpop.f32.mrf.mxu1 }
  0xe5   :  { %v958_v24 = vpop.f32.mrf.mxu0 }
  0xe6   :  { %v980_v25 = vpop.f32.mrf.mxu1  ;;  %v959_v38 = vadd.f32 %v958_v24, %v957_v22 }
  0xe7   :  { %v960_v26 = vpop.f32.mrf.mxu0  ;;  %v981_v39 = vadd.f32 %v980_v25, %v979_v23 }
  0xe8   :  { %v982_v27 = vpop.f32.mrf.mxu1 }
  0xe9   :  { %v961_v28 = vpop.f32.mrf.mxu0  ;;  %v703_v41 = vadd.f32 %v981_v39, %v959_v38 }
  0xea   :  { %v983_v29 = vpop.f32.mrf.mxu1 }
 0x103   :  { %v1001_v30 = vpop.f32.mrf.mxu0 }
 0x104   :  { %v1023_v31 = vpop.f32.mrf.mxu1 }
 0x105   :  { %v1002_v32 = vpop.f32.mrf.mxu0 }
 0x106   :  { %v1024_v33 = vpop.f32.mrf.mxu1  ;;  %v1003_v40 = vadd.f32 %v1002_v32, %v1001_v30 }
 0x107   :  { %v1004_v34 = vpop.f32.mrf.mxu0  ;;  %v1025_v43 = vadd.f32 %v1024_v33, %v1023_v31 }
 0x108   :  { %v1026_v35 = vpop.f32.mrf.mxu1  ;;  %v743_v42 = vadd.f32 %v1003_v40, %v703_v41 }
 0x109   :  { %v1005_v36 = vpop.f32.mrf.mxu0 }
 0x10a   :  { %v1027_v37 = vpop.f32.mrf.mxu1  ;;  %v783_v44 = vadd.f32 %v1025_v43, %v743_v42 }
 0x123   :  { %v822_v45 = vpop.f32.mrf.mxu0 }
 0x124   :  { %v823_v47 = vadd.f32 %v822_v45, %v783_v44 }
 0x125   :  { %v1056_v48 = vpop.f32.mrf.mxu0 }
 0x126   :  { %v851_v49 = vadd.f32 %v940_v46, %v823_v47 }
 0x127   :  { %v825_v50 = vpop.f32.mrf.mxu0 }
 0x128   :  { %v852_v51 = vmax.f32 %v851_v49, 0.0 }
 0x129   :  { %v1057_v52 = vpop.f32.mrf.mxu0 }
 0x12a   :  { %v853_v53 = vpack.c.bf16 %v852_v51, %v852_v51 }
 0x12c   :  { %854 = vst [vmem:[%s1403_s3] sm:$0xf] %v853_v53 }

// kernel: encoder_forward.107
= control target key start
LH: loop header
LB: loop body
LE: loop exit
PB: predicated region body
PF: predicated region fallthrough
CT: control target
= control target key end

     0   :  { %s90_s0 = inlined_call_operand.vmem [shape: bf16[2,1,512], index: 0, kind: input, shape index: {}]   ;;  %s91_s1 = inlined_call_operand.hbm [shape: f32[2,512], index: 1, kind: output, shape index: {}]  }
   0x1   :  { %v47_v0 = vld [vmem:[%s90_s0] sm:$0xff]  }
   0x2   :  { %v48_v1 = vunpack.c.l.bf16 %v47_v0  ;;  %v49_v2 = vunpack.c.h.bf16 %v47_v0 }
   0x3   :  { %6 = vsyncpa [#allocation3], 0  ;;  %vm22_vm0 = vcmask 1041409   ;;  %vm24_vm1 = vcmask 1043459   ;;  %vm26_vm2 = vcmask 1045509   ;;  %s73_s8 = smov [#allocation2]  }
   0x4   :  { %v21_v3 = vrot.slane %v49_v2, 7  ;;  %s38_s9 = sshll.u32 %s73_s8, 4  ;;  %vm28_vm3 = vcmask 1047559   ;;  %s39_s9 = int_to_ptr.vmem [resolvable:$true] %s38_s9 }
   0x5   :  { %s51_s10 = scalar_lea.vmem %s39_s9, 128  ;;  %p56_p1 = scmp.lt.s32.totalorder %s39_s9, %s39_s9 }
   0x6   :  { %v23_v4 = vsel %vm22_vm0, %v21_v3, %v48_v1  ;;  %p52_p0 = scmp.ne.s32.totalorder %s39_s9, %s51_s10  ;;  %p57_p2 = scmp.lt.s32.totalorder %s51_s10, %s51_s10 }
   0x7   :  { %v25_v5 = vsel %vm24_vm1, %v21_v3, %v23_v4 }
   0x8   :  { %v27_v6 = vsel %vm26_vm2, %v21_v3, %v25_v5  ;;  %p58_p3 = por %p57_p2, %p56_p1 }
   0x9   :  { %v29_v7 = vsel %vm28_vm3, %v21_v3, %v27_v6 }
   0xa   :  { %31 = vst [vmem:[#allocation2] sm:$0xff] %v29_v7  ;;  %p59_p4 = pnand %p58_p3, %p52_p0 }
   0xc   :  { %62 = shalt.err (!%p59_p4)
}
   0xd   :  { %41 = dma.vmem_to_hbm [thread:$0]  %s39_s9, 128, %s91_s1, [#allocation3]  }
   0xe   :  { %71 = dma.done.wait [#allocation3], 128  }
   0xf   :  { %72 = vsyncadd [#allocation3], 4294967168 }
  0x10   :  { %45 = vsyncpa [#allocation3], 1 }

</bundles_post_ra>
